<compile_context>
chip_gen: v7x
topology: tpu7x:2x2x1
jax: 0.10.0
libtpu: 0.0.40
codegen_flags: <defaults>
</compile_context>

<pallas_src>
import functools

import jax
import jax.numpy as jnp
from jax.experimental import pallas as pl
from jax.experimental.pallas import tpu as pltpu

_CIN_PAD = 8  # pad the layer-1 input channels (3 -> 8): sublane friendly, K=72


def _convnet_kernel(x_ref, w1_ref, w2_ref, w3_ref, w4_ref,
                    sb1_ref, sb2_ref, sb3_ref, sb4_ref,
                    o_ref,
                    p1_ref, p2_ref, p3_ref, p4_ref,
                    *, H, W, cin, c_mid, c_out):
    """Whole ConvNet forward for ONE image, fully VMEM-resident.

    x_ref   : (1, H, W, cin)        input image (channels zero-padded to cin)
    w*_ref  : (9*cin_l, cout_l)     bf16 im2col weights per layer
    sb*_ref : (2, cout_l)           row 0 = folded BN scale, row 1 = bias
    o_ref   : (1, 1, c_out)         global-average-pooled features
    p*_ref  : (h+2, w+2, c) f32     zero-padded activation scratch per layer
    """

    def conv_bn_relu(p_ref, h, w, ci, w_ref, sb_ref):
        # im2col: one (h*w, 9*ci) x (9*ci, cout) bf16 MXU matmul, f32 acc.
        xp = p_ref[...]                                    # (h+2, w+2, ci) f32
        taps = []
        for dy in range(3):
            for dx in range(3):
                taps.append(xp[dy:dy + h, dx:dx + w, :].reshape(h * w, ci))
        patch = jnp.concatenate(taps, axis=-1).astype(jnp.bfloat16)
        acc = jnp.dot(patch, w_ref[...], preferred_element_type=jnp.float32)
        # folded BatchNorm (eval mode) + ReLU
        return jnp.maximum(acc * sb_ref[0:1, :] + sb_ref[1:2, :], 0.0)

    def maxpool2_into(y, h, w, c, dst_ref):
        # MaxPool2d(2,2), then stage into next layer's zero-padded scratch.
        y4 = y.reshape(h // 2, 2, w // 2, 2, c)
        m = jnp.maximum(y4[:, 0], y4[:, 1])                 # (h/2, w/2, 2, c)
        pooled = jnp.maximum(m[:, :, 0], m[:, :, 1])        # (h/2, w/2, c)
        dst_ref[...] = jnp.zeros_like(dst_ref)              # zero halo
        dst_ref[1:h // 2 + 1, 1:w // 2 + 1, :] = pooled

    # Stage the input image into the zero-padded scratch (in-kernel pad=1).
    p1_ref[...] = jnp.zeros_like(p1_ref)
    p1_ref[1:H + 1, 1:W + 1, :] = x_ref[0]

    y = conv_bn_relu(p1_ref, H, W, cin, w1_ref, sb1_ref)          # (H*W, 64)
    maxpool2_into(y, H, W, c_mid, p2_ref)

    y = conv_bn_relu(p2_ref, H // 2, W // 2, c_mid, w2_ref, sb2_ref)
    maxpool2_into(y, H // 2, W // 2, c_mid, p3_ref)

    y = conv_bn_relu(p3_ref, H // 4, W // 4, c_mid, w3_ref, sb3_ref)
    maxpool2_into(y, H // 4, W // 4, c_mid, p4_ref)

    y = conv_bn_relu(p4_ref, H // 8, W // 8, c_mid, w4_ref, sb4_ref)
    # AdaptiveAvgPool2d(1): global mean over the remaining spatial positions.
    inv = 1.0 / float((H // 8) * (W // 8))
    avg = jnp.sum(y, axis=0) * inv                                   # (c_out,)
    o_ref[...] = avg.reshape(1, 1, c_out).astype(o_ref.dtype)


def _prepare_params(params, cin_pad):
    """HWIO weights -> (9*cin, cout) bf16 im2col matrices; stack (scale,bias)."""
    prepped = []
    for i, (w, scale, bias) in enumerate(params):
        kh, kw, cin, cout = w.shape
        if i == 0 and cin < cin_pad:
            w = jnp.pad(w, ((0, 0), (0, 0), (0, cin_pad - cin), (0, 0)))
            cin = cin_pad
        w_flat = w.reshape(kh * kw * cin, cout).astype(jnp.bfloat16)
        sb = jnp.stack([scale, bias]).astype(jnp.float32)          # (2, cout)
        prepped.append((w_flat, sb))
    return prepped


def convnet_forward(x_nchw, params):
    """Pallas implementation of ConvNet.forward.  x_nchw: (N, 3, H, W)."""
    N, C, H, W = x_nchw.shape
    assert H % 8 == 0 and W % 8 == 0, "need three MaxPool2d(2) stages"
    cin_pad = max(C, _CIN_PAD)

    x = jnp.transpose(x_nchw, (0, 2, 3, 1)).astype(jnp.float32)     # NHWC
    x = jnp.pad(x, ((0, 0), (0, 0), (0, 0), (0, cin_pad - C)))      # cin -> 8

    (w1, sb1), (w2, sb2), (w3, sb3), (w4, sb4) = _prepare_params(params,
                                                                 cin_pad)
    c_mid = sb1.shape[1]
    c_out = sb4.shape[1]

    kernel = functools.partial(_convnet_kernel, H=H, W=W, cin=cin_pad,
                               c_mid=c_mid, c_out=c_out)

    flops = 2 * N * (H * W * 9 * cin_pad * c_mid
                     + (H // 2) * (W // 2) * 9 * c_mid * c_mid
                     + (H // 4) * (W // 4) * 9 * c_mid * c_mid
                     + (H // 8) * (W // 8) * 9 * c_mid * c_out)
    operands = (x, w1, w2, w3, w4, sb1, sb2, sb3, sb4)
    bytes_accessed = int(sum(a.size * a.dtype.itemsize for a in operands)
                         + N * c_out * 4)

    const2 = lambda n: (0, 0)   # weights / scale-bias stay VMEM-resident
    out = pl.pallas_call(
        kernel,
        out_shape=jax.ShapeDtypeStruct((N, 1, c_out), jnp.float32),
        grid=(N,),
        in_specs=[
            pl.BlockSpec((1, H, W, cin_pad), lambda n: (n, 0, 0, 0)),
            pl.BlockSpec(w1.shape, const2),
            pl.BlockSpec(w2.shape, const2),
            pl.BlockSpec(w3.shape, const2),
            pl.BlockSpec(w4.shape, const2),
            pl.BlockSpec(sb1.shape, const2),
            pl.BlockSpec(sb2.shape, const2),
            pl.BlockSpec(sb3.shape, const2),
            pl.BlockSpec(sb4.shape, const2),
        ],
        out_specs=pl.BlockSpec((1, 1, c_out), lambda n: (n, 0, 0)),
        scratch_shapes=[
            pltpu.VMEM((H + 2, W + 2, cin_pad), jnp.float32),
            pltpu.VMEM((H // 2 + 2, W // 2 + 2, c_mid), jnp.float32),
            pltpu.VMEM((H // 4 + 2, W // 4 + 2, c_mid), jnp.float32),
            pltpu.VMEM((H // 8 + 2, W // 8 + 2, c_mid), jnp.float32),
        ],
        compiler_params=pltpu.CompilerParams(
            dimension_semantics=("parallel",),        # 1 image / TC on v7x
            vmem_limit_bytes=32 * 1024 * 1024),
        cost_estimate=pl.CostEstimate(flops=flops, transcendentals=0,
                                      bytes_accessed=bytes_accessed),
    )(*operands)
    return out.reshape(N, c_out)


def init_params(key, output_size=64):
    """Deterministic synthetic parameters for the 4 conv+BN blocks.

    BatchNorm is applied in eval (inference) mode; its statistics and affine
    params are folded with the conv bias into a per-channel (scale, bias).
    """
    channel_pairs = [(3, 64), (64, 64), (64, 64), (64, output_size)]
    eps = 1e-5
    params = []
    for cin, cout in channel_pairs:
        key, k1, k2, k3, k4, k5, k6 = jax.random.split(key, 7)
        w = 0.1 * jax.random.normal(k1, (3, 3, cin, cout), jnp.float32)   # HWIO
        b_conv = 0.05 * jax.random.normal(k2, (cout,), jnp.float32)
        gamma = 1.0 + 0.1 * jax.random.normal(k3, (cout,), jnp.float32)
        beta = 0.1 * jax.random.normal(k4, (cout,), jnp.float32)
        r_mean = 0.1 * jax.random.normal(k5, (cout,), jnp.float32)
        r_var = jnp.abs(1.0 + 0.1 * jax.random.normal(k6, (cout,), jnp.float32))
        scale = gamma / jnp.sqrt(r_var + eps)
        bias = (b_conv - r_mean) * scale + beta
        params.append((w, scale, bias))
    return params


def reference_forward(x_nchw, params):
    """Pure-JAX (f32, HIGHEST precision) reference for correctness checking."""
    x = jnp.transpose(x_nchw, (0, 2, 3, 1)).astype(jnp.float32)
    for i, (w, scale, bias) in enumerate(params):
        y = jax.lax.conv_general_dilated(
            x, w, window_strides=(1, 1), padding="SAME",
            dimension_numbers=("NHWC", "HWIO", "NHWC"),
            precision=jax.lax.Precision.HIGHEST)
        y = jnp.maximum(y * scale + bias, 0.0)
        if i < 3:
            y = jax.lax.reduce_window(y, -jnp.inf, jax.lax.max,
                                      (1, 2, 2, 1), (1, 2, 2, 1), "VALID")
        else:
            y = jnp.mean(y, axis=(1, 2))
        x = y
    return x.reshape(x.shape[0], -1)


if __name__ == "__main__":
    key = jax.random.PRNGKey(0)
    k_params, k_x = jax.random.split(key)

    output_size = 64
    params = init_params(k_params, output_size=output_size)

    # Small input consistent with the module: batch=2, channels=3, 16x16.
    # After 3 MaxPool(2): 16 -> 8 -> 4 -> 2; global avg-pool -> (2, 64).
    x = jax.random.normal(k_x, (2, 3, 16, 16), jnp.float32)

    fwd = jax.jit(convnet_forward)
    out = jax.block_until_ready(fwd(x, params))
    assert out.shape == (2, output_size), out.shape

    ref = jax.block_until_ready(reference_forward(x, params))
    # bf16 MXU inputs (f32 accumulation) across 4 chained layers -> slightly
    # looser tolerance than the pure-f32 version used.
    assert jnp.allclose(out, ref, atol=2e-2, rtol=2e-2), (
        float(jnp.max(jnp.abs(out - ref))))

    print("KERNEL_OK")
</pallas_src>

<mosaic_0001>
module attributes {stable_mosaic.version = 11 : i64} {
  func.func @_convnet_kernel(%arg0: i32, %arg1: memref<1x16x16x8xf32, #tpu.memory_space<vmem>>, %arg2: memref<72x64xbf16, #tpu.memory_space<vmem>>, %arg3: memref<576x64xbf16, #tpu.memory_space<vmem>>, %arg4: memref<576x64xbf16, #tpu.memory_space<vmem>>, %arg5: memref<576x64xbf16, #tpu.memory_space<vmem>>, %arg6: memref<2x64xf32, #tpu.memory_space<vmem>>, %arg7: memref<2x64xf32, #tpu.memory_space<vmem>>, %arg8: memref<2x64xf32, #tpu.memory_space<vmem>>, %arg9: memref<2x64xf32, #tpu.memory_space<vmem>>, %arg10: memref<1x1x64xf32, #tpu.memory_space<vmem>>, %arg11: memref<18x18x8xf32, #tpu.memory_space<vmem>>, %arg12: memref<10x10x64xf32, #tpu.memory_space<vmem>>, %arg13: memref<6x6x64xf32, #tpu.memory_space<vmem>>, %arg14: memref<4x4x64xf32, #tpu.memory_space<vmem>>) attributes {dimension_semantics = [#tpu.dimension_semantics<parallel>], iteration_bounds = array<i64: 2>, scalar_prefetch = 0 : i64, scratch_operands = 4 : i64, tpu.core_type = #tpu.core_type<tc>, window_params = [{transform_indices = @transform_0, window_bounds = array<i64: 1, 16, 16, 8>}, {pipeline_mode = #tpu.pipeline_mode<synchronous>, transform_indices = @transform_1, window_bounds = array<i64: 72, 64>}, {pipeline_mode = #tpu.pipeline_mode<synchronous>, transform_indices = @transform_2, window_bounds = array<i64: 576, 64>}, {pipeline_mode = #tpu.pipeline_mode<synchronous>, transform_indices = @transform_3, window_bounds = array<i64: 576, 64>}, {pipeline_mode = #tpu.pipeline_mode<synchronous>, transform_indices = @transform_4, window_bounds = array<i64: 576, 64>}, {pipeline_mode = #tpu.pipeline_mode<synchronous>, transform_indices = @transform_5, window_bounds = array<i64: 2, 64>}, {pipeline_mode = #tpu.pipeline_mode<synchronous>, transform_indices = @transform_6, window_bounds = array<i64: 2, 64>}, {pipeline_mode = #tpu.pipeline_mode<synchronous>, transform_indices = @transform_7, window_bounds = array<i64: 2, 64>}, {pipeline_mode = #tpu.pipeline_mode<synchronous>, transform_indices = @transform_8, window_bounds = array<i64: 2, 64>}, {transform_indices = @transform_9, window_bounds = array<i64: 1, 1, 64>}]} {
    %cst = arith.constant 0.000000e+00 : f32
    %0 = vector.broadcast %cst : f32 to vector<18x18x8xf32>
    %c0 = arith.constant 0 : index
    %c0_0 = arith.constant 0 : index
    %c0_1 = arith.constant 0 : index
    %1 = vector.load %arg11[%c0, %c0_0, %c0_1] : memref<18x18x8xf32, #tpu.memory_space<vmem>>, vector<18x18x8xf32>
    tpu.vector_store %arg11[%c0, %c0_0, %c0_1], %0 {strides = array<i32>} : memref<18x18x8xf32, #tpu.memory_space<vmem>>, vector<18x18x8xf32>,
    %c0_2 = arith.constant 0 : index
    %c0_3 = arith.constant 0 : index
    %c0_4 = arith.constant 0 : index
    %c0_5 = arith.constant 0 : index
    %2 = vector.load %arg1[%c0_2, %c0_3, %c0_4, %c0_5] : memref<1x16x16x8xf32, #tpu.memory_space<vmem>>, vector<1x16x16x8xf32>
    %3 = vector.shape_cast %2 : vector<1x16x16x8xf32> to vector<16x16x8xf32>
    %c1 = arith.constant 1 : index
    %c1_6 = arith.constant 1 : index
    %c0_7 = arith.constant 0 : index
    %4 = vector.load %arg11[%c1, %c1_6, %c0_7] : memref<18x18x8xf32, #tpu.memory_space<vmem>>, vector<16x16x8xf32>
    tpu.vector_store %arg11[%c1, %c1_6, %c0_7], %3 {strides = array<i32>} : memref<18x18x8xf32, #tpu.memory_space<vmem>>, vector<16x16x8xf32>,
    %c0_8 = arith.constant 0 : index
    %c0_9 = arith.constant 0 : index
    %c0_10 = arith.constant 0 : index
    %5 = vector.load %arg11[%c0_8, %c0_9, %c0_10] : memref<18x18x8xf32, #tpu.memory_space<vmem>>, vector<18x18x8xf32>
    %6 = vector.extract_strided_slice %5 {offsets = [0, 0, 0], sizes = [16, 16, 8], strides = [1, 1, 1]} : vector<18x18x8xf32> to vector<16x16x8xf32>
    %7 = vector.shape_cast %6 : vector<16x16x8xf32> to vector<256x8xf32>
    %8 = vector.extract_strided_slice %5 {offsets = [0, 1, 0], sizes = [16, 16, 8], strides = [1, 1, 1]} : vector<18x18x8xf32> to vector<16x16x8xf32>
    %9 = vector.shape_cast %8 : vector<16x16x8xf32> to vector<256x8xf32>
    %10 = vector.extract_strided_slice %5 {offsets = [0, 2, 0], sizes = [16, 16, 8], strides = [1, 1, 1]} : vector<18x18x8xf32> to vector<16x16x8xf32>
    %11 = vector.shape_cast %10 : vector<16x16x8xf32> to vector<256x8xf32>
    %12 = vector.extract_strided_slice %5 {offsets = [1, 0, 0], sizes = [16, 16, 8], strides = [1, 1, 1]} : vector<18x18x8xf32> to vector<16x16x8xf32>
    %13 = vector.shape_cast %12 : vector<16x16x8xf32> to vector<256x8xf32>
    %14 = vector.extract_strided_slice %5 {offsets = [1, 1, 0], sizes = [16, 16, 8], strides = [1, 1, 1]} : vector<18x18x8xf32> to vector<16x16x8xf32>
    %15 = vector.shape_cast %14 : vector<16x16x8xf32> to vector<256x8xf32>
    %16 = vector.extract_strided_slice %5 {offsets = [1, 2, 0], sizes = [16, 16, 8], strides = [1, 1, 1]} : vector<18x18x8xf32> to vector<16x16x8xf32>
    %17 = vector.shape_cast %16 : vector<16x16x8xf32> to vector<256x8xf32>
    %18 = vector.extract_strided_slice %5 {offsets = [2, 0, 0], sizes = [16, 16, 8], strides = [1, 1, 1]} : vector<18x18x8xf32> to vector<16x16x8xf32>
    %19 = vector.shape_cast %18 : vector<16x16x8xf32> to vector<256x8xf32>
    %20 = vector.extract_strided_slice %5 {offsets = [2, 1, 0], sizes = [16, 16, 8], strides = [1, 1, 1]} : vector<18x18x8xf32> to vector<16x16x8xf32>
    %21 = vector.shape_cast %20 : vector<16x16x8xf32> to vector<256x8xf32>
    %22 = vector.extract_strided_slice %5 {offsets = [2, 2, 0], sizes = [16, 16, 8], strides = [1, 1, 1]} : vector<18x18x8xf32> to vector<16x16x8xf32>
    %23 = vector.shape_cast %22 : vector<16x16x8xf32> to vector<256x8xf32>
    %24 = tpu.concatenate %7, %9, %11, %13, %15, %17, %19, %21, %23 in 1 : vector<256x8xf32>, vector<256x8xf32>, vector<256x8xf32>, vector<256x8xf32>, vector<256x8xf32>, vector<256x8xf32>, vector<256x8xf32>, vector<256x8xf32>, vector<256x8xf32> -> vector<256x72xf32>
    %25 = arith.truncf %24 : vector<256x72xf32> to vector<256x72xbf16>
    %c0_11 = arith.constant 0 : index
    %c0_12 = arith.constant 0 : index
    %26 = vector.load %arg2[%c0_11, %c0_12] : memref<72x64xbf16, #tpu.memory_space<vmem>>, vector<72x64xbf16>
    %cst_13 = arith.constant dense<0.000000e+00> : vector<256x64xf32>
    %27 = tpu.matmul %25, %26, %cst_13 {dimension_numbers = #tpu.dot_dimension_numbers<[1], [0], [0], [1], [0, 0, 1, 1], [], []>} : vector<256x72xbf16>, vector<72x64xbf16>, vector<256x64xf32> -> vector<256x64xf32>
    %c0_14 = arith.constant 0 : index
    %c0_15 = arith.constant 0 : index
    %28 = vector.load %arg6[%c0_14, %c0_15] : memref<2x64xf32, #tpu.memory_space<vmem>>, vector<1x64xf32>
    %29 = vector.broadcast %28 : vector<1x64xf32> to vector<256x64xf32>
    %30 = arith.mulf %27, %29 : vector<256x64xf32>
    %c1_16 = arith.constant 1 : index
    %c0_17 = arith.constant 0 : index
    %31 = vector.load %arg6[%c1_16, %c0_17] : memref<2x64xf32, #tpu.memory_space<vmem>>, vector<1x64xf32>
    %32 = vector.broadcast %31 : vector<1x64xf32> to vector<256x64xf32>
    %33 = arith.addf %30, %32 : vector<256x64xf32>
    %cst_18 = arith.constant 0.000000e+00 : f32
    %34 = vector.broadcast %cst_18 : f32 to vector<256x64xf32>
    %35 = arith.maximumf %33, %34 : vector<256x64xf32>
    %36 = vector.shape_cast %35 : vector<256x64xf32> to vector<8x2x8x2x64xf32>
    %37 = vector.extract_strided_slice %36 {offsets = [0, 0, 0, 0, 0], sizes = [8, 1, 8, 2, 64], strides = [1, 1, 1, 1, 1]} : vector<8x2x8x2x64xf32> to vector<8x1x8x2x64xf32>
    %38 = vector.shape_cast %37 : vector<8x1x8x2x64xf32> to vector<8x8x2x64xf32>
    %39 = vector.extract_strided_slice %36 {offsets = [0, 1, 0, 0, 0], sizes = [8, 1, 8, 2, 64], strides = [1, 1, 1, 1, 1]} : vector<8x2x8x2x64xf32> to vector<8x1x8x2x64xf32>
    %40 = vector.shape_cast %39 : vector<8x1x8x2x64xf32> to vector<8x8x2x64xf32>
    %41 = arith.maximumf %38, %40 : vector<8x8x2x64xf32>
    %42 = vector.extract_strided_slice %41 {offsets = [0, 0, 0, 0], sizes = [8, 8, 1, 64], strides = [1, 1, 1, 1]} : vector<8x8x2x64xf32> to vector<8x8x1x64xf32>
    %43 = vector.shape_cast %42 : vector<8x8x1x64xf32> to vector<8x8x64xf32>
    %44 = vector.extract_strided_slice %41 {offsets = [0, 0, 1, 0], sizes = [8, 8, 1, 64], strides = [1, 1, 1, 1]} : vector<8x8x2x64xf32> to vector<8x8x1x64xf32>
    %45 = vector.shape_cast %44 : vector<8x8x1x64xf32> to vector<8x8x64xf32>
    %46 = arith.maximumf %43, %45 : vector<8x8x64xf32>
    %cst_19 = arith.constant 0.000000e+00 : f32
    %47 = vector.broadcast %cst_19 : f32 to vector<10x10x64xf32>
    %c0_20 = arith.constant 0 : index
    %c0_21 = arith.constant 0 : index
    %c0_22 = arith.constant 0 : index
    %48 = vector.load %arg12[%c0_20, %c0_21, %c0_22] : memref<10x10x64xf32, #tpu.memory_space<vmem>>, vector<10x10x64xf32>
    tpu.vector_store %arg12[%c0_20, %c0_21, %c0_22], %47 {strides = array<i32>} : memref<10x10x64xf32, #tpu.memory_space<vmem>>, vector<10x10x64xf32>,
    %c1_23 = arith.constant 1 : index
    %c1_24 = arith.constant 1 : index
    %c0_25 = arith.constant 0 : index
    %49 = vector.load %arg12[%c1_23, %c1_24, %c0_25] : memref<10x10x64xf32, #tpu.memory_space<vmem>>, vector<8x8x64xf32>
    tpu.vector_store %arg12[%c1_23, %c1_24, %c0_25], %46 {strides = array<i32>} : memref<10x10x64xf32, #tpu.memory_space<vmem>>, vector<8x8x64xf32>,
    %c0_26 = arith.constant 0 : index
    %c0_27 = arith.constant 0 : index
    %c0_28 = arith.constant 0 : index
    %50 = vector.load %arg12[%c0_26, %c0_27, %c0_28] : memref<10x10x64xf32, #tpu.memory_space<vmem>>, vector<10x10x64xf32>
    %51 = vector.extract_strided_slice %50 {offsets = [0, 0, 0], sizes = [8, 8, 64], strides = [1, 1, 1]} : vector<10x10x64xf32> to vector<8x8x64xf32>
    %52 = vector.shape_cast %51 : vector<8x8x64xf32> to vector<64x64xf32>
    %53 = vector.extract_strided_slice %50 {offsets = [0, 1, 0], sizes = [8, 8, 64], strides = [1, 1, 1]} : vector<10x10x64xf32> to vector<8x8x64xf32>
    %54 = vector.shape_cast %53 : vector<8x8x64xf32> to vector<64x64xf32>
    %55 = vector.extract_strided_slice %50 {offsets = [0, 2, 0], sizes = [8, 8, 64], strides = [1, 1, 1]} : vector<10x10x64xf32> to vector<8x8x64xf32>
    %56 = vector.shape_cast %55 : vector<8x8x64xf32> to vector<64x64xf32>
    %57 = vector.extract_strided_slice %50 {offsets = [1, 0, 0], sizes = [8, 8, 64], strides = [1, 1, 1]} : vector<10x10x64xf32> to vector<8x8x64xf32>
    %58 = vector.shape_cast %57 : vector<8x8x64xf32> to vector<64x64xf32>
    %59 = vector.extract_strided_slice %50 {offsets = [1, 1, 0], sizes = [8, 8, 64], strides = [1, 1, 1]} : vector<10x10x64xf32> to vector<8x8x64xf32>
    %60 = vector.shape_cast %59 : vector<8x8x64xf32> to vector<64x64xf32>
    %61 = vector.extract_strided_slice %50 {offsets = [1, 2, 0], sizes = [8, 8, 64], strides = [1, 1, 1]} : vector<10x10x64xf32> to vector<8x8x64xf32>
    %62 = vector.shape_cast %61 : vector<8x8x64xf32> to vector<64x64xf32>
    %63 = vector.extract_strided_slice %50 {offsets = [2, 0, 0], sizes = [8, 8, 64], strides = [1, 1, 1]} : vector<10x10x64xf32> to vector<8x8x64xf32>
    %64 = vector.shape_cast %63 : vector<8x8x64xf32> to vector<64x64xf32>
    %65 = vector.extract_strided_slice %50 {offsets = [2, 1, 0], sizes = [8, 8, 64], strides = [1, 1, 1]} : vector<10x10x64xf32> to vector<8x8x64xf32>
    %66 = vector.shape_cast %65 : vector<8x8x64xf32> to vector<64x64xf32>
    %67 = vector.extract_strided_slice %50 {offsets = [2, 2, 0], sizes = [8, 8, 64], strides = [1, 1, 1]} : vector<10x10x64xf32> to vector<8x8x64xf32>
    %68 = vector.shape_cast %67 : vector<8x8x64xf32> to vector<64x64xf32>
    %69 = tpu.concatenate %52, %54, %56, %58, %60, %62, %64, %66, %68 in 1 : vector<64x64xf32>, vector<64x64xf32>, vector<64x64xf32>, vector<64x64xf32>, vector<64x64xf32>, vector<64x64xf32>, vector<64x64xf32>, vector<64x64xf32>, vector<64x64xf32> -> vector<64x576xf32>
    %70 = arith.truncf %69 : vector<64x576xf32> to vector<64x576xbf16>
    %c0_29 = arith.constant 0 : index
    %c0_30 = arith.constant 0 : index
    %71 = vector.load %arg3[%c0_29, %c0_30] : memref<576x64xbf16, #tpu.memory_space<vmem>>, vector<576x64xbf16>
    %cst_31 = arith.constant dense<0.000000e+00> : vector<64x64xf32>
    %72 = tpu.matmul %70, %71, %cst_31 {dimension_numbers = #tpu.dot_dimension_numbers<[1], [0], [0], [1], [0, 0, 1, 1], [], []>} : vector<64x576xbf16>, vector<576x64xbf16>, vector<64x64xf32> -> vector<64x64xf32>
    %c0_32 = arith.constant 0 : index
    %c0_33 = arith.constant 0 : index
    %73 = vector.load %arg7[%c0_32, %c0_33] : memref<2x64xf32, #tpu.memory_space<vmem>>, vector<1x64xf32>
    %74 = vector.broadcast %73 : vector<1x64xf32> to vector<64x64xf32>
    %75 = arith.mulf %72, %74 : vector<64x64xf32>
    %c1_34 = arith.constant 1 : index
    %c0_35 = arith.constant 0 : index
    %76 = vector.load %arg7[%c1_34, %c0_35] : memref<2x64xf32, #tpu.memory_space<vmem>>, vector<1x64xf32>
    %77 = vector.broadcast %76 : vector<1x64xf32> to vector<64x64xf32>
    %78 = arith.addf %75, %77 : vector<64x64xf32>
    %cst_36 = arith.constant 0.000000e+00 : f32
    %79 = vector.broadcast %cst_36 : f32 to vector<64x64xf32>
    %80 = arith.maximumf %78, %79 : vector<64x64xf32>
    %81 = vector.shape_cast %80 : vector<64x64xf32> to vector<4x2x4x2x64xf32>
    %82 = vector.extract_strided_slice %81 {offsets = [0, 0, 0, 0, 0], sizes = [4, 1, 4, 2, 64], strides = [1, 1, 1, 1, 1]} : vector<4x2x4x2x64xf32> to vector<4x1x4x2x64xf32>
    %83 = vector.shape_cast %82 : vector<4x1x4x2x64xf32> to vector<4x4x2x64xf32>
    %84 = vector.extract_strided_slice %81 {offsets = [0, 1, 0, 0, 0], sizes = [4, 1, 4, 2, 64], strides = [1, 1, 1, 1, 1]} : vector<4x2x4x2x64xf32> to vector<4x1x4x2x64xf32>
    %85 = vector.shape_cast %84 : vector<4x1x4x2x64xf32> to vector<4x4x2x64xf32>
    %86 = arith.maximumf %83, %85 : vector<4x4x2x64xf32>
    %87 = vector.extract_strided_slice %86 {offsets = [0, 0, 0, 0], sizes = [4, 4, 1, 64], strides = [1, 1, 1, 1]} : vector<4x4x2x64xf32> to vector<4x4x1x64xf32>
    %88 = vector.shape_cast %87 : vector<4x4x1x64xf32> to vector<4x4x64xf32>
    %89 = vector.extract_strided_slice %86 {offsets = [0, 0, 1, 0], sizes = [4, 4, 1, 64], strides = [1, 1, 1, 1]} : vector<4x4x2x64xf32> to vector<4x4x1x64xf32>
    %90 = vector.shape_cast %89 : vector<4x4x1x64xf32> to vector<4x4x64xf32>
    %91 = arith.maximumf %88, %90 : vector<4x4x64xf32>
    %cst_37 = arith.constant 0.000000e+00 : f32
    %92 = vector.broadcast %cst_37 : f32 to vector<6x6x64xf32>
    %c0_38 = arith.constant 0 : index
    %c0_39 = arith.constant 0 : index
    %c0_40 = arith.constant 0 : index
    %93 = vector.load %arg13[%c0_38, %c0_39, %c0_40] : memref<6x6x64xf32, #tpu.memory_space<vmem>>, vector<6x6x64xf32>
    tpu.vector_store %arg13[%c0_38, %c0_39, %c0_40], %92 {strides = array<i32>} : memref<6x6x64xf32, #tpu.memory_space<vmem>>, vector<6x6x64xf32>,
    %c1_41 = arith.constant 1 : index
    %c1_42 = arith.constant 1 : index
    %c0_43 = arith.constant 0 : index
    %94 = vector.load %arg13[%c1_41, %c1_42, %c0_43] : memref<6x6x64xf32, #tpu.memory_space<vmem>>, vector<4x4x64xf32>
    tpu.vector_store %arg13[%c1_41, %c1_42, %c0_43], %91 {strides = array<i32>} : memref<6x6x64xf32, #tpu.memory_space<vmem>>, vector<4x4x64xf32>,
    %c0_44 = arith.constant 0 : index
    %c0_45 = arith.constant 0 : index
    %c0_46 = arith.constant 0 : index
    %95 = vector.load %arg13[%c0_44, %c0_45, %c0_46] : memref<6x6x64xf32, #tpu.memory_space<vmem>>, vector<6x6x64xf32>
    %96 = vector.extract_strided_slice %95 {offsets = [0, 0, 0], sizes = [4, 4, 64], strides = [1, 1, 1]} : vector<6x6x64xf32> to vector<4x4x64xf32>
    %97 = vector.shape_cast %96 : vector<4x4x64xf32> to vector<16x64xf32>
    %98 = vector.extract_strided_slice %95 {offsets = [0, 1, 0], sizes = [4, 4, 64], strides = [1, 1, 1]} : vector<6x6x64xf32> to vector<4x4x64xf32>
    %99 = vector.shape_cast %98 : vector<4x4x64xf32> to vector<16x64xf32>
    %100 = vector.extract_strided_slice %95 {offsets = [0, 2, 0], sizes = [4, 4, 64], strides = [1, 1, 1]} : vector<6x6x64xf32> to vector<4x4x64xf32>
    %101 = vector.shape_cast %100 : vector<4x4x64xf32> to vector<16x64xf32>
    %102 = vector.extract_strided_slice %95 {offsets = [1, 0, 0], sizes = [4, 4, 64], strides = [1, 1, 1]} : vector<6x6x64xf32> to vector<4x4x64xf32>
    %103 = vector.shape_cast %102 : vector<4x4x64xf32> to vector<16x64xf32>
    %104 = vector.extract_strided_slice %95 {offsets = [1, 1, 0], sizes = [4, 4, 64], strides = [1, 1, 1]} : vector<6x6x64xf32> to vector<4x4x64xf32>
    %105 = vector.shape_cast %104 : vector<4x4x64xf32> to vector<16x64xf32>
    %106 = vector.extract_strided_slice %95 {offsets = [1, 2, 0], sizes = [4, 4, 64], strides = [1, 1, 1]} : vector<6x6x64xf32> to vector<4x4x64xf32>
    %107 = vector.shape_cast %106 : vector<4x4x64xf32> to vector<16x64xf32>
    %108 = vector.extract_strided_slice %95 {offsets = [2, 0, 0], sizes = [4, 4, 64], strides = [1, 1, 1]} : vector<6x6x64xf32> to vector<4x4x64xf32>
    %109 = vector.shape_cast %108 : vector<4x4x64xf32> to vector<16x64xf32>
    %110 = vector.extract_strided_slice %95 {offsets = [2, 1, 0], sizes = [4, 4, 64], strides = [1, 1, 1]} : vector<6x6x64xf32> to vector<4x4x64xf32>
    %111 = vector.shape_cast %110 : vector<4x4x64xf32> to vector<16x64xf32>
    %112 = vector.extract_strided_slice %95 {offsets = [2, 2, 0], sizes = [4, 4, 64], strides = [1, 1, 1]} : vector<6x6x64xf32> to vector<4x4x64xf32>
    %113 = vector.shape_cast %112 : vector<4x4x64xf32> to vector<16x64xf32>
    %114 = tpu.concatenate %97, %99, %101, %103, %105, %107, %109, %111, %113 in 1 : vector<16x64xf32>, vector<16x64xf32>, vector<16x64xf32>, vector<16x64xf32>, vector<16x64xf32>, vector<16x64xf32>, vector<16x64xf32>, vector<16x64xf32>, vector<16x64xf32> -> vector<16x576xf32>
    %115 = arith.truncf %114 : vector<16x576xf32> to vector<16x576xbf16>
    %c0_47 = arith.constant 0 : index
    %c0_48 = arith.constant 0 : index
    %116 = vector.load %arg4[%c0_47, %c0_48] : memref<576x64xbf16, #tpu.memory_space<vmem>>, vector<576x64xbf16>
    %cst_49 = arith.constant dense<0.000000e+00> : vector<16x64xf32>
    %117 = tpu.matmul %115, %116, %cst_49 {dimension_numbers = #tpu.dot_dimension_numbers<[1], [0], [0], [1], [0, 0, 1, 1], [], []>} : vector<16x576xbf16>, vector<576x64xbf16>, vector<16x64xf32> -> vector<16x64xf32>
    %c0_50 = arith.constant 0 : index
    %c0_51 = arith.constant 0 : index
    %118 = vector.load %arg8[%c0_50, %c0_51] : memref<2x64xf32, #tpu.memory_space<vmem>>, vector<1x64xf32>
    %119 = vector.broadcast %118 : vector<1x64xf32> to vector<16x64xf32>
    %120 = arith.mulf %117, %119 : vector<16x64xf32>
    %c1_52 = arith.constant 1 : index
    %c0_53 = arith.constant 0 : index
    %121 = vector.load %arg8[%c1_52, %c0_53] : memref<2x64xf32, #tpu.memory_space<vmem>>, vector<1x64xf32>
    %122 = vector.broadcast %121 : vector<1x64xf32> to vector<16x64xf32>
    %123 = arith.addf %120, %122 : vector<16x64xf32>
    %cst_54 = arith.constant 0.000000e+00 : f32
    %124 = vector.broadcast %cst_54 : f32 to vector<16x64xf32>
    %125 = arith.maximumf %123, %124 : vector<16x64xf32>
    %126 = vector.shape_cast %125 : vector<16x64xf32> to vector<2x2x2x2x64xf32>
    %127 = vector.extract_strided_slice %126 {offsets = [0, 0, 0, 0, 0], sizes = [2, 1, 2, 2, 64], strides = [1, 1, 1, 1, 1]} : vector<2x2x2x2x64xf32> to vector<2x1x2x2x64xf32>
    %128 = vector.shape_cast %127 : vector<2x1x2x2x64xf32> to vector<2x2x2x64xf32>
    %129 = vector.extract_strided_slice %126 {offsets = [0, 1, 0, 0, 0], sizes = [2, 1, 2, 2, 64], strides = [1, 1, 1, 1, 1]} : vector<2x2x2x2x64xf32> to vector<2x1x2x2x64xf32>
    %130 = vector.shape_cast %129 : vector<2x1x2x2x64xf32> to vector<2x2x2x64xf32>
    %131 = arith.maximumf %128, %130 : vector<2x2x2x64xf32>
    %132 = vector.extract_strided_slice %131 {offsets = [0, 0, 0, 0], sizes = [2, 2, 1, 64], strides = [1, 1, 1, 1]} : vector<2x2x2x64xf32> to vector<2x2x1x64xf32>
    %133 = vector.shape_cast %132 : vector<2x2x1x64xf32> to vector<2x2x64xf32>
    %134 = vector.extract_strided_slice %131 {offsets = [0, 0, 1, 0], sizes = [2, 2, 1, 64], strides = [1, 1, 1, 1]} : vector<2x2x2x64xf32> to vector<2x2x1x64xf32>
    %135 = vector.shape_cast %134 : vector<2x2x1x64xf32> to vector<2x2x64xf32>
    %136 = arith.maximumf %133, %135 : vector<2x2x64xf32>
    %cst_55 = arith.constant 0.000000e+00 : f32
    %137 = vector.broadcast %cst_55 : f32 to vector<4x4x64xf32>
    %c0_56 = arith.constant 0 : index
    %c0_57 = arith.constant 0 : index
    %c0_58 = arith.constant 0 : index
    %138 = vector.load %arg14[%c0_56, %c0_57, %c0_58] : memref<4x4x64xf32, #tpu.memory_space<vmem>>, vector<4x4x64xf32>
    tpu.vector_store %arg14[%c0_56, %c0_57, %c0_58], %137 {strides = array<i32>} : memref<4x4x64xf32, #tpu.memory_space<vmem>>, vector<4x4x64xf32>,
    %c1_59 = arith.constant 1 : index
    %c1_60 = arith.constant 1 : index
    %c0_61 = arith.constant 0 : index
    %139 = vector.load %arg14[%c1_59, %c1_60, %c0_61] : memref<4x4x64xf32, #tpu.memory_space<vmem>>, vector<2x2x64xf32>
    tpu.vector_store %arg14[%c1_59, %c1_60, %c0_61], %136 {strides = array<i32>} : memref<4x4x64xf32, #tpu.memory_space<vmem>>, vector<2x2x64xf32>,
    %c0_62 = arith.constant 0 : index
    %c0_63 = arith.constant 0 : index
    %c0_64 = arith.constant 0 : index
    %140 = vector.load %arg14[%c0_62, %c0_63, %c0_64] : memref<4x4x64xf32, #tpu.memory_space<vmem>>, vector<4x4x64xf32>
    %141 = vector.extract_strided_slice %140 {offsets = [0, 0, 0], sizes = [2, 2, 64], strides = [1, 1, 1]} : vector<4x4x64xf32> to vector<2x2x64xf32>
    %142 = vector.shape_cast %141 : vector<2x2x64xf32> to vector<4x64xf32>
    %143 = vector.extract_strided_slice %140 {offsets = [0, 1, 0], sizes = [2, 2, 64], strides = [1, 1, 1]} : vector<4x4x64xf32> to vector<2x2x64xf32>
    %144 = vector.shape_cast %143 : vector<2x2x64xf32> to vector<4x64xf32>
    %145 = vector.extract_strided_slice %140 {offsets = [0, 2, 0], sizes = [2, 2, 64], strides = [1, 1, 1]} : vector<4x4x64xf32> to vector<2x2x64xf32>
    %146 = vector.shape_cast %145 : vector<2x2x64xf32> to vector<4x64xf32>
    %147 = vector.extract_strided_slice %140 {offsets = [1, 0, 0], sizes = [2, 2, 64], strides = [1, 1, 1]} : vector<4x4x64xf32> to vector<2x2x64xf32>
    %148 = vector.shape_cast %147 : vector<2x2x64xf32> to vector<4x64xf32>
    %149 = vector.extract_strided_slice %140 {offsets = [1, 1, 0], sizes = [2, 2, 64], strides = [1, 1, 1]} : vector<4x4x64xf32> to vector<2x2x64xf32>
    %150 = vector.shape_cast %149 : vector<2x2x64xf32> to vector<4x64xf32>
    %151 = vector.extract_strided_slice %140 {offsets = [1, 2, 0], sizes = [2, 2, 64], strides = [1, 1, 1]} : vector<4x4x64xf32> to vector<2x2x64xf32>
    %152 = vector.shape_cast %151 : vector<2x2x64xf32> to vector<4x64xf32>
    %153 = vector.extract_strided_slice %140 {offsets = [2, 0, 0], sizes = [2, 2, 64], strides = [1, 1, 1]} : vector<4x4x64xf32> to vector<2x2x64xf32>
    %154 = vector.shape_cast %153 : vector<2x2x64xf32> to vector<4x64xf32>
    %155 = vector.extract_strided_slice %140 {offsets = [2, 1, 0], sizes = [2, 2, 64], strides = [1, 1, 1]} : vector<4x4x64xf32> to vector<2x2x64xf32>
    %156 = vector.shape_cast %155 : vector<2x2x64xf32> to vector<4x64xf32>
    %157 = vector.extract_strided_slice %140 {offsets = [2, 2, 0], sizes = [2, 2, 64], strides = [1, 1, 1]} : vector<4x4x64xf32> to vector<2x2x64xf32>
    %158 = vector.shape_cast %157 : vector<2x2x64xf32> to vector<4x64xf32>
    %159 = tpu.concatenate %142, %144, %146, %148, %150, %152, %154, %156, %158 in 1 : vector<4x64xf32>, vector<4x64xf32>, vector<4x64xf32>, vector<4x64xf32>, vector<4x64xf32>, vector<4x64xf32>, vector<4x64xf32>, vector<4x64xf32>, vector<4x64xf32> -> vector<4x576xf32>
    %160 = arith.truncf %159 : vector<4x576xf32> to vector<4x576xbf16>
    %c0_65 = arith.constant 0 : index
    %c0_66 = arith.constant 0 : index
    %161 = vector.load %arg5[%c0_65, %c0_66] : memref<576x64xbf16, #tpu.memory_space<vmem>>, vector<576x64xbf16>
    %cst_67 = arith.constant dense<0.000000e+00> : vector<4x64xf32>
    %162 = tpu.matmul %160, %161, %cst_67 {dimension_numbers = #tpu.dot_dimension_numbers<[1], [0], [0], [1], [0, 0, 1, 1], [], []>} : vector<4x576xbf16>, vector<576x64xbf16>, vector<4x64xf32> -> vector<4x64xf32>
    %c0_68 = arith.constant 0 : index
    %c0_69 = arith.constant 0 : index
    %163 = vector.load %arg9[%c0_68, %c0_69] : memref<2x64xf32, #tpu.memory_space<vmem>>, vector<1x64xf32>
    %164 = vector.broadcast %163 : vector<1x64xf32> to vector<4x64xf32>
    %165 = arith.mulf %162, %164 : vector<4x64xf32>
    %c1_70 = arith.constant 1 : index
    %c0_71 = arith.constant 0 : index
    %166 = vector.load %arg9[%c1_70, %c0_71] : memref<2x64xf32, #tpu.memory_space<vmem>>, vector<1x64xf32>
    %167 = vector.broadcast %166 : vector<1x64xf32> to vector<4x64xf32>
    %168 = arith.addf %165, %167 : vector<4x64xf32>
    %cst_72 = arith.constant 0.000000e+00 : f32
    %169 = vector.broadcast %cst_72 : f32 to vector<4x64xf32>
    %170 = arith.maximumf %168, %169 : vector<4x64xf32>
    %cst_73 = arith.constant dense<0.000000e+00> : vector<64xf32>
    %171 = vector.multi_reduction <add>, %170, %cst_73 [0] : vector<4x64xf32> to vector<64xf32>
    %cst_74 = arith.constant 2.500000e-01 : f32
    %172 = vector.broadcast %cst_74 : f32 to vector<64xf32>
    %173 = arith.mulf %171, %172 : vector<64xf32>
    %174 = vector.shape_cast %173 : vector<64xf32> to vector<1x1x64xf32>
    %c0_75 = arith.constant 0 : index
    %c0_76 = arith.constant 0 : index
    %c0_77 = arith.constant 0 : index
    %175 = vector.load %arg10[%c0_75, %c0_76, %c0_77] : memref<1x1x64xf32, #tpu.memory_space<vmem>>, vector<1x1x64xf32>
    tpu.vector_store %arg10[%c0_75, %c0_76, %c0_77], %174 {strides = array<i32>} : memref<1x1x64xf32, #tpu.memory_space<vmem>>, vector<1x1x64xf32>,
    return
  }
  func.func @transform_0(%arg0: i32) -> (i32, i32, i32, i32) {
    %c0_i32 = arith.constant 0 : i32
    %c0_i32_0 = arith.constant 0 : i32
    %c0_i32_1 = arith.constant 0 : i32
    %c0_i32_2 = arith.constant 0 : i32
    return %arg0, %c0_i32, %c0_i32_0, %c0_i32_1 : i32, i32, i32, i32
  }
  func.func @transform_1(%arg0: i32) -> (i32, i32) {
    %c0_i32 = arith.constant 0 : i32
    %c0_i32_0 = arith.constant 0 : i32
    %c0_i32_1 = arith.constant 0 : i32
    return %c0_i32, %c0_i32_0 : i32, i32
  }
  func.func @transform_2(%arg0: i32) -> (i32, i32) {
    %c0_i32 = arith.constant 0 : i32
    %c0_i32_0 = arith.constant 0 : i32
    %c0_i32_1 = arith.constant 0 : i32
    return %c0_i32, %c0_i32_0 : i32, i32
  }
  func.func @transform_3(%arg0: i32) -> (i32, i32) {
    %c0_i32 = arith.constant 0 : i32
    %c0_i32_0 = arith.constant 0 : i32
    %c0_i32_1 = arith.constant 0 : i32
    return %c0_i32, %c0_i32_0 : i32, i32
  }
  func.func @transform_4(%arg0: i32) -> (i32, i32) {
    %c0_i32 = arith.constant 0 : i32
    %c0_i32_0 = arith.constant 0 : i32
    %c0_i32_1 = arith.constant 0 : i32
    return %c0_i32, %c0_i32_0 : i32, i32
  }
  func.func @transform_5(%arg0: i32) -> (i32, i32) {
    %c0_i32 = arith.constant 0 : i32
    %c0_i32_0 = arith.constant 0 : i32
    %c0_i32_1 = arith.constant 0 : i32
    return %c0_i32, %c0_i32_0 : i32, i32
  }
  func.func @transform_6(%arg0: i32) -> (i32, i32) {
    %c0_i32 = arith.constant 0 : i32
    %c0_i32_0 = arith.constant 0 : i32
    %c0_i32_1 = arith.constant 0 : i32
    return %c0_i32, %c0_i32_0 : i32, i32
  }
  func.func @transform_7(%arg0: i32) -> (i32, i32) {
    %c0_i32 = arith.constant 0 : i32
    %c0_i32_0 = arith.constant 0 : i32
    %c0_i32_1 = arith.constant 0 : i32
    return %c0_i32, %c0_i32_0 : i32, i32
  }
  func.func @transform_8(%arg0: i32) -> (i32, i32) {
    %c0_i32 = arith.constant 0 : i32
    %c0_i32_0 = arith.constant 0 : i32
    %c0_i32_1 = arith.constant 0 : i32
    return %c0_i32, %c0_i32_0 : i32, i32
  }
  func.func @transform_9(%arg0: i32) -> (i32, i32, i32) {
    %c0_i32 = arith.constant 0 : i32
    %c0_i32_0 = arith.constant 0 : i32
    %c0_i32_1 = arith.constant 0 : i32
    return %arg0, %c0_i32, %c0_i32_0 : i32, i32, i32
  }
}

</mosaic_0001>

<bundles_post_ra>
// kernel: convnet_forward.1
= control target key start
LH: loop header
LB: loop body
LE: loop exit
PB: predicated region body
PF: predicated region fallthrough
CT: control target
= control target key end

     0   :  { %14 = vsyncpa [#allocation7], 0  ;;  %s10132_s0 = inlined_call_operand.vmem [shape: f32[2,16,16,8], index: 0, kind: input, shape index: {}]   ;;  %s10133_s1 = inlined_call_operand.vmem [shape: bf16[72,64], index: 1, kind: input, shape index: {}]   ;;  %s10134_s2 = inlined_call_operand.vmem [shape: bf16[576,64], index: 2, kind: input, shape index: {}]   ;;  %s10135_s3 = inlined_call_operand.vmem [shape: bf16[576,64], index: 3, kind: input, shape index: {}]   ;;  %s10136_s4 = inlined_call_operand.vmem [shape: bf16[576,64], index: 4, kind: input, shape index: {}]   ;;  %s10137_s5 = inlined_call_operand.vmem [shape: f32[2,64], index: 5, kind: input, shape index: {}]   ;;  %s10138_s6 = inlined_call_operand.vmem [shape: f32[2,64], index: 6, kind: input, shape index: {}]   ;;  %s10139_s7 = inlined_call_operand.vmem [shape: f32[2,64], index: 7, kind: input, shape index: {}]   ;;  %s10140_s8 = inlined_call_operand.vmem [shape: f32[2,64], index: 8, kind: input, shape index: {}]   ;;  %s10141_s9 = inlined_call_operand.hbm [shape: f32[2,1,64], index: 9, kind: output, shape index: {}]  }
   0x1   :  { %16 = vsyncpa [#allocation7 + $0x1], 0  ;;  %s7734_s30 = smov 0   ;;  %s7736_s10 = smov 0  }
   0x2   :  { %s7738_s11 = smov 0   ;;  %s7740_s12 = smov 0  }
   0x3 LB: > { %s7755_s13 = sadd.s32 4294967295, %s7670_s12   ;;  %s6120_s14 = sadd.s32 4294967294, %s7670_s12   ;;  %s7670_s12 = sphi %s7740_s12, %s10153_s12   ;;  %s7666_s11 = sphi %s7738_s11, %s10152_s11   ;;  %s7662_s10 = sphi %s7736_s10, %s10151_s10   ;;  %s7658_s30 = sphi %s7734_s30, %s10150_s30  }
   0x4   : > { %s7759_s15 = sadd.s32 1, %s7670_s12   ;;  %s223_s16 = sadd.s32 1, %s7666_s11 }
   0x5   : > { %s220_s17 = ssub.s32 %s7670_s12, %s7759_s15  ;;  %p233_p0 = scmp.ne.s32.totalorder %s7666_s11, %s7662_s10 }
   0x6   : > { %p221_p1 = scmp.eq.s32.totalorder %s220_s17, 0  ;;  %p234_p2 = scmp.eq.s32.totalorder %s7755_s13, 1 }
   0x7   : > { %p239_p3 = scmp.ne.s32.totalorder %s7662_s10, %s7658_s30  ;;  %p240_p4 = scmp.eq.s32.totalorder %s6120_s14, 1 }
   0x8   : > { %s7770_s18 = scalar_select %p221_p1, %s7666_s11, %s223_s16  }
   0x9   : > { %p7772_p5 = por %p234_p2, %p233_p0  ;;  %p7776_p6 = por %p240_p4, %p239_p3 }
   0xa   : > { %p6123_p7 = scmp.ge.s32.totalorder %s7670_s12, 1  ;;  %p290_p8 = scmp.lt.s32.totalorder %s7670_s12, 3 }
   0xc   : > { %p291_p9 = pnand %p6123_p7, %p290_p8 }
   0xd   : > { %vm331_vm0 = vcmask (!%p291_p9), 64512   ;;  %vm334_vm1 = vcmask (!%p291_p9), 58368   ;;  %v7672_v0 = vmov (!%p291_p9), 0.0   ;;  %p325_p10 = scmp.lt.s32.totalorder (!%p291_p9), %s7755_s13, 1  ;;  %vm635_vm2 = vcmask (!%p291_p9), 1045504   ;;  %s7673_s26 = smov (!%p291_p9), 16  }
   0xe   : > { %294 = sbr.rel (%p291_p9) target bundleno = 1864 (0x748), region = 56  ;;  %332 = vst.msk [vmem:[#allocation2] sm:$0xff] (!%p291_p9), %vm331_vm0, %v7672_v0  ;;  %333 = vst.msk [vmem:[#allocation2 + $0x8] sm:$0xff] (!%p291_p9), %vm331_vm0, %v7672_v0  ;;  %vm554_vm3 = vcmask (!%p291_p9), 1046528   ;;  %s7674_s27 = smov (!%p291_p9), 8   ;;  %vm1740_vm4 = vcmask (!%p291_p9), 523264  }
   0xf   : > { %335 = vst.msk [vmem:[#allocation2 + $0x10] sm:$0x3] (!%p291_p9), %vm334_vm1, %v7672_v0  ;;  %338 = vst.msk [vmem:[#allocation2 + $0x28] sm:$0x3] (!%p291_p9), %vm334_vm1, %v7672_v0  ;;  %s7675_s28 = smov (!%p291_p9), 24   ;;  %s7677_s24 = smov (!%p291_p9), 40  }
  0x10   : > { %336 = vst.msk [vmem:[#allocation2 + $0x18] sm:$0xff] (!%p291_p9), %vm331_vm0, %v7672_v0  ;;  %337 = vst.msk [vmem:[#allocation2 + $0x20] sm:$0xff] (!%p291_p9), %vm331_vm0, %v7672_v0  ;;  %s7678_s16 = smov (!%p291_p9), 48   ;;  %s7679_s17 = smov (!%p291_p9), 56   ;;  %vm1874_vm5 = vcmask (!%p291_p9), 1043456   ;;  %vm1542_vm6 = vcmask (!%p291_p9), 130048  }
  0x11   : > { %339 = vst.msk [vmem:[#allocation2 + $0x30] sm:$0xff] (!%p291_p9), %vm331_vm0, %v7672_v0  ;;  %340 = vst.msk [vmem:[#allocation2 + $0x38] sm:$0xff] (!%p291_p9), %vm331_vm0, %v7672_v0  ;;  %vm1575_vm7 = vcmask (!%p291_p9), 195584   ;;  %vm1608_vm8 = vcmask (!%p291_p9), 261120   ;;  %vm1641_vm9 = vcmask (!%p291_p9), 326656   ;;  %vm1674_vm10 = vcmask (!%p291_p9), 392192  }
  0x12   : > { %341 = vst.msk [vmem:[#allocation2 + $0x40] sm:$0x3] (!%p291_p9), %vm334_vm1, %v7672_v0  ;;  %344 = vst.msk [vmem:[#allocation2 + $0x58] sm:$0x3] (!%p291_p9), %vm334_vm1, %v7672_v0  ;;  %vm1707_vm11 = vcmask (!%p291_p9), 457728   ;;  %vm1825_vm12 = vcmask (!%p291_p9), 588800  }
  0x13   : > { %342 = vst.msk [vmem:[#allocation2 + $0x48] sm:$0xff] (!%p291_p9), %vm331_vm0, %v7672_v0  ;;  %343 = vst.msk [vmem:[#allocation2 + $0x50] sm:$0xff] (!%p291_p9), %vm331_vm0, %v7672_v0  ;;  %vm3234_vm13 = vcmask (!%p291_p9), 517120   ;;  %vm3574_vm14 = vcmask (!%p291_p9), 1041409   ;;  %vm3576_vm15 = vcmask (!%p291_p9), 1042434  }
  0x14   : > { %345 = vst.msk [vmem:[#allocation2 + $0x60] sm:$0xff] (!%p291_p9), %vm331_vm0, %v7672_v0  ;;  %346 = vst.msk [vmem:[#allocation2 + $0x68] sm:$0xff] (!%p291_p9), %vm331_vm0, %v7672_v0 }
  0x15   : > { %347 = vst.msk [vmem:[#allocation2 + $0x70] sm:$0x3] %vm334_vm1, %v7672_v0  ;;  %350 = vst.msk [vmem:[#allocation2 + $0x88] sm:$0x3] %vm334_vm1, %v7672_v0  ;;  %s326_s21 = scalar_select %p325_p10, %s7755_s13, 1  ;;  %v452_v4 = vld [vmem:[#allocation2] sm:$0xff] }
  0x16   : > { %348 = vst.msk [vmem:[#allocation2 + $0x78] sm:$0xff] %vm331_vm0, %v7672_v0  ;;  %349 = vst.msk [vmem:[#allocation2 + $0x80] sm:$0xff] %vm331_vm0, %v7672_v0  ;;  %v453_v5 = vld [vmem:[#allocation2 + $0x8] sm:$0xff]  ;;  %v454_v6 = vld [vmem:[#allocation2 + $0x10] sm:$0x3]  ;;  %v636_v7 = vrot.slane %v452_v4, 2 }
  0x17   : > { %351 = vst.msk [vmem:[#allocation2 + $0x90] sm:$0xff] %vm331_vm0, %v7672_v0  ;;  %352 = vst.msk [vmem:[#allocation2 + $0x98] sm:$0xff] %vm331_vm0, %v7672_v0  ;;  %s6375_s22 = sshll.u32 %s326_s21, 8  ;;  %v637_v8 = vrot.slane %v453_v5, 2  ;;  %v639_v9 = vrot.slane %v454_v6, 2  ;;  %v555_v10 = vrot.slane %v452_v4, 1 }
  0x18   : > { %353 = vst.msk [vmem:[#allocation2 + $0xa0] sm:$0x3] %vm334_vm1, %v7672_v0  ;;  %356 = vst.msk [vmem:[#allocation2 + $0xb8] sm:$0x3] %vm334_vm1, %v7672_v0  ;;  %s7895_s25 = scalar_lea.vmem %s10132_s0, %s6375_s22  ;;  %v556_v13 = vrot.slane %v453_v5, 1  ;;  %v558_v14 = vrot.slane %v454_v6, 1 }
  0x19   : > { %354 = vst.msk [vmem:[#allocation2 + $0xa8] sm:$0xff] %vm331_vm0, %v7672_v0  ;;  %355 = vst.msk [vmem:[#allocation2 + $0xb0] sm:$0xff] %vm331_vm0, %v7672_v0  ;;  %v389_v1 = vld [vmem:[%s7895_s25 + $0x10] sm:$0xff]  ;;  %v390_v2 = vld [vmem:[%s7895_s25 + $0x18] sm:$0xff]  ;;  %v638_v18 = vsel %vm635_vm2, %v636_v7, %v637_v8  ;;  %v640_v19 = vsel %vm635_vm2, %v637_v8, %v639_v9  ;;  %s7676_s21 = smov 32   ;;  %s7680_s22 = smov 64  }
  0x1a   : > { %357 = vst.msk [vmem:[#allocation2 + $0xc0] sm:$0xff] %vm331_vm0, %v7672_v0  ;;  %358 = vst.msk [vmem:[#allocation2 + $0xc8] sm:$0xff] %vm331_vm0, %v7672_v0  ;;  %v387_v3 = vld [vmem:[%s7895_s25] sm:$0xff]  ;;  %v388_v11 = vld [vmem:[%s7895_s25 + $0x8] sm:$0xff]  ;;  %v6721_v23 = vpack.i.bf16 %v640_v19, %v638_v18  ;;  %v557_v24 = vsel %vm554_vm3, %v555_v10, %v556_v13  ;;  %v559_v25 = vsel %vm554_vm3, %v556_v13, %v558_v14 }
  0x1b   : > { %359 = vst.msk [vmem:[#allocation2 + $0xd0] sm:$0x3] %vm334_vm1, %v7672_v0  ;;  %362 = vst.msk [vmem:[#allocation2 + $0xe8] sm:$0x3] %vm334_vm1, %v7672_v0  ;;  %v391_v12 = vld [vmem:[%s7895_s25 + $0x20] sm:$0xff]  ;;  %v392_v15 = vld [vmem:[%s7895_s25 + $0x28] sm:$0xff]  ;;  %v6716_v29 = vpack.i.bf16 %v559_v25, %v557_v24 }
  0x1c   : > { %360 = vst.msk [vmem:[#allocation2 + $0xd8] sm:$0xff] %vm331_vm0, %v7672_v0  ;;  %361 = vst.msk [vmem:[#allocation2 + $0xe0] sm:$0xff] %vm331_vm0, %v7672_v0  ;;  %v393_v16 = vld [vmem:[%s7895_s25 + $0x30] sm:$0xff]  ;;  %v394_v17 = vld [vmem:[%s7895_s25 + $0x38] sm:$0xff]  ;;  %6722 = vrot.lane.b32.xlu1 %v6721_v23, %s7673_s26 }
  0x1d   : > { %363 = vst.msk [vmem:[#allocation2 + $0xf0] sm:$0xff] %vm331_vm0, %v7672_v0  ;;  %364 = vst.msk [vmem:[#allocation2 + $0xf8] sm:$0xff] %vm331_vm0, %v7672_v0  ;;  %v395_v20 = vld [vmem:[%s7895_s25 + $0x40] sm:$0xff]  ;;  %v396_v21 = vld [vmem:[%s7895_s25 + $0x48] sm:$0xff]  ;;  %6717 = vrot.lane.b32.xlu0 %v6716_v29, %s7674_s27 }
  0x1e   : > { %365 = vst.msk [vmem:[#allocation2 + $0x100] sm:$0x3] %vm334_vm1, %v7672_v0  ;;  %368 = vst.msk [vmem:[#allocation2 + $0x118] sm:$0x3] %vm334_vm1, %v7672_v0  ;;  %v397_v22 = vld [vmem:[%s7895_s25 + $0x50] sm:$0xff]  ;;  %v398_v26 = vld [vmem:[%s7895_s25 + $0x58] sm:$0xff] }
  0x1f   : > { %366 = vst.msk [vmem:[#allocation2 + $0x108] sm:$0xff] %vm331_vm0, %v7672_v0  ;;  %367 = vst.msk [vmem:[#allocation2 + $0x110] sm:$0xff] %vm331_vm0, %v7672_v0  ;;  %v399_v27 = vld [vmem:[%s7895_s25 + $0x60] sm:$0xff]  ;;  %v400_v28 = vld [vmem:[%s7895_s25 + $0x68] sm:$0xff] }
  0x20   : > { %369 = vst.msk [vmem:[#allocation2 + $0x120] sm:$0xff] %vm331_vm0, %v7672_v0  ;;  %370 = vst.msk [vmem:[#allocation2 + $0x128] sm:$0xff] %vm331_vm0, %v7672_v0  ;;  %v401_v30 = vld [vmem:[%s7895_s25 + $0x70] sm:$0xff]  ;;  %v402_v31 = vld [vmem:[%s7895_s25 + $0x78] sm:$0xff] }
  0x21   : > { %371 = vst.msk [vmem:[#allocation2 + $0x130] sm:$0x3] %vm334_vm1, %v7672_v0  ;;  %374 = vst.msk [vmem:[#allocation2 + $0x148] sm:$0x3] %vm334_vm1, %v7672_v0  ;;  %v403_v32 = vld [vmem:[%s7895_s25 + $0x80] sm:$0xff]  ;;  %v404_v33 = vld [vmem:[%s7895_s25 + $0x88] sm:$0xff] }
  0x22   : > { %372 = vst.msk [vmem:[#allocation2 + $0x138] sm:$0xff] %vm331_vm0, %v7672_v0  ;;  %373 = vst.msk [vmem:[#allocation2 + $0x140] sm:$0xff] %vm331_vm0, %v7672_v0  ;;  %v405_v34 = vld [vmem:[%s7895_s25 + $0x90] sm:$0xff]  ;;  %v406_v35 = vld [vmem:[%s7895_s25 + $0x98] sm:$0xff] }
  0x23   : > { %375 = vst.msk [vmem:[#allocation2 + $0x150] sm:$0xff] %vm331_vm0, %v7672_v0  ;;  %376 = vst.msk [vmem:[#allocation2 + $0x158] sm:$0xff] %vm331_vm0, %v7672_v0  ;;  %v7446_v7 = vld [vmem:[%s10133_s1] sm:$0xff]   ;;  %v7447_v8 = vld [vmem:[%s10133_s1 + $0x8] sm:$0xff]  }
  0x24   : > { %377 = vst.msk [vmem:[#allocation2 + $0x160] sm:$0x3] %vm334_vm1, %v7672_v0  ;;  %380 = vst.msk [vmem:[#allocation2 + $0x178] sm:$0x3] %vm334_vm1, %v7672_v0  ;;  %6583 = vmatprep.subr.bf16.mxu0 %v7446_v7  ;;  %v7449_v19 = vld [vmem:[%s10133_s1 + $0x18] sm:$0xff]  }
  0x25   : > { %378 = vst.msk [vmem:[#allocation2 + $0x168] sm:$0xff] %vm331_vm0, %v7672_v0  ;;  %379 = vst.msk [vmem:[#allocation2 + $0x170] sm:$0xff] %vm331_vm0, %v7672_v0  ;;  %6584 = vmatpush3.bf16.msra.mxu0 %v7446_v7 }
  0x26   : > { %381 = vst.msk [vmem:[#allocation2 + $0x180] sm:$0xff] %vm331_vm0, %v7672_v0  ;;  %382 = vst.msk [vmem:[#allocation2 + $0x188] sm:$0xff] %vm331_vm0, %v7672_v0  ;;  %6585 = vmatprep.subr.bf16.mxu0 %v7447_v8 }
  0x27   : > { %383 = vst.msk [vmem:[#allocation2 + $0x190] sm:$0x3] %vm334_vm1, %v7672_v0  ;;  %386 = vst.msk [vmem:[#allocation2 + $0x1a8] sm:$0x3] %vm334_vm1, %v7672_v0  ;;  %vm3580_vm1 = vcmask 1044484  }
  0x28   : > { %384 = vst.msk [vmem:[#allocation2 + $0x198] sm:$0xff] %vm331_vm0, %v7672_v0  ;;  %385 = vst.msk [vmem:[#allocation2 + $0x1a0] sm:$0xff] %vm331_vm0, %v7672_v0 }
  0x29   : > { %422 = vst.msk [vmem:[#allocation2 + $0x31] sm:$0xff] %vm331_vm0, %v389_v1  ;;  %423 = vst.msk [vmem:[#allocation2 + $0x39] sm:$0xff] %vm331_vm0, %v390_v2  ;;  %6586 = vmatpush3.bf16.msra.mxu0 %v7447_v8 }
  0x2a   : > { %420 = vst.msk [vmem:[#allocation2 + $0x19] sm:$0xff] %vm331_vm0, %v387_v3  ;;  %421 = vst.msk [vmem:[#allocation2 + $0x21] sm:$0xff] %vm331_vm0, %v388_v11  ;;  %v407_v11 = vld [vmem:[%s7895_s25 + $0xa0] sm:$0xff] }
  0x2b   : > { %424 = vst.msk [vmem:[#allocation2 + $0x49] sm:$0xff] %vm331_vm0, %v391_v12  ;;  %425 = vst.msk [vmem:[#allocation2 + $0x51] sm:$0xff] %vm331_vm0, %v392_v15  ;;  %v408_v12 = vld [vmem:[%s7895_s25 + $0xa8] sm:$0xff]  ;;  %v7448_v15 = vld [vmem:[%s10133_s1 + $0x10] sm:$0xff]  }
  0x2c   : > { %426 = vst.msk [vmem:[#allocation2 + $0x61] sm:$0xff] %vm331_vm0, %v393_v16  ;;  %427 = vst.msk [vmem:[#allocation2 + $0x69] sm:$0xff] %vm331_vm0, %v394_v17  ;;  %6587 = vmatprep.subr.bf16.mxu0 %v7448_v15 }
  0x2d   : > { %428 = vst.msk [vmem:[#allocation2 + $0x79] sm:$0xff] %vm331_vm0, %v395_v20  ;;  %429 = vst.msk [vmem:[#allocation2 + $0x81] sm:$0xff] %vm331_vm0, %v396_v21  ;;  %6588 = vmatpush3.bf16.msra.mxu0 %v7448_v15 }
  0x2e   : > { %430 = vst.msk [vmem:[#allocation2 + $0x91] sm:$0xff] %vm331_vm0, %v397_v22  ;;  %431 = vst.msk [vmem:[#allocation2 + $0x99] sm:$0xff] %vm331_vm0, %v398_v26  ;;  %6589 = vmatprep.subr.bf16.mxu0 %v7449_v19 }
  0x2f   : > { %432 = vst.msk [vmem:[#allocation2 + $0xa9] sm:$0xff] %vm331_vm0, %v399_v27  ;;  %433 = vst.msk [vmem:[#allocation2 + $0xb1] sm:$0xff] %vm331_vm0, %v400_v28 }
  0x30   : > { %434 = vst.msk [vmem:[#allocation2 + $0xc1] sm:$0xff] %vm331_vm0, %v401_v30  ;;  %435 = vst.msk [vmem:[#allocation2 + $0xc9] sm:$0xff] %vm331_vm0, %v402_v31  ;;  %v458_v36 = vld [vmem:[#allocation2 + $0x30] sm:$0xff]  ;;  %v459_v37 = vld [vmem:[#allocation2 + $0x38] sm:$0xff] }
  0x31   : > { %436 = vst.msk [vmem:[#allocation2 + $0xd9] sm:$0xff] %vm331_vm0, %v403_v32  ;;  %v455_v38 = vld [vmem:[#allocation2 + $0x18] sm:$0xff]  ;;  %437 = vst.msk [vmem:[#allocation2 + $0xe1] sm:$0xff] %vm331_vm0, %v404_v33  ;;  %v7943_v39 = vpack.i.bf16 %v459_v37, %v458_v36  ;;  %v460_v42 = vld [vmem:[#allocation2 + $0x40] sm:$0x3]  ;;  %v565_v43 = vrot.slane %v458_v36, 1  ;;  %6590 = vmatpush3.bf16.msra.mxu0 %v7449_v19 }
  0x32   : > { %438 = vst.msk [vmem:[#allocation2 + $0xf1] sm:$0xff] %vm331_vm0, %v405_v34  ;;  %439 = vst.msk [vmem:[#allocation2 + $0xf9] sm:$0xff] %vm331_vm0, %v406_v35  ;;  %v641_v40 = vrot.slane %v455_v38, 2  ;;  %v560_v41 = vrot.slane %v455_v38, 1  ;;  %v456_v44 = vld [vmem:[#allocation2 + $0x20] sm:$0xff]  ;;  %v566_v46 = vrot.slane %v459_v37, 1 }
  0x33   : > { %v457_v45 = vld [vmem:[#allocation2 + $0x28] sm:$0x3]  ;;  %v568_v47 = vrot.slane %v460_v42, 1  ;;  %6732 = vrot.lane.b32.xlu1 %v7943_v39, %s7675_s28  ;;  %v6726_v48 = vpack.i.bf16 %v456_v44, %v455_v38  ;;  %v642_v49 = vrot.slane %v456_v44, 2  ;;  %v561_v51 = vrot.slane %v456_v44, 1  ;;  %v462_v5 = vld [vmem:[#allocation2 + $0x50] sm:$0xff] }
  0x34   : > { %v644_v50 = vrot.slane %v457_v45, 2  ;;  %v563_v52 = vrot.slane %v457_v45, 1  ;;  %v567_v53 = vsel %vm554_vm3, %v565_v43, %v566_v46  ;;  %v646_v55 = vrot.slane %v458_v36, 2  ;;  %v461_v4 = vld [vmem:[#allocation2 + $0x48] sm:$0xff]  ;;  %v463_v6 = vld [vmem:[#allocation2 + $0x58] sm:$0x3] }
  0x35   : > { %v569_v54 = vsel %vm554_vm3, %v566_v46, %v568_v47  ;;  %6727 = vrot.lane.b32.xlu0 %v6726_v48, %s7675_s28  ;;  %v643_v56 = vsel %vm635_vm2, %v641_v40, %v642_v49  ;;  %v562_v58 = vsel %vm554_vm3, %v560_v41, %v561_v51  ;;  %v647_v59 = vrot.slane %v459_v37, 2  ;;  %440 = vst.msk [vmem:[#allocation2 + $0x109] sm:$0xff] %vm331_vm0, %v407_v11  ;;  %v464_v26 = vld [vmem:[#allocation2 + $0x60] sm:$0xff]  ;;  %v465_v27 = vld [vmem:[#allocation2 + $0x68] sm:$0xff]  ;;  %v466_v29 = vld [vmem:[#allocation2 + $0x70] sm:$0x3] }
  0x36   : > { %v645_v57 = vsel %vm635_vm2, %v642_v49, %v644_v50  ;;  %v564_v61 = vsel %vm554_vm3, %v561_v51, %v563_v52  ;;  %v649_v62 = vrot.slane %v460_v42, 2  ;;  %v6751_v1 = vpack.i.bf16 %v569_v54, %v567_v53  ;;  %441 = vst.msk [vmem:[#allocation2 + $0x111] sm:$0xff] %vm331_vm0, %v408_v12  ;;  %v409_v30 = vld [vmem:[%s7895_s25 + $0xb0] sm:$0xff]  ;;  %v410_v31 = vld [vmem:[%s7895_s25 + $0xb8] sm:$0xff]  ;;  %v468_v43 = vld [vmem:[#allocation2 + $0x80] sm:$0xff] }
  0x37   : > { %v6741_v60 = vpack.i.bf16 %v645_v57, %v643_v56  ;;  %v6736_v63 = vpack.i.bf16 %v564_v61, %v562_v58  ;;  %v648_v2 = vsel %vm635_vm2, %v646_v55, %v647_v59  ;;  %v570_v10 = vrot.slane %v461_v4, 1  ;;  %442 = vst.msk [vmem:[#allocation2 + $0x121] sm:$0xff] %vm331_vm0, %v409_v30  ;;  %443 = vst.msk [vmem:[#allocation2 + $0x129] sm:$0xff] %vm331_vm0, %v410_v31  ;;  %v467_v41 = vld [vmem:[#allocation2 + $0x78] sm:$0xff]  ;;  %v7450_v46 = vld [vmem:[%s10133_s1 + $0x20] ss:$0 sps:$4 sm:$0xff]  }
  0x38   : > { %v650_v3 = vsel %vm635_vm2, %v647_v59, %v649_v62  ;;  %v571_v13 = vrot.slane %v462_v5, 1  ;;  %v573_v14 = vrot.slane %v463_v6, 1  ;;  %v6771_v16 = vpack.i.bf16 %v462_v5, %v461_v4  ;;  %v469_v47 = vld [vmem:[#allocation2 + $0x88] sm:$0x3]  ;;  %v411_v48 = vld [vmem:[%s7895_s25 + $0xc0] sm:$0xff]  ;;  %3233 = vst.msk [vmem:[#allocation3] sm:$0xff] %vm1740_vm4, %v7672_v0  ;;  %6665 = vmatprep.subr.msk.bf16.mxu0 %vm1874_vm5, %v7450_v46 }
  0x39   : > { %6742 = vrot.lane.b32.xlu1 %v6741_v60, %s7673_s26  ;;  %6737 = vrot.lane.b32.xlu0 %v6736_v63, %s7674_s27  ;;  %v6766_v9 = vpack.i.bf16 %v650_v3, %v648_v2  ;;  %v651_v21 = vrot.slane %v461_v4, 2  ;;  %v652_v22 = vrot.slane %v462_v5, 2  ;;  %v654_v23 = vrot.slane %v463_v6, 2  ;;  %v412_v49 = vld [vmem:[%s7895_s25 + $0xc8] sm:$0xff]  ;;  %444 = vst.msk [vmem:[#allocation2 + $0x139] sm:$0xff] %vm331_vm0, %v411_v48  ;;  %v470_v62 = vld [vmem:[#allocation2 + $0x90] sm:$0xff] }
  0x3a   : > { %v572_v17 = vsel %vm554_vm3, %v570_v10, %v571_v13  ;;  %v574_v18 = vsel %vm554_vm3, %v571_v13, %v573_v14  ;;  %v575_v32 = vrot.slane %v464_v26, 1  ;;  %v576_v33 = vrot.slane %v465_v27, 1  ;;  %445 = vst.msk [vmem:[#allocation2 + $0x141] sm:$0xff] %vm331_vm0, %v412_v49  ;;  %v413_v11 = vld [vmem:[%s7895_s25 + $0xd0] sm:$0xff]  ;;  %v414_v12 = vld [vmem:[%s7895_s25 + $0xd8] sm:$0xff] }
  0x3b   : > { %v7981_v20 = vpack.i.bf16 %v574_v18, %v572_v17  ;;  %v653_v24 = vsel %vm635_vm2, %v651_v21, %v652_v22  ;;  %v655_v25 = vsel %vm635_vm2, %v652_v22, %v654_v23  ;;  %v578_v34 = vrot.slane %v466_v29, 1  ;;  %3236 = vst.msk [vmem:[#allocation3 + $0x10] sm:$0xff] %vm1740_vm4, %v7672_v0  ;;  %3238 = vst.msk [vmem:[#allocation3 + $0x20] sm:$0xff] %vm1740_vm4, %v7672_v0  ;;  %v474_v18 = vld [vmem:[#allocation2 + $0xb0] sm:$0xff]  ;;  %v475_v19 = vld [vmem:[#allocation2 + $0xb8] sm:$0x3] }
  0x3c   : > { %v6796_v28 = vpack.i.bf16 %v655_v25, %v653_v24  ;;  %v656_v35 = vrot.slane %v464_v26, 2  ;;  %v6821_v36 = vpack.i.bf16 %v465_v27, %v464_v26  ;;  %v577_v37 = vsel %vm554_vm3, %v575_v32, %v576_v33  ;;  %3240 = vst.msk [vmem:[#allocation3 + $0x30] sm:$0xff] %vm1740_vm4, %v7672_v0  ;;  %3242 = vst.msk [vmem:[#allocation3 + $0x40] sm:$0xff] %vm1740_vm4, %v7672_v0  ;;  %v415_v22 = vld [vmem:[%s7895_s25 + $0xe0] sm:$0xff]  ;;  %v416_v23 = vld [vmem:[%s7895_s25 + $0xe8] sm:$0xff] }
  0x3d   : > { %6752 = vrot.lane.b32.xlu1 %v6751_v1, %s7676_s21  ;;  %6747 = vrot.lane.b32.xlu0 %v6736_v63, %s7676_s21  ;;  %v579_v38 = vsel %vm554_vm3, %v576_v33, %v578_v34  ;;  %v659_v40 = vrot.slane %v466_v29, 2  ;;  %v580_v51 = vrot.slane %v467_v41, 1  ;;  %3244 = vst.msk [vmem:[#allocation3 + $0x50] sm:$0xff] %vm1740_vm4, %v7672_v0  ;;  %3246 = vst.msk [vmem:[#allocation3 + $0x60] sm:$0xff] %vm1740_vm4, %v7672_v0  ;;  %v581_v52 = vrot.slane %v468_v43, 1  ;;  %v471_v63 = vld [vmem:[#allocation2 + $0x98] sm:$0xff] }
  0x3e   : > { %v6831_v42 = vpack.i.bf16 %v579_v38, %v577_v37  ;;  %3248 = vst.msk [vmem:[#allocation3 + $0x70] sm:$0xff] %vm1740_vm4, %v7672_v0  ;;  %3250 = vst.msk [vmem:[#allocation3 + $0x80] sm:$0xff] %vm1740_vm4, %v7672_v0  ;;  %v583_v53 = vrot.slane %v469_v47, 1  ;;  %v1876_v54 = vsel %vm1874_vm5, %v7450_v46, 0  ;;  %v6851_v55 = vpack.i.bf16 %v468_v43, %v467_v41  ;;  %v478_v37 = vld [vmem:[#allocation2 + $0xd0] sm:$0x3] }
  0x3f   : > { %3252 = vst.msk [vmem:[#allocation3 + $0x90] sm:$0xff] %vm1740_vm4, %v7672_v0  ;;  %6592 = vmatpush3.bf16.msra.mxu0 %v1876_v54  ;;  %v582_v56 = vsel %vm554_vm3, %v580_v51, %v581_v52  ;;  %v661_v59 = vrot.slane %v467_v41, 2  ;;  %v664_v61 = vrot.slane %v469_v47, 2  ;;  %v585_v4 = vrot.slane %v470_v62, 1  ;;  %v417_v47 = vld [vmem:[%s7895_s25 + $0xf0] sm:$0xff]  ;;  %v418_v48 = vld [vmem:[%s7895_s25 + $0xf8] sm:$0xff] }
  0x40   : > { %v584_v57 = vsel %vm554_vm3, %v581_v52, %v583_v53  ;;  %v586_v5 = vrot.slane %v471_v63, 1  ;;  %v666_v7 = vrot.slane %v470_v62, 2  ;;  %446 = vst.msk [vmem:[#allocation2 + $0x151] sm:$0xff] %vm331_vm0, %v413_v11  ;;  %447 = vst.msk [vmem:[#allocation2 + $0x159] sm:$0xff] %vm331_vm0, %v414_v12  ;;  %v6901_v13 = vpack.i.bf16 %v471_v63, %v470_v62  ;;  %v479_v52 = vld [vmem:[#allocation2 + $0xd8] sm:$0xff]  ;;  %v480_v54 = vld [vmem:[#allocation2 + $0xe0] sm:$0xff] }
  0x41   : > { %6767 = vrot.lane.b32.xlu1 %v6766_v9, %s7677_s24  ;;  %6757 = vrot.lane.b32.xlu0 %v6741_v60, %s7677_s24  ;;  %v6861_v58 = vpack.i.bf16 %v584_v57, %v582_v56  ;;  %v662_v60 = vrot.slane %v468_v43, 2  ;;  %448 = vst.msk [vmem:[#allocation2 + $0x169] sm:$0xff] %vm331_vm0, %v415_v22  ;;  %449 = vst.msk [vmem:[#allocation2 + $0x171] sm:$0xff] %vm331_vm0, %v416_v23  ;;  %v591_v26 = vrot.slane %v474_v18, 1  ;;  %v672_v33 = vrot.slane %v474_v18, 2 }
  0x42   : > { %v587_v14 = vsel %vm554_vm3, %v585_v4, %v586_v5  ;;  %v674_v34 = vrot.slane %v475_v19, 2  ;;  %v679_v46 = vrot.slane %v478_v37, 2  ;;  %450 = vst.msk [vmem:[#allocation2 + $0x181] sm:$0xff] %vm331_vm0, %v417_v47  ;;  %451 = vst.msk [vmem:[#allocation2 + $0x189] sm:$0xff] %vm331_vm0, %v418_v48  ;;  %v8101_v62 = vpack.i.bf16 %v480_v54, %v479_v52  ;;  %v7573_v47 = vld [vmem:[#allocation2 + $0x8] sm:$0xff] }
  0x43   : > { %v663_v2 = vsel %vm635_vm2, %v661_v59, %v662_v60  ;;  %v665_v3 = vsel %vm635_vm2, %v662_v60, %v664_v61  ;;  %v600_v59 = vrot.slane %v479_v52, 1  ;;  %v601_v60 = vrot.slane %v480_v54, 1  ;;  %3237 = vst.msk [vmem:[#allocation3 + $0x18] sm:$0x3] %vm3234_vm13, %v7672_v0  ;;  %3235 = vst.msk [vmem:[#allocation3 + $0x8] sm:$0x3] %vm3234_vm13, %v7672_v0 }
  0x44   : > { %v6876_v8 = vpack.i.bf16 %v665_v3, %v663_v2  ;;  %3239 = vst.msk [vmem:[#allocation3 + $0x28] sm:$0x3] %vm3234_vm13, %v7672_v0  ;;  %3241 = vst.msk [vmem:[#allocation3 + $0x38] sm:$0x3] %vm3234_vm13, %v7672_v0  ;;  %vm3582_vm5 = vcmask 1045509  }
  0x45   : > { %6772 = vrot.lane.b32.xlu1 %v6771_v16, %s7678_s16  ;;  %6762 = vrot.lane.b32.xlu0 %v7943_v39, %s7678_s16  ;;  %v657_v39 = vrot.slane %v465_v27, 2  ;;  %v593_v27 = vrot.slane %v475_v19, 1  ;;  %3243 = vst.msk [vmem:[#allocation3 + $0x48] sm:$0x3] %vm3234_vm13, %v7672_v0  ;;  %3245 = vst.msk [vmem:[#allocation3 + $0x58] sm:$0x3] %vm3234_vm13, %v7672_v0 }
  0x46   : > { %3247 = vst.msk [vmem:[#allocation3 + $0x68] sm:$0x3] %vm3234_vm13, %v7672_v0  ;;  %3249 = vst.msk [vmem:[#allocation3 + $0x78] sm:$0x3] %vm3234_vm13, %v7672_v0 }
  0x47   : > { %v658_v44 = vsel %vm635_vm2, %v656_v35, %v657_v39  ;;  %v660_v45 = vsel %vm635_vm2, %v657_v39, %v659_v40  ;;  %v594_v30 = vsel %vm554_vm3, %v591_v26, %v593_v27  ;;  %v476_v35 = vld [vmem:[#allocation2 + $0xc0] sm:$0xff]  ;;  %v675_v39 = vsel %vm635_vm2, %v672_v33, %v674_v34  ;;  %3251 = vst.msk [vmem:[#allocation3 + $0x88] sm:$0x3] %vm3234_vm13, %v7672_v0 }
  0x48   : > { %v6841_v50 = vpack.i.bf16 %v660_v45, %v658_v44  ;;  %v595_v40 = vrot.slane %v476_v35, 1  ;;  %v676_v43 = vrot.slane %v476_v35, 2  ;;  %3253 = vst.msk [vmem:[#allocation3 + $0x98] sm:$0x3] %vm3234_vm13, %v7672_v0 }
  0x49   : > { %6782 = vrot.lane.b32.xlu1 %v7981_v20, %s7679_s17  ;;  %6777 = vrot.lane.b32.xlu0 %v6751_v1, %s7679_s17 }
  0x4d   : > { %6792 = vrot.lane.b32.xlu1 %v6751_v1, %s7674_s27  ;;  %6787 = vrot.lane.b32.xlu0 %v6766_v9, %s7680_s22  ;;  %v472_v1 = vld [vmem:[#allocation2 + $0xa0] sm:$0x3] }
  0x4e   : > { %v588_v6 = vrot.slane %v472_v1, 1  ;;  %v669_v10 = vrot.slane %v472_v1, 2  ;;  %v602_v1 = vsel %vm554_vm3, %v600_v59, %v601_v60 }
  0x50   : > { %v589_v15 = vsel %vm554_vm3, %v586_v5, %v588_v6  ;;  %v681_v6 = vrot.slane %v479_v52, 2 }
  0x51   : > { %6802 = vrot.lane.b32.xlu1 %v7981_v20, %s7674_s27  ;;  %6797 = vrot.lane.b32.xlu0 %v6796_v28, %s7680_s22  ;;  %v6911_v17 = vpack.i.bf16 %v589_v15, %v587_v14  ;;  %v483_v14 = vld [vmem:[#allocation2 + $0xf8] sm:$0xff]  ;;  %v484_v15 = vld [vmem:[#allocation2 + $0x100] sm:$0x3] }
  0x52   : > { %v606_v19 = vrot.slane %v483_v14, 1  ;;  %v687_v23 = vrot.slane %v483_v14, 2 }
  0x55   : > { %6812 = vrot.lane.b32.xlu1 %v6796_v28, %s7673_s26  ;;  %6807 = vrot.lane.b32.xlu0 %v6766_v9, %s7673_s26  ;;  %v667_v9 = vrot.slane %v471_v63, 2 }
  0x57   : > { %v670_v21 = vsel %vm635_vm2, %v667_v9, %v669_v10 }
  0x59   : > { %6822 = vrot.lane.b32.xlu1 %v6821_v36, %s7675_s28  ;;  %6817 = vrot.lane.b32.xlu0 %v6771_v16, %s7675_s28  ;;  %v473_v16 = vld [vmem:[#allocation2 + $0xa8] sm:$0xff] }
  0x5a   : > { %v590_v25 = vrot.slane %v473_v16, 1  ;;  %v671_v32 = vrot.slane %v473_v16, 2 }
  0x5c   : > { %v592_v29 = vsel %vm554_vm3, %v590_v25, %v591_v26  ;;  %v673_v38 = vsel %vm635_vm2, %v671_v32, %v672_v33 }
  0x5d   : > { %6832 = vrot.lane.b32.xlu1 %v6831_v42, %s7676_s21  ;;  %6827 = vrot.lane.b32.xlu0 %v7981_v20, %s7676_s21  ;;  %v668_v20 = vsel %vm635_vm2, %v666_v7, %v667_v9  ;;  %v6941_v31 = vpack.i.bf16 %v594_v30, %v592_v29  ;;  %v6956_v44 = vpack.i.bf16 %v675_v39, %v673_v38  ;;  %v682_v7 = vrot.slane %v480_v54, 2  ;;  %v8143_v29 = vld [vmem:[#allocation2 + $0x108] sm:$0xff]  ;;  %v8145_v30 = vld [vmem:[#allocation2 + $0x110] sm:$0xff] }
  0x5e   : > { %v6921_v24 = vpack.i.bf16 %v670_v21, %v668_v20  ;;  %v608_v20 = vrot.slane %v484_v15, 1 }
  0x5f   : > { %v683_v11 = vsel %vm635_vm2, %v681_v6, %v682_v7 }
  0x61   : > { %6842 = vrot.lane.b32.xlu1 %v6841_v50, %s7677_s24  ;;  %6837 = vrot.lane.b32.xlu0 %v6796_v28, %s7677_s24  ;;  %v6931_v28 = vpack.i.bf16 %v474_v18, %v473_v16 }
  0x65   : > { %6852 = vrot.lane.b32.xlu1 %v6851_v55, %s7678_s16  ;;  %6847 = vrot.lane.b32.xlu0 %v6821_v36, %s7678_s16  ;;  %v477_v36 = vld [vmem:[#allocation2 + $0xc8] sm:$0xff] }
  0x66   : > { %v596_v41 = vrot.slane %v477_v36, 1  ;;  %v677_v45 = vrot.slane %v477_v36, 2  ;;  %v6981_v49 = vpack.i.bf16 %v477_v36, %v476_v35 }
  0x68   : > { %v678_v56 = vsel %vm635_vm2, %v676_v43, %v677_v45  ;;  %v680_v57 = vsel %vm635_vm2, %v677_v45, %v679_v46 }
  0x69   : > { %6862 = vrot.lane.b32.xlu1 %v6861_v58, %s7679_s17  ;;  %6857 = vrot.lane.b32.xlu0 %v6831_v42, %s7679_s17 }
  0x6d   : > { %6872 = vrot.lane.b32.xlu1 %v6831_v42, %s7674_s27  ;;  %6867 = vrot.lane.b32.xlu0 %v6841_v50, %s7680_s22  ;;  %v598_v42 = vrot.slane %v478_v37, 1 }
  0x6f   : > { %v599_v51 = vsel %vm554_vm3, %v596_v41, %v598_v42 }
  0x71   : > { %6882 = vrot.lane.b32.xlu1 %v6861_v58, %s7674_s27  ;;  %6877 = vrot.lane.b32.xlu0 %v6876_v8, %s7680_s22 }
  0x75   : > { %6892 = vrot.lane.b32.xlu1 %v6876_v8, %s7673_s26  ;;  %6887 = vrot.lane.b32.xlu0 %v6841_v50, %s7673_s26  ;;  %v597_v50 = vsel %vm554_vm3, %v595_v40, %v596_v41  ;;  %v610_v40 = vrot.slane %v8143_v29, 1  ;;  %v611_v41 = vrot.slane %v8145_v30, 1 }
  0x76   : > { %v6991_v53 = vpack.i.bf16 %v599_v51, %v597_v50 }
  0x79   : > { %6902 = vrot.lane.b32.xlu1 %v6901_v13, %s7675_s28  ;;  %6897 = vrot.lane.b32.xlu0 %v6851_v55, %s7675_s28  ;;  %v481_v55 = vld [vmem:[#allocation2 + $0xe8] sm:$0x3] }
  0x7a   : > { %v603_v61 = vrot.slane %v481_v55, 1 }
  0x7c   : > { %v604_v2 = vsel %vm554_vm3, %v601_v60, %v603_v61  ;;  %v8184_v61 = vpack.i.bf16 %v8145_v30, %v8143_v29 }
  0x7d   : > { %6912 = vrot.lane.b32.xlu1 %v6911_v17, %s7676_s21  ;;  %6907 = vrot.lane.b32.xlu0 %v6861_v58, %s7676_s21  ;;  %v8096_v58 = vpack.i.bf16 %v680_v57, %v678_v56  ;;  %v8112_v4 = vpack.i.bf16 %v604_v2, %v602_v1  ;;  %v7575_v56 = vld [vmem:[#allocation2 + $0x20] sm:$0xff] }
  0x81   : > { %6922 = vrot.lane.b32.xlu1 %v6921_v24, %s7677_s24  ;;  %6917 = vrot.lane.b32.xlu0 %v6876_v8, %s7677_s24  ;;  %v684_v8 = vrot.slane %v481_v55, 2 }
  0x83   : > { %v685_v12 = vsel %vm635_vm2, %v682_v7, %v684_v8 }
  0x85   : > { %6932 = vrot.lane.b32.xlu1 %v6931_v28, %s7678_s16  ;;  %6927 = vrot.lane.b32.xlu0 %v6901_v13, %s7678_s16  ;;  %v482_v13 = vld [vmem:[#allocation2 + $0xf0] sm:$0xff] }
  0x86   : > { %v605_v18 = vrot.slane %v482_v13, 1  ;;  %v686_v22 = vrot.slane %v482_v13, 2  ;;  %v8139_v26 = vpack.i.bf16 %v483_v14, %v482_v13 }
  0x88   : > { %v607_v27 = vsel %vm554_vm3, %v605_v18, %v606_v19  ;;  %v688_v35 = vsel %vm635_vm2, %v686_v22, %v687_v23 }
  0x89   : > { %6942 = vrot.lane.b32.xlu1 %v6941_v31, %s7679_s17  ;;  %6937 = vrot.lane.b32.xlu0 %v6911_v17, %s7679_s17 }
  0x8d   : > { %6952 = vrot.lane.b32.xlu1 %v6911_v17, %s7674_s27  ;;  %6947 = vrot.lane.b32.xlu0 %v6921_v24, %s7680_s22  ;;  %v8129_v17 = vpack.i.bf16 %v685_v12, %v683_v11 }
  0x8e   : > { %v8104_v63 = vpop.permute.xlu1 %6722 }
  0x8f   : > { %v8108_v3 = vpop.permute.xlu0 %6717  ;;  %v6725_v43 = vunpack.i.h.bf16 %v8104_v63 }
  0x90   : > { %v6720_v32 = vunpack.i.h.bf16 %v8108_v3  ;;  %v6719_v33 = vunpack.i.l.bf16 %v8108_v3 }
  0x91   : > { %6962 = vrot.lane.b32.xlu1 %v6941_v31, %s7674_s27  ;;  %6957 = vrot.lane.b32.xlu0 %v6956_v44, %s7680_s22 }
  0x92   : > { %v1511_v48 = vsel %vm331_vm0, %v7573_v47, %v6720_v32 }
  0x93   : > { %v1544_v7 = vsel %vm1542_vm6, %v1511_v48, %v6725_v43 }
  0x95   : > { %6972 = vrot.lane.b32.xlu1 %v6956_v44, %s7673_s26  ;;  %6967 = vrot.lane.b32.xlu0 %v6921_v24, %s7673_s26  ;;  %v689_v24 = vrot.slane %v484_v15, 2 }
  0x97   : > { %v690_v36 = vsel %vm635_vm2, %v687_v23, %v689_v24 }
  0x98   : > { %v8168_v46 = vpack.i.bf16 %v690_v36, %v688_v35 }
  0x99   : > { %6982 = vrot.lane.b32.xlu1 %v6981_v49, %s7675_s28  ;;  %6977 = vrot.lane.b32.xlu0 %v6931_v28, %s7675_s28  ;;  %v609_v28 = vsel %vm554_vm3, %v606_v19, %v608_v20 }
  0x9a   : > { %v8166_v45 = vpack.i.bf16 %v609_v28, %v607_v27 }
  0x9d   : > { %6992 = vrot.lane.b32.xlu1 %v6991_v53, %s7676_s21  ;;  %6987 = vrot.lane.b32.xlu0 %v6941_v31, %s7676_s21  ;;  %v8147_v31 = vld [vmem:[#allocation2 + $0x118] sm:$0x3] }
  0x9e   : > { %v613_v42 = vrot.slane %v8147_v31, 1 }
  0xa0   : > { %v614_v1 = vsel %vm554_vm3, %v611_v41, %v613_v42 }
  0xa1   : > { %7002 = vrot.lane.b32.xlu1 %v8096_v58, %s7677_s24  ;;  %6997 = vrot.lane.b32.xlu0 %v6956_v44, %s7677_s24  ;;  %v6724_v44 = vunpack.i.l.bf16 %v8104_v63  ;;  %v612_v63 = vsel %vm554_vm3, %v610_v40, %v611_v41 }
  0xa5   : > { %7012 = vrot.lane.b32.xlu1 %v8101_v62, %s7678_s16  ;;  %7007 = vrot.lane.b32.xlu0 %v6981_v49, %s7678_s16  ;;  %v8115_v5 = vpop.permute.xlu1 %6732  ;;  %v7574_v49 = vld [vmem:[#allocation2] sm:$0xff] }
  0xa6   : > { %v1510_v50 = vsel %vm331_vm0, %v7574_v49, %v6719_v33  ;;  %v6735_v2 = vunpack.i.h.bf16 %v8115_v5  ;;  %v6734_v3 = vunpack.i.l.bf16 %v8115_v5 }
  0xa7   : > { %v8117_v9 = vpop.permute.xlu0 %6727  ;;  %v1543_v6 = vsel %vm1542_vm6, %v1510_v50, %v6724_v44 }
  0xa8   : > { %v6730_v54 = vunpack.i.h.bf16 %v8117_v9  ;;  %v6729_v55 = vunpack.i.l.bf16 %v8117_v9 }
  0xa9   : > { %7022 = vrot.lane.b32.xlu1 %v8112_v4, %s7679_s17  ;;  %7017 = vrot.lane.b32.xlu0 %v6991_v53, %s7679_s17 }
  0xaa   : > { %v1577_v13 = vsel %vm1575_vm7, %v1544_v7, %v6730_v54  ;;  %v1576_v5 = vsel %vm1575_vm7, %v1543_v6, %v6729_v55 }
  0xab   : > { %v8122_v10 = vpop.permute.xlu1 %6742  ;;  %v6738_v16 = vpop.permute.xlu0 %6737 }
  0xac   : > { %v6740_v37 = vunpack.i.h.bf16 %v6738_v16  ;;  %v6739_v38 = vunpack.i.l.bf16 %v6738_v16  ;;  %v6745_v51 = vunpack.i.h.bf16 %v8122_v10  ;;  %v6744_v52 = vunpack.i.l.bf16 %v8122_v10 }
  0xad   : > { %7032 = vrot.lane.b32.xlu1 %v6991_v53, %s7674_s27  ;;  %7027 = vrot.lane.b32.xlu0 %v8096_v58, %s7680_s22 }
  0xae   : > { %v1513_v57 = vsel %vm331_vm0, %v7575_v56, %v6740_v37  ;;  %v8236_v56 = vpack.i.bf16 %v614_v1, %v612_v63  ;;  %v691_v63 = vrot.slane %v8143_v29, 2 }
  0xaf   : > { %v8131_v21 = vpop.permute.xlu1 %6752  ;;  %v8133_v25 = vpop.permute.xlu0 %6747  ;;  %v1546_v8 = vsel %vm1542_vm6, %v1513_v57, %v6745_v51 }
  0xb0   : > { %v6750_v10 = vunpack.i.h.bf16 %v8133_v25  ;;  %v6749_v11 = vunpack.i.l.bf16 %v8133_v25  ;;  %v6754_v18 = vunpack.i.l.bf16 %v8131_v21  ;;  %v1579_v23 = vsel %vm1575_vm7, %v1546_v8, %v6735_v2 }
  0xb1   : > { %7042 = vrot.lane.b32.xlu1 %v8112_v4, %s7674_s27  ;;  %7037 = vrot.lane.b32.xlu0 %v8129_v17, %s7680_s22  ;;  %v692_v8 = vrot.slane %v8145_v30, 2  ;;  %v488_v30 = vld [vmem:[#allocation2 + $0x120] sm:$0xff] }
  0xb2   : > { %v1610_v27 = vsel %vm1608_vm8, %v1577_v13, %v6750_v10  ;;  %v1609_v28 = vsel %vm1608_vm8, %v1576_v5, %v6749_v11  ;;  %v489_v13 = vld [vmem:[#allocation2 + $0x128] sm:$0xff] }
  0xb3   : > { %v8151_v34 = vpop.permute.xlu1 %6767  ;;  %v8155_v39 = vpop.permute.xlu0 %6757  ;;  %v693_v29 = vsel %vm635_vm2, %v691_v63, %v692_v8 }
  0xb4   : > { %v6760_v14 = vunpack.i.h.bf16 %v8155_v39  ;;  %v6759_v15 = vunpack.i.l.bf16 %v8155_v39  ;;  %v6769_v32 = vunpack.i.l.bf16 %v8151_v34 }
  0xb5   : > { %7052 = vrot.lane.b32.xlu1 %v8129_v17, %s7673_s26  ;;  %7047 = vrot.lane.b32.xlu0 %v8096_v58, %s7673_s26  ;;  %v7576_v58 = vld [vmem:[#allocation2 + $0x18] sm:$0xff] }
  0xb6   : > { %v1512_v59 = vsel %vm331_vm0, %v7576_v58, %v6739_v38  ;;  %v1642_v35 = vsel %vm1641_vm9, %v1609_v28, %v6759_v15  ;;  %v1643_v36 = vsel %vm1641_vm9, %v1610_v27, %v6760_v14  ;;  %v615_v15 = vrot.slane %v488_v30, 1 }
  0xb7   : > { %v8174_v53 = vpop.permute.xlu1 %6772  ;;  %v6763_v60 = vpop.permute.xlu0 %6762  ;;  %v1545_v9 = vsel %vm1542_vm6, %v1512_v59, %v6744_v52  ;;  %v8287_v27 = vpack.i.bf16 %v489_v13, %v488_v30 }
  0xb8   : > { %v6765_v19 = vunpack.i.h.bf16 %v6763_v60  ;;  %v6764_v20 = vunpack.i.l.bf16 %v6763_v60  ;;  %v1578_v22 = vsel %vm1575_vm7, %v1545_v9, %v6734_v3  ;;  %v6775_v37 = vunpack.i.h.bf16 %v8174_v53 }
  0xb9   : > { %7062 = vrot.lane.b32.xlu1 %v8139_v26, %s7675_s28  ;;  %7057 = vrot.lane.b32.xlu0 %v8101_v62, %s7675_s28  ;;  %v6755_v62 = vunpack.i.h.bf16 %v8131_v21  ;;  %v6770_v21 = vunpack.i.h.bf16 %v8151_v34  ;;  %v6774_v38 = vunpack.i.l.bf16 %v8174_v53  ;;  %v1611_v48 = vsel %vm1608_vm8, %v1578_v22, %v6754_v18 }
  0xba   : > { %v1675_v41 = vsel %vm1674_vm10, %v1642_v35, %v6764_v20  ;;  %v1676_v34 = vsel %vm1674_vm10, %v1643_v36, %v6765_v19  ;;  %v1644_v53 = vsel %vm1641_vm9, %v1611_v48, %v6769_v32  ;;  %v694_v9 = vrot.slane %v8147_v31, 2  ;;  %v490_v31 = vld [vmem:[#allocation2 + $0x130] sm:$0x3] }
  0xbb   : > { %v6783_v12 = vpop.permute.xlu1 %6782  ;;  %v6778_v16 = vpop.permute.xlu0 %6777  ;;  %v1612_v49 = vsel %vm1608_vm8, %v1579_v23, %v6755_v62  ;;  %v1677_v57 = vsel %vm1674_vm10, %v1644_v53, %v6774_v38  ;;  %v618_v62 = vrot.slane %v490_v31, 1  ;;  %v696_v19 = vrot.slane %v488_v30, 2 }
  0xbc   : > { %v6780_v24 = vunpack.i.h.bf16 %v6778_v16  ;;  %v6779_v25 = vunpack.i.l.bf16 %v6778_v16  ;;  %v6785_v42 = vunpack.i.h.bf16 %v6783_v12  ;;  %v6784_v43 = vunpack.i.l.bf16 %v6783_v12 }
  0xbd   : > { %7072 = vrot.lane.b32.xlu1 %v8166_v45, %s7676_s21  ;;  %7067 = vrot.lane.b32.xlu0 %v8112_v4, %s7676_s21  ;;  %v1645_v54 = vsel %vm1641_vm9, %v1612_v49, %v6770_v21  ;;  %v695_v12 = vsel %vm635_vm2, %v692_v8, %v694_v9  ;;  %v616_v16 = vrot.slane %v489_v13, 1  ;;  %v697_v20 = vrot.slane %v489_v13, 2 }
  0xbe   : > { %v1708_v44 = vsel %vm1707_vm11, %v1675_v41, %v6779_v25  ;;  %v1709_v47 = vsel %vm1707_vm11, %v1676_v34, %v6780_v24  ;;  %v1678_v58 = vsel %vm1674_vm10, %v1645_v54, %v6775_v37  ;;  %v1710_v2 = vsel %vm1707_vm11, %v1677_v57, %v6784_v43  ;;  %v8279_v24 = vld [vmem:[#allocation2 + $0x138] sm:$0xff]  ;;  %v8283_v25 = vld [vmem:[#allocation2 + $0x148] sm:$0x3] }
  0xbf   : > { %v8214_v33 = vpop.permute.xlu1 %6792  ;;  %v6788_v39 = vpop.permute.xlu0 %6787  ;;  %v1711_v3 = vsel %vm1707_vm11, %v1678_v58, %v6785_v42  ;;  %v8271_v14 = vpack.i.bf16 %v695_v12, %v693_v29  ;;  %v699_v23 = vrot.slane %v490_v31, 2  ;;  %v617_v28 = vsel %vm554_vm3, %v615_v15, %v616_v16  ;;  %v7578_v58 = vld [vmem:[#allocation2 + $0x48] sm:$0xff] }
  0xc0   : > { %v6790_v4 = vunpack.i.h.bf16 %v6788_v39  ;;  %v6789_v40 = vunpack.i.l.bf16 %v6788_v39  ;;  %v619_v21 = vsel %vm554_vm3, %v616_v16, %v618_v62  ;;  %v698_v35 = vsel %vm635_vm2, %v696_v19, %v697_v20 }
  0xc1   : > { %7082 = vrot.lane.b32.xlu1 %v8168_v46, %s7677_s24  ;;  %7077 = vrot.lane.b32.xlu0 %v8129_v17, %s7677_s24  ;;  %v700_v37 = vsel %vm635_vm2, %v697_v20, %v699_v23  ;;  %v620_v38 = vrot.slane %v8279_v24, 1  ;;  %v8304_v34 = vpack.i.bf16 %v619_v21, %v617_v28  ;;  %v6795_v43 = vunpack.i.h.bf16 %v8214_v33 }
  0xc2   : > { %v1741_v51 = vsel %vm1740_vm4, %v1708_v44, %v6789_v40  ;;  %v1742_v52 = vsel %vm1740_vm4, %v1709_v47, %v6790_v4  ;;  %v623_v4 = vrot.slane %v8283_v25, 1  ;;  %v6794_v44 = vunpack.i.l.bf16 %v8214_v33 }
  0xc3   : > { %v8230_v50 = vpop.permute.xlu1 %6802  ;;  %v6798_v55 = vpop.permute.xlu0 %6797  ;;  %v1773_v17 = vpack.c.bf16 %v1742_v52, %v1741_v51  ;;  %v8320_v52 = vpack.i.bf16 %v700_v37, %v698_v35 }
  0xc4   : > { %v6800_v59 = vunpack.i.h.bf16 %v6798_v55  ;;  %v6799_v60 = vunpack.i.l.bf16 %v6798_v55  ;;  %v6805_v40 = vunpack.i.h.bf16 %v8230_v50  ;;  %v6804_v41 = vunpack.i.l.bf16 %v8230_v50 }
  0xc5   : > { %7092 = vrot.lane.b32.xlu1 %v8184_v61, %s7678_s16  ;;  %7087 = vrot.lane.b32.xlu0 %v8139_v26, %s7678_s16 }
  0xc6   : > { %6593 = vmatprep.mubr.msk.bf16.mxu0 %vm1825_vm12, %v1773_v17  ;;  %v1743_v1 = vsel %vm1740_vm4, %v1710_v2, %v6799_v60  ;;  %v1744_v6 = vsel %vm1740_vm4, %v1711_v3, %v6800_v59  ;;  %v1516_v59 = vsel %vm331_vm0, %v7578_v58, %v6804_v41  ;;  %v7579_v3 = vld [vmem:[#allocation2 + $0x38] sm:$0xff] }
  0xc7   : > { %v8250_v7 = vpop.permute.xlu1 %6812  ;;  %v8254_v10 = vpop.permute.xlu0 %6807  ;;  %v1774_v11 = vpack.c.bf16 %v1744_v6, %v1743_v1  ;;  %v1515_v63 = vsel %vm331_vm0, %v7579_v3, %v6795_v43  ;;  %v7580_v1 = vld [vmem:[#allocation2 + $0x30] sm:$0xff] }
  0xc8   : > { %v6815_v47 = vunpack.i.h.bf16 %v8250_v7  ;;  %v6814_v48 = vunpack.i.l.bf16 %v8250_v7  ;;  %v6810_v49 = vunpack.i.h.bf16 %v8254_v10  ;;  %v6809_v50 = vunpack.i.l.bf16 %v8254_v10 }
  0xc9   : > { %7102 = vrot.lane.b32.xlu1 %v8236_v56, %s7679_s17  ;;  %7097 = vrot.lane.b32.xlu0 %v8166_v45, %s7679_s17  ;;  %v1514_v6 = vsel %vm331_vm0, %v7580_v1, %v6794_v44 }
  0xca   : > { %6594 = vmatmul.mubr.msk.bf16.vlgmr.msra.gmra.mrb[0].mxu0 %vm1825_vm12, %v1774_v11  ;;  %v1549_v7 = vsel %vm1542_vm6, %v1516_v59, %v6814_v48  ;;  %v1548_v9 = vsel %vm1542_vm6, %v1515_v63, %v6810_v49  ;;  %v1547_v10 = vsel %vm1542_vm6, %v1514_v6, %v6809_v50 }
  0xcb   : > { %v8261_v26 = vpop.permute.xlu1 %6822  ;;  %v8265_v5 = vpop.permute.xlu0 %6817 }
  0xcc   : > { %v6825_v53 = vunpack.i.h.bf16 %v8261_v26  ;;  %v6824_v54 = vunpack.i.l.bf16 %v8261_v26  ;;  %v6820_v60 = vunpack.i.h.bf16 %v8265_v5  ;;  %v6819_v2 = vunpack.i.l.bf16 %v8265_v5 }
  0xcd   : > { %7112 = vrot.lane.b32.xlu1 %v8166_v45, %s7674_s27  ;;  %7107 = vrot.lane.b32.xlu0 %v8168_v46, %s7680_s22  ;;  %v8281_v45 = vld [vmem:[#allocation2 + $0x140] sm:$0xff] }
  0xce   : > { %v621_v39 = vrot.slane %v8281_v45, 1  ;;  %v8308_v42 = vpack.i.bf16 %v8281_v45, %v8279_v24  ;;  %v1582_v12 = vsel %vm1575_vm7, %v1549_v7, %v6824_v54  ;;  %v1581_v15 = vsel %vm1575_vm7, %v1548_v9, %v6820_v60 }
  0xcf   : > { %v8273_v18 = vpop.permute.xlu1 %6832  ;;  %v8275_v22 = vpop.permute.xlu0 %6827  ;;  %v702_v9 = vrot.slane %v8281_v45, 2 }
  0xd0   : > { %v8325_v55 = vsel %vm554_vm3, %v620_v38, %v621_v39  ;;  %v8328_v17 = vsel %vm554_vm3, %v621_v39, %v623_v4  ;;  %v6830_v11 = vunpack.i.h.bf16 %v8275_v22  ;;  %v6829_v26 = vunpack.i.l.bf16 %v8275_v22 }
  0xd1   : > { %7122 = vrot.lane.b32.xlu1 %v8236_v56, %s7674_s27  ;;  %7117 = vrot.lane.b32.xlu0 %v8271_v14, %s7680_s22  ;;  %v6835_v19 = vunpack.i.h.bf16 %v8273_v18  ;;  %v6834_v20 = vunpack.i.l.bf16 %v8273_v18  ;;  %v8386_v60 = vpack.i.bf16 %v8328_v17, %v8325_v55  ;;  %v701_v55 = vrot.slane %v8279_v24, 2 }
  0xd2   : > { %v1614_v21 = vsel %vm1608_vm8, %v1581_v15, %v6830_v11 }
  0xd3   : > { %v8291_v32 = vpop.permute.xlu1 %6842  ;;  %v8294_v36 = vpop.permute.xlu0 %6837  ;;  %v1615_v50 = vsel %vm1608_vm8, %v1582_v12, %v6834_v20  ;;  %v496_v12 = vld [vmem:[#allocation2 + $0x160] sm:$0x3]  ;;  %v703_v45 = vsel %vm635_vm2, %v701_v55, %v702_v9  ;;  %v8425_v20 = vld [vmem:[#allocation2 + $0x170] sm:$0xff]  ;;  %v7583_v55 = vld [vmem:[#allocation2 + $0x68] sm:$0xff] }
  0xd4   : > { %v6840_v13 = vunpack.i.h.bf16 %v8294_v36  ;;  %v6839_v31 = vunpack.i.l.bf16 %v8294_v36  ;;  %v6845_v35 = vunpack.i.h.bf16 %v8291_v32  ;;  %v6844_v36 = vunpack.i.l.bf16 %v8291_v32 }
  0xd5   : > { %7132 = vrot.lane.b32.xlu1 %v8271_v14, %s7673_s26  ;;  %7127 = vrot.lane.b32.xlu0 %v8168_v46, %s7673_s26  ;;  %v7577_v46 = vld [vmem:[#allocation2 + $0x50] sm:$0xff] }
  0xd6   : > { %v1517_v57 = vsel %vm331_vm0, %v7577_v46, %v6805_v40  ;;  %v1647_v39 = vsel %vm1641_vm9, %v1614_v21, %v6840_v13  ;;  %v1648_v46 = vsel %vm1641_vm9, %v1615_v50, %v6844_v36 }
  0xd7   : > { %v8318_v51 = vpop.permute.xlu1 %6852  ;;  %v6848_v33 = vpop.permute.xlu0 %6847  ;;  %v1550_v8 = vsel %vm1542_vm6, %v1517_v57, %v6815_v47 }
  0xd8   : > { %v1583_v30 = vsel %vm1575_vm7, %v1550_v8, %v6825_v53  ;;  %v6850_v16 = vunpack.i.h.bf16 %v6848_v33  ;;  %v6849_v62 = vunpack.i.l.bf16 %v6848_v33  ;;  %v6855_v18 = vunpack.i.h.bf16 %v8318_v51 }
  0xd9   : > { %7142 = vrot.lane.b32.xlu1 %v8287_v27, %s7675_s28  ;;  %7137 = vrot.lane.b32.xlu0 %v8184_v61, %s7675_s28  ;;  %v1580_v61 = vsel %vm1575_vm7, %v1547_v10, %v6819_v2  ;;  %v6854_v4 = vunpack.i.l.bf16 %v8318_v51  ;;  %v1616_v51 = vsel %vm1608_vm8, %v1583_v30, %v6835_v19  ;;  %v704_v10 = vrot.slane %v8283_v25, 2  ;;  %v8423_v19 = vld [vmem:[#allocation2 + $0x168] sm:$0xff] }
  0xda   : > { %v1613_v28 = vsel %vm1608_vm8, %v1580_v61, %v6829_v26  ;;  %v1680_v41 = vsel %vm1674_vm10, %v1647_v39, %v6850_v16  ;;  %v1649_v57 = vsel %vm1641_vm9, %v1616_v51, %v6845_v35  ;;  %v709_v16 = vrot.slane %v496_v12, 2 }
  0xdb   : > { %v6863_v29 = vpop.permute.xlu1 %6862  ;;  %v6858_v5 = vpop.permute.xlu0 %6857  ;;  %v1646_v38 = vsel %vm1641_vm9, %v1613_v28, %v6839_v31  ;;  %v1682_v2 = vsel %vm1674_vm10, %v1649_v57, %v6855_v18  ;;  %v705_v25 = vsel %vm635_vm2, %v702_v9, %v704_v10  ;;  %v631_v39 = vrot.slane %v8425_v20, 1 }
  0xdc   : > { %v6860_v22 = vunpack.i.h.bf16 %v6858_v5  ;;  %v6859_v23 = vunpack.i.l.bf16 %v6858_v5  ;;  %v6865_v32 = vunpack.i.h.bf16 %v6863_v29  ;;  %v6864_v47 = vunpack.i.l.bf16 %v6863_v29  ;;  %v494_v29 = vld [vmem:[#allocation2 + $0x150] sm:$0xff] }
  0xdd   : > { %7152 = vrot.lane.b32.xlu1 %v8304_v34, %s7676_s21  ;;  %7147 = vrot.lane.b32.xlu0 %v8236_v56, %s7676_s21  ;;  %v1679_v56 = vsel %vm1674_vm10, %v1646_v38, %v6849_v62  ;;  %v625_v30 = vrot.slane %v494_v29, 1  ;;  %v628_v5 = vrot.slane %v496_v12, 1  ;;  %v706_v61 = vrot.slane %v494_v29, 2 }
  0xde   : > { %v1712_v48 = vsel %vm1707_vm11, %v1679_v56, %v6859_v23  ;;  %v1713_v49 = vsel %vm1707_vm11, %v1680_v41, %v6860_v22  ;;  %v1715_v6 = vsel %vm1707_vm11, %v1682_v2, %v6865_v32  ;;  %v8421_v62 = vpack.i.bf16 %v705_v25, %v703_v45  ;;  %v8427_v22 = vld [vmem:[#allocation2 + $0x178] sm:$0x3]  ;;  %v7581_v2 = vld [vmem:[#allocation2 + $0x80] sm:$0xff] }
  0xdf   : > { %v8362_v37 = vpop.permute.xlu1 %6872  ;;  %v6868_v40 = vpop.permute.xlu0 %6867  ;;  %v630_v38 = vrot.slane %v8423_v19, 1  ;;  %v633_v18 = vrot.slane %v8427_v22, 1  ;;  %v8472_v57 = vpack.i.bf16 %v8425_v20, %v8423_v19 }
  0xe0   : > { %v6870_v43 = vunpack.i.h.bf16 %v6868_v40  ;;  %v6869_v44 = vunpack.i.l.bf16 %v6868_v40  ;;  %v6874_v50 = vunpack.i.l.bf16 %v8362_v37 }
  0xe1   : > { %7162 = vrot.lane.b32.xlu1 %v8320_v52, %s7677_s24  ;;  %7157 = vrot.lane.b32.xlu0 %v8271_v14, %s7677_s24  ;;  %v1681_v14 = vsel %vm1674_vm10, %v1648_v46, %v6854_v4 }
  0xe2   : > { %v1745_v53 = vsel %vm1740_vm4, %v1712_v48, %v6869_v44  ;;  %v1746_v54 = vsel %vm1740_vm4, %v1713_v49, %v6870_v43  ;;  %v1714_v1 = vsel %vm1707_vm11, %v1681_v14, %v6864_v47  ;;  %v632_v47 = vsel %vm554_vm3, %v630_v38, %v631_v39 }
  0xe3   : > { %v8380_v33 = vpop.permute.xlu1 %6882  ;;  %v6878_v58 = vpop.permute.xlu0 %6877  ;;  %v1775_v59 = vpack.c.bf16 %v1746_v54, %v1745_v53  ;;  %v634_v48 = vsel %vm554_vm3, %v631_v39, %v633_v18  ;;  %v6875_v49 = vunpack.i.h.bf16 %v8362_v37 }
  0xe4   : > { %v6880_v3 = vunpack.i.h.bf16 %v6878_v58  ;;  %v6879_v63 = vunpack.i.l.bf16 %v6878_v58  ;;  %v6885_v44 = vunpack.i.h.bf16 %v8380_v33  ;;  %v6884_v32 = vunpack.i.l.bf16 %v8380_v33 }
  0xe5   : > { %7172 = vrot.lane.b32.xlu1 %v8308_v42, %s7678_s16  ;;  %7167 = vrot.lane.b32.xlu0 %v8287_v27, %s7678_s16  ;;  %v495_v27 = vld [vmem:[#allocation2 + $0x158] sm:$0xff]  ;;  %v8476_v14 = vpack.i.bf16 %v634_v48, %v632_v47 }
  0xe6   : > { %6597 = vmatprep.mubr.msk.bf16.mxu0 %vm1825_vm12, %v1775_v59  ;;  %v1748_v17 = vsel %vm1740_vm4, %v1715_v6, %v6880_v3  ;;  %v1747_v7 = vsel %vm1740_vm4, %v1714_v1, %v6879_v63  ;;  %v626_v31 = vrot.slane %v495_v27, 1  ;;  %v707_v15 = vrot.slane %v495_v27, 2  ;;  %v7582_v3 = vld [vmem:[#allocation2 + $0x78] sm:$0xff] }
  0xe7   : > { %v8400_v8 = vpop.permute.xlu1 %6892  ;;  %v8404_v11 = vpop.permute.xlu0 %6887  ;;  %v1776_v26 = vpack.c.bf16 %v1748_v17, %v1747_v7  ;;  %v8446_v40 = vpack.i.bf16 %v495_v27, %v494_v29  ;;  %v1520_v63 = vsel %vm331_vm0, %v7582_v3, %v6884_v32  ;;  %v1519_v17 = vsel %vm331_vm0, %v7583_v55, %v6875_v49  ;;  %v7584_v7 = vld [vmem:[#allocation2 + $0x60] sm:$0xff] }
  0xe8   : > { %v627_v21 = vsel %vm554_vm3, %v625_v30, %v626_v31  ;;  %v708_v35 = vsel %vm635_vm2, %v706_v61, %v707_v15  ;;  %v710_v36 = vsel %vm635_vm2, %v707_v15, %v709_v16  ;;  %v6895_v51 = vunpack.i.h.bf16 %v8400_v8 }
  0xe9   : > { %7182 = vrot.lane.b32.xlu1 %v8386_v60, %s7679_s17  ;;  %7177 = vrot.lane.b32.xlu0 %v8304_v34, %s7679_s17  ;;  %v8452_v43 = vpack.i.bf16 %v710_v36, %v708_v35  ;;  %v6894_v53 = vunpack.i.l.bf16 %v8400_v8  ;;  %v6890_v54 = vunpack.i.h.bf16 %v8404_v11  ;;  %v6889_v33 = vunpack.i.l.bf16 %v8404_v11 }
  0xea   : > { %6598 = vmatmul.mubr.msk.bf16.gmra.mrb[4].mxu0 %vm1825_vm12, %v1776_v26  ;;  %v1518_v8 = vsel %vm331_vm0, %v7584_v7, %v6874_v50 }
  0xeb   : > { %v8411_v24 = vpop.permute.xlu1 %6902  ;;  %v8415_v13 = vpop.permute.xlu0 %6897  ;;  %v1553_v9 = vsel %vm1542_vm6, %v1520_v63, %v6894_v53  ;;  %v1552_v11 = vsel %vm1542_vm6, %v1519_v17, %v6890_v54  ;;  %v1551_v26 = vsel %vm1542_vm6, %v1518_v8, %v6889_v33  ;;  %v711_v63 = vrot.slane %v8423_v19, 2 }
  0xec   : > { %v6905_v58 = vunpack.i.h.bf16 %v8411_v24  ;;  %v6904_v37 = vunpack.i.l.bf16 %v8411_v24  ;;  %v6900_v1 = vunpack.i.h.bf16 %v8415_v13  ;;  %v6899_v6 = vunpack.i.l.bf16 %v8415_v13 }
  0xed   : > { %7192 = vrot.lane.b32.xlu1 %v8304_v34, %s7674_s27  ;;  %7187 = vrot.lane.b32.xlu0 %v8320_v52, %s7680_s22  ;;  %v629_v34 = vsel %vm554_vm3, %v626_v31, %v628_v5  ;;  %v712_v19 = vrot.slane %v8425_v20, 2  ;;  %v714_v8 = vrot.slane %v8427_v22, 2 }
  0xee   : > { %v8450_v41 = vpack.i.bf16 %v629_v34, %v627_v21  ;;  %v1586_v24 = vsel %vm1575_vm7, %v1553_v9, %v6904_v37  ;;  %v1585_v31 = vsel %vm1575_vm7, %v1552_v11, %v6900_v1 }
  0xef   : > { %v8429_v23 = vpop.permute.xlu1 %6912  ;;  %v8431_v28 = vpop.permute.xlu0 %6907  ;;  %v713_v20 = vsel %vm635_vm2, %v711_v63, %v712_v19  ;;  %v715_v22 = vsel %vm635_vm2, %v712_v19, %v714_v8 }
  0xf0   : > { %v6910_v29 = vunpack.i.h.bf16 %v8431_v28  ;;  %v6909_v27 = vunpack.i.l.bf16 %v8431_v28  ;;  %v6915_v15 = vunpack.i.h.bf16 %v8429_v23  ;;  %v6914_v16 = vunpack.i.l.bf16 %v8429_v23 }
  0xf1   : > { %7202 = vrot.lane.b32.xlu1 %v8386_v60, %s7674_s27  ;;  %7197 = vrot.lane.b32.xlu0 %v8421_v62, %s7680_s22 }
  0xf2   : > { %v1618_v35 = vsel %vm1608_vm8, %v1585_v31, %v6910_v29  ;;  %v1619_v54 = vsel %vm1608_vm8, %v1586_v24, %v6914_v16  ;;  %v502_v24 = vld [vmem:[#allocation2 + $0x190] sm:$0x3]  ;;  %v8567_v16 = vld [vmem:[#allocation2 + $0x1a8] sm:$0x3] }
  0xf3   : > { %v8444_v4 = vpop.permute.xlu1 %6922  ;;  %v8448_v56 = vpop.permute.xlu0 %6917 }
  0xf4   : > { %v6920_v25 = vunpack.i.h.bf16 %v8448_v56  ;;  %v6919_v30 = vunpack.i.l.bf16 %v8448_v56  ;;  %v6925_v36 = vunpack.i.h.bf16 %v8444_v4  ;;  %v6924_v38 = vunpack.i.l.bf16 %v8444_v4 }
  0xf5   : > { %7212 = vrot.lane.b32.xlu1 %v8421_v62, %s7673_s26  ;;  %7207 = vrot.lane.b32.xlu0 %v8320_v52, %s7673_s26  ;;  %v1521_v52 = vsel %vm331_vm0, %v7581_v2, %v6885_v44 }
  0xf6   : > { %v1554_v10 = vsel %vm1542_vm6, %v1521_v52, %v6895_v51  ;;  %v1651_v56 = vsel %vm1641_vm9, %v1618_v35, %v6920_v25 }
  0xf7   : > { %v8468_v46 = vpop.permute.xlu1 %6932  ;;  %v6928_v59 = vpop.permute.xlu0 %6927  ;;  %v1587_v45 = vsel %vm1575_vm7, %v1554_v10, %v6905_v58 }
  0xf8   : > { %v6930_v5 = vunpack.i.h.bf16 %v6928_v59  ;;  %v6929_v61 = vunpack.i.l.bf16 %v6928_v59  ;;  %v6935_v23 = vunpack.i.h.bf16 %v8468_v46  ;;  %v6934_v44 = vunpack.i.l.bf16 %v8468_v46 }
  0xf9   : > { %7222 = vrot.lane.b32.xlu1 %v8446_v40, %s7675_s28  ;;  %7217 = vrot.lane.b32.xlu0 %v8308_v42, %s7675_s28  ;;  %v1584_v42 = vsel %vm1575_vm7, %v1551_v26, %v6899_v6  ;;  %v1620_v33 = vsel %vm1608_vm8, %v1587_v45, %v6915_v15  ;;  %v1652_v59 = vsel %vm1641_vm9, %v1619_v54, %v6924_v38  ;;  %v500_v26 = vld [vmem:[#allocation2 + $0x180] sm:$0xff] }
  0xfa   : > { %v1617_v34 = vsel %vm1608_vm8, %v1584_v42, %v6909_v27  ;;  %v1684_v47 = vsel %vm1674_vm10, %v1651_v56, %v6930_v5  ;;  %v1653_v2 = vsel %vm1641_vm9, %v1620_v33, %v6925_v36  ;;  %v727_v5 = vrot.slane %v502_v24, 2  ;;  %v8565_v15 = vld [vmem:[#allocation2 + $0x1a0] sm:$0xff] }
  0xfb   : > { %v6943_v12 = vpop.permute.xlu1 %6942  ;;  %v6938_v13 = vpop.permute.xlu0 %6937  ;;  %v1650_v18 = vsel %vm1641_vm9, %v1617_v34, %v6919_v30  ;;  %v1686_v1 = vsel %vm1674_vm10, %v1653_v2, %v6935_v23  ;;  %v722_v30 = vrot.slane %v502_v24, 1  ;;  %v735_v23 = vrot.slane %v8567_v16, 1 }
  0xfc   : > { %v6940_v28 = vunpack.i.h.bf16 %v6938_v13  ;;  %v6939_v21 = vunpack.i.l.bf16 %v6938_v13  ;;  %v6945_v4 = vunpack.i.h.bf16 %v6943_v12  ;;  %v6944_v50 = vunpack.i.l.bf16 %v6943_v12  ;;  %v501_v12 = vld [vmem:[#allocation2 + $0x188] sm:$0xff] }
  0xfd   : > { %7232 = vrot.lane.b32.xlu1 %v8450_v41, %s7676_s21  ;;  %7227 = vrot.lane.b32.xlu0 %v8386_v60, %s7676_s21  ;;  %v1683_v60 = vsel %vm1674_vm10, %v1650_v18, %v6929_v61  ;;  %v720_v25 = vrot.slane %v501_v12, 1  ;;  %v724_v13 = vrot.slane %v500_v26, 2  ;;  %v725_v42 = vrot.slane %v501_v12, 2  ;;  %v8563_v61 = vld [vmem:[#allocation2 + $0x198] sm:$0xff] }
  0xfe   : > { %v1716_v51 = vsel %vm1707_vm11, %v1683_v60, %v6939_v21  ;;  %v1717_v53 = vsel %vm1707_vm11, %v1684_v47, %v6940_v28  ;;  %v1719_v7 = vsel %vm1707_vm11, %v1686_v1, %v6945_v4  ;;  %v8571_v28 = vpack.i.bf16 %v715_v22, %v713_v20 }
  0xff   : > { %v8510_v39 = vpop.permute.xlu1 %6952  ;;  %v6948_v32 = vpop.permute.xlu0 %6947  ;;  %v723_v35 = vsel %vm554_vm3, %v720_v25, %v722_v30  ;;  %v726_v36 = vsel %vm635_vm2, %v724_v13, %v725_v42  ;;  %v728_v38 = vsel %vm635_vm2, %v725_v42, %v727_v5  ;;  %v733_v18 = vrot.slane %v8565_v15, 1 }
 0x100   : > { %v6950_v48 = vunpack.i.h.bf16 %v6948_v32  ;;  %v6949_v49 = vunpack.i.l.bf16 %v6948_v32  ;;  %v732_v56 = vrot.slane %v8563_v61, 1  ;;  %v8594_v47 = vpack.i.bf16 %v728_v38, %v726_v36 }
 0x101   : > { %7242 = vrot.lane.b32.xlu1 %v8452_v43, %s7677_s24  ;;  %7237 = vrot.lane.b32.xlu0 %v8421_v62, %s7677_s24  ;;  %v1685_v62 = vsel %vm1674_vm10, %v1652_v59, %v6934_v44  ;;  %v8588_v44 = vpack.i.bf16 %v501_v12, %v500_v26  ;;  %v738_v54 = vrot.slane %v8565_v15, 2  ;;  %v6955_v33 = vunpack.i.h.bf16 %v8510_v39 }
 0x102   : > { %v1749_v46 = vsel %vm1740_vm4, %v1716_v51, %v6949_v49  ;;  %v1750_v58 = vsel %vm1740_vm4, %v1717_v53, %v6950_v48  ;;  %v1718_v17 = vsel %vm1707_vm11, %v1685_v62, %v6944_v50  ;;  %v7331_v49 = vpack.i.bf16 %v8565_v15, %v8563_v61 }
 0x103   : > { %v8528_v37 = vpop.permute.xlu1 %6962  ;;  %v6958_v52 = vpop.permute.xlu0 %6957  ;;  %v1777_v3 = vpack.c.bf16 %v1750_v58, %v1749_v46  ;;  %v8601_v4 = vsel %vm554_vm3, %v732_v56, %v733_v18  ;;  %v8604_v50 = vsel %vm554_vm3, %v733_v18, %v735_v23  ;;  %v6954_v46 = vunpack.i.l.bf16 %v8510_v39 }
 0x104   : > { %v6960_v6 = vunpack.i.h.bf16 %v6958_v52  ;;  %v6959_v55 = vunpack.i.l.bf16 %v6958_v52  ;;  %v6965_v51 = vunpack.i.h.bf16 %v8528_v37  ;;  %v6964_v53 = vunpack.i.l.bf16 %v8528_v37 }
 0x105   : > { %7252 = vrot.lane.b32.xlu1 %v8472_v57, %s7678_s16  ;;  %7247 = vrot.lane.b32.xlu0 %v8446_v40, %s7678_s16  ;;  %v719_v40 = vrot.slane %v500_v26, 1  ;;  %v7341_v63 = vpack.i.bf16 %v8604_v50, %v8601_v4 }
 0x106   : > { %6601 = vmatprep.mubr.msk.bf16.mxu0 %vm1825_vm12, %v1777_v3  ;;  %v1752_v9 = vsel %vm1740_vm4, %v1719_v7, %v6960_v6  ;;  %v1751_v10 = vsel %vm1740_vm4, %v1718_v17, %v6959_v55  ;;  %v737_v3 = vrot.slane %v8563_v61, 2  ;;  %v740_v6 = vrot.slane %v8567_v16, 2  ;;  %v7585_v55 = vld [vmem:[#allocation2 + $0xb0] sm:$0xff]  ;;  %v7586_v17 = vld [vmem:[#allocation2 + $0xa8] sm:$0xff] }
 0x107   : > { %v8546_v11 = vpop.permute.xlu1 %6972  ;;  %v8548_v29 = vpop.permute.xlu0 %6967  ;;  %v1778_v27 = vpack.c.bf16 %v1752_v9, %v1751_v10  ;;  %v721_v34 = vsel %vm554_vm3, %v719_v40, %v720_v25  ;;  %v1524_v7 = vsel %vm331_vm0, %v7586_v17, %v6964_v53  ;;  %v7587_v9 = vld [vmem:[#allocation2 + $0x98] sm:$0xff] }
 0x108   : > { %v8592_v60 = vpack.i.bf16 %v723_v35, %v721_v34  ;;  %v6975_v58 = vunpack.i.h.bf16 %v8546_v11  ;;  %v6974_v59 = vunpack.i.l.bf16 %v8546_v11  ;;  %v6970_v2 = vunpack.i.h.bf16 %v8548_v29  ;;  %v7588_v11 = vld [vmem:[#allocation2 + $0x90] sm:$0xff] }
 0x109   : > { %7262 = vrot.lane.b32.xlu1 %v8476_v14, %s7679_s17  ;;  %7257 = vrot.lane.b32.xlu0 %v8450_v41, %s7679_s17  ;;  %v6969_v37 = vunpack.i.l.bf16 %v8548_v29  ;;  %v1523_v10 = vsel %vm331_vm0, %v7587_v9, %v6955_v33  ;;  %v1522_v26 = vsel %vm331_vm0, %v7588_v11, %v6954_v46 }
 0x10a   : > { %6602 = vmatmul.mubr.msk.bf16.gmra.mrb[8].mxu0 %vm1825_vm12, %v1778_v27  ;;  %v1557_v29 = vsel %vm1542_vm6, %v1524_v7, %v6974_v59  ;;  %v1556_v12 = vsel %vm1542_vm6, %v1523_v10, %v6970_v2 }
 0x10b   : > { %v8557_v45 = vpop.permute.xlu1 %6982  ;;  %v8559_v31 = vpop.permute.xlu0 %6977  ;;  %v1555_v24 = vsel %vm1542_vm6, %v1522_v26, %v6969_v37 }
 0x10c   : > { %v6985_v39 = vunpack.i.h.bf16 %v8557_v45  ;;  %v6984_v62 = vunpack.i.l.bf16 %v8557_v45  ;;  %v6980_v19 = vunpack.i.h.bf16 %v8559_v31  ;;  %v6979_v8 = vunpack.i.l.bf16 %v8559_v31 }
 0x10d   : > { %7272 = vrot.lane.b32.xlu1 %v8450_v41, %s7674_s27  ;;  %7267 = vrot.lane.b32.xlu0 %v8452_v43, %s7680_s22 }
 0x10e   : > { %v1590_v45 = vsel %vm1575_vm7, %v1557_v29, %v6984_v62  ;;  %v1589_v31 = vsel %vm1575_vm7, %v1556_v12, %v6980_v19 }
 0x10f   : > { %v8573_v21 = vpop.permute.xlu1 %6992  ;;  %v8578_v41 = vpop.permute.xlu0 %6987 }
 0x110   : > { %v6990_v20 = vunpack.i.h.bf16 %v8578_v41  ;;  %v6989_v22 = vunpack.i.l.bf16 %v8578_v41  ;;  %v6995_v35 = vunpack.i.h.bf16 %v8573_v21  ;;  %v6994_v36 = vunpack.i.l.bf16 %v8573_v21 }
 0x111   : > { %7282 = vrot.lane.b32.xlu1 %v8476_v14, %s7674_s27  ;;  %7277 = vrot.lane.b32.xlu0 %v8571_v28, %s7680_s22 }
 0x112   : > { %v1622_v56 = vsel %vm1608_vm8, %v1589_v31, %v6990_v20 }
 0x113   : > { %v8590_v32 = vpop.permute.xlu1 %7002  ;;  %v8596_v48 = vpop.permute.xlu0 %6997 }
 0x114   : > { %v7000_v30 = vunpack.i.h.bf16 %v8596_v48  ;;  %v6999_v13 = vunpack.i.l.bf16 %v8596_v48  ;;  %v7005_v23 = vunpack.i.h.bf16 %v8590_v32  ;;  %v7004_v48 = vunpack.i.l.bf16 %v8590_v32 }
 0x115   : > { %7292 = vrot.lane.b32.xlu1 %v8571_v28, %s7673_s26  ;;  %7287 = vrot.lane.b32.xlu0 %v8452_v43, %s7673_s26  ;;  %v1525_v43 = vsel %vm331_vm0, %v7585_v55, %v6965_v51 }
 0x116   : > { %v1558_v27 = vsel %vm1542_vm6, %v1525_v43, %v6975_v58  ;;  %v1655_v33 = vsel %vm1641_vm9, %v1622_v56, %v7000_v30 }
 0x117   : > { %v8619_v52 = vpop.permute.xlu1 %7012  ;;  %v7008_v1 = vpop.permute.xlu0 %7007  ;;  %v1591_v25 = vsel %vm1575_vm7, %v1558_v27, %v6985_v39 }
 0x118   : > { %v7010_v5 = vunpack.i.h.bf16 %v7008_v1  ;;  %v7009_v34 = vunpack.i.l.bf16 %v7008_v1  ;;  %v7015_v21 = vunpack.i.h.bf16 %v8619_v52  ;;  %v7014_v46 = vunpack.i.l.bf16 %v8619_v52 }
 0x119   : > { %7302 = vrot.lane.b32.xlu1 %v8588_v44, %s7675_s28  ;;  %7297 = vrot.lane.b32.xlu0 %v8472_v57, %s7675_s28  ;;  %v1588_v57 = vsel %vm1575_vm7, %v1555_v24, %v6979_v8  ;;  %v1623_v52 = vsel %vm1608_vm8, %v1590_v45, %v6994_v36  ;;  %v1624_v55 = vsel %vm1608_vm8, %v1591_v25, %v6995_v35  ;;  %v7589_v35 = vld [vmem:[#allocation2 + $0xe0] sm:$0xff] }
 0x11a   : > { %v1621_v18 = vsel %vm1608_vm8, %v1588_v57, %v6989_v22  ;;  %v1688_v59 = vsel %vm1674_vm10, %v1655_v33, %v7010_v5  ;;  %v1656_v19 = vsel %vm1641_vm9, %v1623_v52, %v7004_v48  ;;  %v1657_v8 = vsel %vm1641_vm9, %v1624_v55, %v7005_v23  ;;  %v7591_v23 = vld [vmem:[#allocation2 + $0xc8] sm:$0xff] }
 0x11b   : > { %v7023_v40 = vpop.permute.xlu1 %7022  ;;  %v7018_v42 = vpop.permute.xlu0 %7017  ;;  %v1654_v53 = vsel %vm1641_vm9, %v1621_v18, %v6999_v13  ;;  %v1689_v11 = vsel %vm1674_vm10, %v1656_v19, %v7014_v46  ;;  %v1690_v26 = vsel %vm1674_vm10, %v1657_v8, %v7015_v21 }
 0x11c   : > { %v7020_v41 = vunpack.i.h.bf16 %v7018_v42  ;;  %v7019_v38 = vunpack.i.l.bf16 %v7018_v42  ;;  %v7025_v32 = vunpack.i.h.bf16 %v7023_v40  ;;  %v7024_v39 = vunpack.i.l.bf16 %v7023_v40 }
 0x11d   : > { %7312 = vrot.lane.b32.xlu1 %v8592_v60, %s7676_s21  ;;  %7307 = vrot.lane.b32.xlu0 %v8476_v14, %s7676_s21  ;;  %v1687_v14 = vsel %vm1674_vm10, %v1654_v53, %v7009_v34  ;;  %s6372_s21 = sshll.u32 %s7755_s13, 4  ;;  %s7683_s13 = smov [#allocation6]  }
 0x11e   : > { %v1720_v62 = vsel %vm1707_vm11, %v1687_v14, %v7019_v38  ;;  %v1721_v1 = vsel %vm1707_vm11, %v1688_v59, %v7020_v41  ;;  %v1722_v12 = vsel %vm1707_vm11, %v1689_v11, %v7024_v39  ;;  %v1723_v24 = vsel %vm1707_vm11, %v1690_v26, %v7025_v32  ;;  %v7590_v41 = vld [vmem:[#allocation2 + $0xd8] sm:$0xff]  ;;  %s10090_s23 = scalar_lea.hbm %s10141_s9, %s6372_s21  ;;  %s7612_s26 = sshll.u32 %s7683_s13, 4  ;;  %s7613_s26 = int_to_ptr.vmem [resolvable:$false] %s7612_s26 }
 0x11f   : > { %v8659_v51 = vpop.permute.xlu1 %7032  ;;  %v7028_v58 = vpop.permute.xlu0 %7027  ;;  %s7614_s27 = scalar_lea.vmem %s7613_s26, 32 }
 0x120   : > { %v7030_v2 = vunpack.i.h.bf16 %v7028_v58  ;;  %v7029_v37 = vunpack.i.l.bf16 %v7028_v58 }
 0x121   : > { %7322 = vrot.lane.b32.xlu1 %v8594_v47, %s7677_s24  ;;  %7317 = vrot.lane.b32.xlu0 %v8571_v28, %s7677_s24  ;;  %v739_v28 = vsel %vm635_vm2, %v737_v3, %v738_v54  ;;  %v741_v3 = vsel %vm635_vm2, %v738_v54, %v740_v6 }
 0x122   : > { %v1753_v43 = vsel %vm1740_vm4, %v1720_v62, %v7029_v37  ;;  %v1754_v17 = vsel %vm1740_vm4, %v1721_v1, %v7030_v2 }
 0x123   : > { %v7043_v7 = vpop.permute.xlu1 %7042  ;;  %v1779_v9 = vpack.c.bf16 %v1754_v17, %v1753_v43  ;;  %v7038_v10 = vpop.permute.xlu0 %7037 }
 0x124   : > { %v7040_v29 = vunpack.i.h.bf16 %v7038_v10  ;;  %v7039_v27 = vunpack.i.l.bf16 %v7038_v10  ;;  %v7045_v50 = vunpack.i.h.bf16 %v7043_v7 }
 0x125   : > { %7332 = vrot.lane.b32.xlu1 %v7331_v49, %s7678_s16  ;;  %7327 = vrot.lane.b32.xlu0 %v8588_v44, %s7678_s16  ;;  %v7351_v44 = vpack.i.bf16 %v741_v3, %v739_v28 }
 0x126   : > { %6605 = vmatprep.mubr.msk.bf16.mxu0 %vm1825_vm12, %v1779_v9  ;;  %v1756_v20 = vsel %vm1740_vm4, %v1723_v24, %v7040_v29  ;;  %v1755_v61 = vsel %vm1740_vm4, %v1722_v12, %v7039_v27  ;;  %v1529_v36 = vsel %vm331_vm0, %v7589_v35, %v7045_v50 }
 0x127   : > { %v7053_v49 = vpop.permute.xlu1 %7052  ;;  %v1780_v22 = vpack.c.bf16 %v1756_v20, %v1755_v61  ;;  %v7048_v40 = vpop.permute.xlu0 %7047 }
 0x128   : > { %v7055_v25 = vunpack.i.h.bf16 %v7053_v49  ;;  %v7054_v30 = vunpack.i.l.bf16 %v7053_v49  ;;  %v7050_v13 = vunpack.i.h.bf16 %v7048_v40  ;;  %v7049_v42 = vunpack.i.l.bf16 %v7048_v40 }
 0x129   : > { %7342 = vrot.lane.b32.xlu1 %v7341_v63, %s7679_s17  ;;  %7337 = vrot.lane.b32.xlu0 %v8592_v60, %s7679_s17  ;;  %v7044_v63 = vunpack.i.l.bf16 %v7043_v7  ;;  %v7035_v60 = vunpack.i.h.bf16 %v8659_v51 }
 0x12a   : > { %6606 = vmatmul.mubr.msk.bf16.gmra.mrb[12].mxu0 %vm1825_vm12, %v1780_v22  ;;  %v1562_v21 = vsel %vm1542_vm6, %v1529_v36, %v7055_v25 }
 0x12b   : > { %v7063_v15 = vpop.permute.xlu1 %7062  ;;  %v7058_v16 = vpop.permute.xlu0 %7057  ;;  %v1528_v38 = vsel %vm331_vm0, %v7590_v41, %v7044_v63  ;;  %v1527_v48 = vsel %vm331_vm0, %v7591_v23, %v7035_v60 }
 0x12c   : > { %v7065_v31 = vunpack.i.h.bf16 %v7063_v15  ;;  %v7064_v5 = vunpack.i.l.bf16 %v7063_v15  ;;  %v7060_v18 = vunpack.i.h.bf16 %v7058_v16  ;;  %v7059_v56 = vunpack.i.l.bf16 %v7058_v16 }
 0x12d   : > { %7352 = vrot.lane.b32.xlu1 %v7351_v44, %s7680_s22  ;;  %7347 = vrot.lane.b32.xlu0 %v8594_v47, %s7680_s22  ;;  %v7034_v47 = vunpack.i.l.bf16 %v8659_v51  ;;  %v7592_v51 = vld [vmem:[#allocation2 + $0xc0] sm:$0xff]  ;;  %v1561_v33 = vsel %vm1542_vm6, %v1528_v38, %v7054_v30  ;;  %v1560_v46 = vsel %vm1542_vm6, %v1527_v48, %v7050_v13 }
 0x12e   : > { %v1594_v37 = vsel %vm1575_vm7, %v1561_v33, %v7064_v5  ;;  %v1595_v32 = vsel %vm1575_vm7, %v1562_v21, %v7065_v31  ;;  %v1593_v55 = vsel %vm1575_vm7, %v1560_v46, %v7060_v18 }
 0x12f   : > { %v8712_v54 = vpop.permute.xlu1 %7072  ;;  %v7068_v6 = vpop.permute.xlu0 %7067  ;;  %v1526_v53 = vsel %vm331_vm0, %v7592_v51, %v7034_v47 }
 0x130   : > { %v1559_v58 = vsel %vm1542_vm6, %v1526_v53, %v7049_v42  ;;  %v7070_v14 = vunpack.i.h.bf16 %v7068_v6  ;;  %v7069_v59 = vunpack.i.l.bf16 %v7068_v6  ;;  %v7075_v7 = vunpack.i.h.bf16 %v8712_v54 }
 0x131   : > { %v1592_v52 = vsel %vm1575_vm7, %v1559_v58, %v7059_v56  ;;  %v7074_v19 = vunpack.i.l.bf16 %v8712_v54 }
 0x132   : > { %v1625_v10 = vsel %vm1608_vm8, %v1592_v52, %v7069_v59  ;;  %v1626_v28 = vsel %vm1608_vm8, %v1593_v55, %v7070_v14  ;;  %v7593_v55 = vld [vmem:[#allocation2 + $0x110] sm:$0xff] }
 0x133   : > { %v8714_v45 = vpop.permute.xlu1 %7082  ;;  %v7078_v4 = vpop.permute.xlu0 %7077  ;;  %v1627_v6 = vsel %vm1608_vm8, %v1594_v37, %v7074_v19 }
 0x134   : > { %v7080_v39 = vunpack.i.h.bf16 %v7078_v4  ;;  %v7079_v62 = vunpack.i.l.bf16 %v7078_v4  ;;  %v7085_v11 = vunpack.i.h.bf16 %v8714_v45  ;;  %v7084_v26 = vunpack.i.l.bf16 %v8714_v45 }
 0x135   : > { %v1628_v45 = vsel %vm1608_vm8, %v1595_v32, %v7075_v7 }
 0x136   : > { %v1658_v27 = vsel %vm1641_vm9, %v1625_v10, %v7079_v62  ;;  %v1659_v12 = vsel %vm1641_vm9, %v1626_v28, %v7080_v39  ;;  %v1660_v60 = vsel %vm1641_vm9, %v1627_v6, %v7084_v26  ;;  %v1661_v47 = vsel %vm1641_vm9, %v1628_v45, %v7085_v11  ;;  %v7596_v28 = vld [vmem:[#allocation2 + $0xf0] sm:$0xff] }
 0x137   : > { %v8738_v57 = vpop.permute.xlu1 %7092  ;;  %v7088_v34 = vpop.permute.xlu0 %7087 }
 0x138   : > { %v7090_v43 = vunpack.i.h.bf16 %v7088_v34  ;;  %v7089_v17 = vunpack.i.l.bf16 %v7088_v34  ;;  %v7095_v24 = vunpack.i.h.bf16 %v8738_v57  ;;  %v7094_v3 = vunpack.i.l.bf16 %v8738_v57 }
 0x13a   : > { %v1691_v61 = vsel %vm1674_vm10, %v1658_v27, %v7089_v17  ;;  %v1692_v49 = vsel %vm1674_vm10, %v1659_v12, %v7090_v43  ;;  %v1693_v13 = vsel %vm1674_vm10, %v1660_v60, %v7094_v3  ;;  %v1694_v42 = vsel %vm1674_vm10, %v1661_v47, %v7095_v24  ;;  %v7594_v17 = vld [vmem:[#allocation2 + $0x108] sm:$0xff] }
 0x13b   : > { %v7103_v2 = vpop.permute.xlu1 %7102  ;;  %v7098_v1 = vpop.permute.xlu0 %7097 }
 0x13c   : > { %v7100_v8 = vunpack.i.h.bf16 %v7098_v1  ;;  %v7099_v9 = vunpack.i.l.bf16 %v7098_v1  ;;  %v7105_v44 = vunpack.i.h.bf16 %v7103_v2  ;;  %v7104_v15 = vunpack.i.l.bf16 %v7103_v2 }
 0x13e   : > { %v1724_v16 = vsel %vm1707_vm11, %v1691_v61, %v7099_v9  ;;  %v1725_v54 = vsel %vm1707_vm11, %v1692_v49, %v7100_v8  ;;  %v1726_v5 = vsel %vm1707_vm11, %v1693_v13, %v7104_v15  ;;  %v1727_v34 = vsel %vm1707_vm11, %v1694_v42, %v7105_v44  ;;  %v7595_v9 = vld [vmem:[#allocation2 + $0xf8] sm:$0xff] }
 0x13f   : > { %v8758_v29 = vpop.permute.xlu1 %7112  ;;  %v7108_v20 = vpop.permute.xlu0 %7107 }
 0x140   : > { %v7110_v22 = vunpack.i.h.bf16 %v7108_v20  ;;  %v7109_v40 = vunpack.i.l.bf16 %v7108_v20  ;;  %v7115_v58 = vunpack.i.h.bf16 %v8758_v29  ;;  %v7114_v14 = vunpack.i.l.bf16 %v8758_v29 }
 0x142   : > { %v1757_v4 = vsel %vm1740_vm4, %v1724_v16, %v7109_v40  ;;  %v1758_v50 = vsel %vm1740_vm4, %v1725_v54, %v7110_v22  ;;  %v1531_v10 = vsel %vm331_vm0, %v7595_v9, %v7115_v58  ;;  %v1530_v11 = vsel %vm331_vm0, %v7596_v28, %v7114_v14 }
 0x143   : > { %v7123_v63 = vpop.permute.xlu1 %7122  ;;  %v1781_v25 = vpack.c.bf16 %v1758_v50, %v1757_v4  ;;  %v7118_v30 = vpop.permute.xlu0 %7117 }
 0x144   : > { %v7120_v57 = vunpack.i.h.bf16 %v7118_v30  ;;  %v7119_v31 = vunpack.i.l.bf16 %v7118_v30  ;;  %v7125_v21 = vunpack.i.h.bf16 %v7123_v63  ;;  %v7124_v46 = vunpack.i.l.bf16 %v7123_v63 }
 0x145   : > { %6609 = vmatprep.mubr.msk.bf16.mxu0 %vm1825_vm12, %v1781_v25 }
 0x146   : > { %v1760_v35 = vsel %vm1740_vm4, %v1727_v34, %v7120_v57  ;;  %v1759_v36 = vsel %vm1740_vm4, %v1726_v5, %v7119_v31  ;;  %v1533_v43 = vsel %vm331_vm0, %v7593_v55, %v7125_v21  ;;  %v1532_v7 = vsel %vm331_vm0, %v7594_v17, %v7124_v46 }
 0x147   : > { %v7133_v41 = vpop.permute.xlu1 %7132  ;;  %v1782_v38 = vpack.c.bf16 %v1760_v35, %v1759_v36  ;;  %v7128_v18 = vpop.permute.xlu0 %7127 }
 0x148   : > { %v7135_v59 = vunpack.i.h.bf16 %v7133_v41  ;;  %v7134_v2 = vunpack.i.l.bf16 %v7133_v41  ;;  %v7130_v37 = vunpack.i.h.bf16 %v7128_v18  ;;  %v7129_v32 = vunpack.i.l.bf16 %v7128_v18 }
 0x149   : > { %6610 = vmatmul.mubr.msk.bf16.gmra.mrb[16].mxu0 %vm1825_vm12, %v1782_v38 }
 0x14a   : > { %v1565_v26 = vsel %vm1542_vm6, %v1532_v7, %v7134_v2  ;;  %v1566_v29 = vsel %vm1542_vm6, %v1533_v43, %v7135_v59  ;;  %v1564_v27 = vsel %vm1542_vm6, %v1531_v10, %v7130_v37  ;;  %v1563_v12 = vsel %vm1542_vm6, %v1530_v11, %v7129_v32 }
 0x14b   : > { %v7143_v56 = vpop.permute.xlu1 %7142  ;;  %v7138_v23 = vpop.permute.xlu0 %7137 }
 0x14c   : > { %v7145_v62 = vunpack.i.h.bf16 %v7143_v56  ;;  %v7144_v1 = vunpack.i.l.bf16 %v7143_v56  ;;  %v7140_v19 = vunpack.i.h.bf16 %v7138_v23  ;;  %v7139_v8 = vunpack.i.l.bf16 %v7138_v23 }
 0x14e   : > { %v1598_v61 = vsel %vm1575_vm7, %v1565_v26, %v7144_v1  ;;  %v1599_v49 = vsel %vm1575_vm7, %v1566_v29, %v7145_v62  ;;  %v1596_v15 = vsel %vm1575_vm7, %v1563_v12, %v7139_v8  ;;  %v1597_v16 = vsel %vm1575_vm7, %v1564_v27, %v7140_v19 }
 0x14f   : > { %v8782_v48 = vpop.permute.xlu1 %7152  ;;  %v7148_v51 = vpop.permute.xlu0 %7147 }
 0x150   : > { %v7150_v24 = vunpack.i.h.bf16 %v7148_v51  ;;  %v7149_v3 = vunpack.i.l.bf16 %v7148_v51  ;;  %v7155_v45 = vunpack.i.h.bf16 %v8782_v48  ;;  %v7154_v4 = vunpack.i.l.bf16 %v8782_v48 }
 0x152   : > { %v1629_v60 = vsel %vm1608_vm8, %v1596_v15, %v7149_v3  ;;  %v1630_v47 = vsel %vm1608_vm8, %v1597_v16, %v7150_v24  ;;  %v1631_v51 = vsel %vm1608_vm8, %v1598_v61, %v7154_v4  ;;  %v7597_v16 = vld [vmem:[#allocation2 + $0x140] sm:$0xff] }
 0x153   : > { %v8784_v53 = vpop.permute.xlu1 %7162  ;;  %v7158_v33 = vpop.permute.xlu0 %7157 }
 0x154   : > { %v7160_v22 = vunpack.i.h.bf16 %v7158_v33  ;;  %v7159_v40 = vunpack.i.l.bf16 %v7158_v33  ;;  %v7165_v25 = vunpack.i.h.bf16 %v8784_v53  ;;  %v7164_v30 = vunpack.i.l.bf16 %v8784_v53 }
 0x155   : > { %v1632_v53 = vsel %vm1608_vm8, %v1599_v49, %v7155_v45 }
 0x156   : > { %v1662_v42 = vsel %vm1641_vm9, %v1629_v60, %v7159_v40  ;;  %v1663_v57 = vsel %vm1641_vm9, %v1630_v47, %v7160_v22  ;;  %v1664_v58 = vsel %vm1641_vm9, %v1631_v51, %v7164_v30  ;;  %v1665_v14 = vsel %vm1641_vm9, %v1632_v53, %v7165_v25  ;;  %v7600_v47 = vld [vmem:[#allocation2 + $0x120] sm:$0xff] }
 0x157   : > { %v8788_v39 = vpop.permute.xlu1 %7172  ;;  %v7168_v52 = vpop.permute.xlu0 %7167 }
 0x158   : > { %v7170_v54 = vunpack.i.h.bf16 %v7168_v52  ;;  %v7169_v6 = vunpack.i.l.bf16 %v7168_v52  ;;  %v7175_v31 = vunpack.i.h.bf16 %v8788_v39  ;;  %v7174_v5 = vunpack.i.l.bf16 %v8788_v39 }
 0x15a   : > { %v1695_v35 = vsel %vm1674_vm10, %v1662_v42, %v7169_v6  ;;  %v1696_v36 = vsel %vm1674_vm10, %v1663_v57, %v7170_v54  ;;  %v1697_v37 = vsel %vm1674_vm10, %v1664_v58, %v7174_v5  ;;  %v1698_v32 = vsel %vm1674_vm10, %v1665_v14, %v7175_v31  ;;  %v7598_v6 = vld [vmem:[#allocation2 + $0x138] sm:$0xff] }
 0x15b   : > { %v7183_v20 = vpop.permute.xlu1 %7182  ;;  %v7178_v44 = vpop.permute.xlu0 %7177 }
 0x15c   : > { %v7180_v50 = vunpack.i.h.bf16 %v7178_v44  ;;  %v7179_v63 = vunpack.i.l.bf16 %v7178_v44  ;;  %v7185_v18 = vunpack.i.h.bf16 %v7183_v20  ;;  %v7184_v56 = vunpack.i.l.bf16 %v7183_v20 }
 0x15e   : > { %v1728_v23 = vsel %vm1707_vm11, %v1695_v35, %v7179_v63  ;;  %v1729_v48 = vsel %vm1707_vm11, %v1696_v36, %v7180_v50  ;;  %v1730_v1 = vsel %vm1707_vm11, %v1697_v37, %v7184_v56  ;;  %v1731_v52 = vsel %vm1707_vm11, %v1698_v32, %v7185_v18  ;;  %v7599_v63 = vld [vmem:[#allocation2 + $0x128] sm:$0xff] }
 0x15f   : > { %v8808_v13 = vpop.permute.xlu1 %7192  ;;  %v7188_v34 = vpop.permute.xlu0 %7187 }
 0x160   : > { %v7190_v41 = vunpack.i.h.bf16 %v7188_v34  ;;  %v7189_v38 = vunpack.i.l.bf16 %v7188_v34  ;;  %v7195_v12 = vunpack.i.h.bf16 %v8808_v13  ;;  %v7194_v24 = vunpack.i.l.bf16 %v8808_v13 }
 0x162   : > { %v1761_v33 = vsel %vm1740_vm4, %v1728_v23, %v7189_v38  ;;  %v1762_v21 = vsel %vm1740_vm4, %v1729_v48, %v7190_v41  ;;  %v1535_v60 = vsel %vm331_vm0, %v7599_v63, %v7195_v12  ;;  %v1534_v25 = vsel %vm331_vm0, %v7600_v47, %v7194_v24 }
 0x163   : > { %v7203_v46 = vpop.permute.xlu1 %7202  ;;  %v1783_v59 = vpack.c.bf16 %v1762_v21, %v1761_v33  ;;  %v7198_v2 = vpop.permute.xlu0 %7197  ;;  %v7681_v63 = vmov 1983009808   ;;  %v2181_v47 = vlaneseq }
 0x164   : > { %v7200_v39 = vunpack.i.h.bf16 %v7198_v2  ;;  %v7199_v62 = vunpack.i.l.bf16 %v7198_v2  ;;  %v7205_v29 = vunpack.i.h.bf16 %v7203_v46  ;;  %v7204_v27 = vunpack.i.l.bf16 %v7203_v46 }
 0x165   : > { %6613 = vmatprep.mubr.msk.bf16.mxu0 %vm1825_vm12, %v1783_v59 }
 0x166   : > { %v1764_v55 = vsel %vm1740_vm4, %v1731_v52, %v7200_v39  ;;  %v1763_v43 = vsel %vm1740_vm4, %v1730_v1, %v7199_v62  ;;  %v1537_v54 = vsel %vm331_vm0, %v7597_v16, %v7205_v29  ;;  %v1536_v45 = vsel %vm331_vm0, %v7598_v6, %v7204_v27 }
 0x167   : > { %v7213_v17 = vpop.permute.xlu1 %7212  ;;  %v1784_v7 = vpack.c.bf16 %v1764_v55, %v1763_v43  ;;  %v7208_v19 = vpop.permute.xlu0 %7207 }
 0x168   : > { %v7215_v3 = vunpack.i.h.bf16 %v7213_v17  ;;  %v7214_v20 = vunpack.i.l.bf16 %v7213_v17  ;;  %v7210_v61 = vunpack.i.h.bf16 %v7208_v19  ;;  %v7209_v49 = vunpack.i.l.bf16 %v7208_v19 }
 0x169   : > { %6614 = vmatmul.mubr.msk.bf16.gmra.mrb[20].mxu0 %vm1825_vm12, %v1784_v7 }
 0x16a   : > { %v1569_v30 = vsel %vm1542_vm6, %v1536_v45, %v7214_v20  ;;  %v1570_v13 = vsel %vm1542_vm6, %v1537_v54, %v7215_v3  ;;  %v1568_v42 = vsel %vm1542_vm6, %v1535_v60, %v7210_v61  ;;  %v1567_v57 = vsel %vm1542_vm6, %v1534_v25, %v7209_v49 }
 0x16b   : > { %v7223_v8 = vpop.permute.xlu1 %7222  ;;  %v7218_v9 = vpop.permute.xlu0 %7217  ;;  %v2179_v60 = vunpack.c.l.s4 %v7681_v63 }
 0x16c   : > { %v7225_v40 = vunpack.i.h.bf16 %v7223_v8  ;;  %v7224_v44 = vunpack.i.l.bf16 %v7223_v8  ;;  %v7220_v4 = vunpack.i.h.bf16 %v7218_v9  ;;  %v7219_v50 = vunpack.i.l.bf16 %v7218_v9 }
 0x16e   : > { %v1602_v35 = vsel %vm1575_vm7, %v1569_v30, %v7224_v44  ;;  %v1603_v36 = vsel %vm1575_vm7, %v1570_v13, %v7225_v40  ;;  %v1600_v56 = vsel %vm1575_vm7, %v1567_v57, %v7219_v50  ;;  %v1601_v23 = vsel %vm1575_vm7, %v1568_v42, %v7220_v4 }
 0x16f   : > { %v8832_v10 = vpop.permute.xlu1 %7232  ;;  %v7228_v28 = vpop.permute.xlu0 %7227  ;;  %v2180_v57 = vunpack.c.0.s8 %v2179_v60 }
 0x170   : > { %v7230_v31 = vunpack.i.h.bf16 %v7228_v28  ;;  %v7229_v5 = vunpack.i.l.bf16 %v7228_v28  ;;  %v7235_v53 = vunpack.i.h.bf16 %v8832_v10  ;;  %v7234_v33 = vunpack.i.l.bf16 %v8832_v10 }
 0x172   : > { %v1633_v58 = vsel %vm1608_vm8, %v1600_v56, %v7229_v5  ;;  %v1634_v14 = vsel %vm1608_vm8, %v1601_v23, %v7230_v31  ;;  %v1635_v28 = vsel %vm1608_vm8, %v1602_v35, %v7234_v33  ;;  %v8880_v31 = vshrl.u32 %v2181_v47, 7  ;;  %v7601_v56 = vld [vmem:[#allocation2 + $0x158] sm:$0xff] }
 0x173   : > { %v8834_v11 = vpop.permute.xlu1 %7242  ;;  %v7238_v26 = vpop.permute.xlu0 %7237 }
 0x174   : > { %v7240_v41 = vunpack.i.h.bf16 %v7238_v26  ;;  %v7239_v38 = vunpack.i.l.bf16 %v7238_v26  ;;  %v7245_v59 = vunpack.i.h.bf16 %v8834_v11  ;;  %v7244_v2 = vunpack.i.l.bf16 %v8834_v11 }
 0x175   : > { %v1636_v11 = vsel %vm1608_vm8, %v1603_v36, %v7235_v53  ;;  %v8885_v33 = vsub.s32 %v2180_v57, %v8880_v31 }
 0x176   : > { %v1666_v32 = vsel %vm1641_vm9, %v1633_v58, %v7239_v38  ;;  %v1667_v39 = vsel %vm1641_vm9, %v1634_v14, %v7240_v41  ;;  %v1668_v12 = vsel %vm1641_vm9, %v1635_v28, %v7244_v2  ;;  %v1669_v24 = vsel %vm1641_vm9, %v1636_v11, %v7245_v59  ;;  %v7604_v58 = vld [vmem:[#allocation2 + $0x168] sm:$0xff] }
 0x177   : > { %v8838_v22 = vpop.permute.xlu1 %7252  ;;  %v7248_v15 = vpop.permute.xlu0 %7247 }
 0x178   : > { %v7250_v48 = vunpack.i.h.bf16 %v7248_v15  ;;  %v7249_v51 = vunpack.i.l.bf16 %v7248_v15  ;;  %v7255_v62 = vunpack.i.h.bf16 %v8838_v22  ;;  %v7254_v1 = vunpack.i.l.bf16 %v8838_v22 }
 0x17a   : > { %v1699_v55 = vsel %vm1674_vm10, %v1666_v32, %v7249_v51  ;;  %v1700_v43 = vsel %vm1674_vm10, %v1667_v39, %v7250_v48  ;;  %v1701_v61 = vsel %vm1674_vm10, %v1668_v12, %v7254_v1  ;;  %v1702_v49 = vsel %vm1674_vm10, %v1669_v24, %v7255_v62  ;;  %v7602_v48 = vld [vmem:[#allocation2 + $0x150] sm:$0xff] }
 0x17b   : > { %v7263_v34 = vpop.permute.xlu1 %7262  ;;  %v7258_v18 = vpop.permute.xlu0 %7257 }
 0x17c   : > { %v7260_v21 = vunpack.i.h.bf16 %v7258_v18  ;;  %v7259_v46 = vunpack.i.l.bf16 %v7258_v18  ;;  %v7265_v19 = vunpack.i.h.bf16 %v7263_v34  ;;  %v7264_v8 = vunpack.i.l.bf16 %v7263_v34 }
 0x17e   : > { %v1732_v9 = vsel %vm1707_vm11, %v1699_v55, %v7259_v46  ;;  %v1733_v10 = vsel %vm1707_vm11, %v1700_v43, %v7260_v21  ;;  %v1734_v44 = vsel %vm1707_vm11, %v1701_v61, %v7264_v8  ;;  %v1735_v15 = vsel %vm1707_vm11, %v1702_v49, %v7265_v19  ;;  %v7603_v21 = vld [vmem:[#allocation2 + $0x170] sm:$0xff] }
 0x17f   : > { %v7273_v37 = vpop.permute.xlu1 %7272  ;;  %v7268_v52 = vpop.permute.xlu0 %7267 }
 0x180   : > { %v7270_v17 = vunpack.i.h.bf16 %v7268_v52  ;;  %v7269_v7 = vunpack.i.l.bf16 %v7268_v52  ;;  %v7275_v30 = vunpack.i.h.bf16 %v7273_v37  ;;  %v7274_v13 = vunpack.i.l.bf16 %v7273_v37 }
 0x182   : > { %v1765_v26 = vsel %vm1740_vm4, %v1732_v9, %v7269_v7  ;;  %v1766_v29 = vsel %vm1740_vm4, %v1733_v10, %v7270_v17  ;;  %v1539_v23 = vsel %vm331_vm0, %v7601_v56, %v7275_v30  ;;  %v1538_v51 = vsel %vm331_vm0, %v7602_v48, %v7274_v13 }
 0x183   : > { %v7283_v27 = vpop.permute.xlu1 %7282  ;;  %v1785_v3 = vpack.c.bf16 %v1766_v29, %v1765_v26  ;;  %v7278_v20 = vpop.permute.xlu0 %7277 }
 0x184   : > { %v7280_v22 = vunpack.i.h.bf16 %v7278_v20  ;;  %v7279_v40 = vunpack.i.l.bf16 %v7278_v20  ;;  %v7285_v5 = vunpack.i.h.bf16 %v7283_v27  ;;  %v7284_v34 = vunpack.i.l.bf16 %v7283_v27 }
 0x185   : > { %6617 = vmatprep.mubr.msk.bf16.mxu0 %vm1825_vm12, %v1785_v3 }
 0x186   : > { %v1768_v16 = vsel %vm1740_vm4, %v1735_v15, %v7280_v22  ;;  %v1767_v54 = vsel %vm1740_vm4, %v1734_v44, %v7279_v40  ;;  %v1541_v46 = vsel %vm331_vm0, %v7603_v21, %v7285_v5  ;;  %v1540_v14 = vsel %vm331_vm0, %v7604_v58, %v7284_v34  ;;  %v8915_v5 = vld [vmem:[%s10137_s5 + $0x1] ss:$0 sm:$0xff] }
 0x187   : > { %v7293_v6 = vpop.permute.xlu1 %7292  ;;  %v1786_v45 = vpack.c.bf16 %v1768_v16, %v1767_v54  ;;  %v7288_v4 = vpop.permute.xlu0 %7287  ;;  %vm3578_vm0 = vcmask 1043459  }
 0x188   : > { %v7295_v36 = vunpack.i.h.bf16 %v7293_v6  ;;  %v7294_v41 = vunpack.i.l.bf16 %v7293_v6  ;;  %v7290_v38 = vunpack.i.h.bf16 %v7288_v4  ;;  %v7289_v18 = vunpack.i.l.bf16 %v7288_v4 }
 0x189   : > { %6618 = vmatmul.mubr.msk.bf16.gmra.mrb[24].mxu0 %vm1825_vm12, %v1786_v45  ;;  %v8906_v45 = vld [vmem:[%s10137_s5] ss:$0 sm:$0xff] }
 0x18a   : > { %v1573_v32 = vsel %vm1542_vm6, %v1540_v14, %v7294_v41  ;;  %v1574_v39 = vsel %vm1542_vm6, %v1541_v46, %v7295_v36  ;;  %v1572_v52 = vsel %vm1542_vm6, %v1539_v23, %v7290_v38  ;;  %v1571_v55 = vsel %vm1542_vm6, %v1538_v51, %v7289_v18 }
 0x18b   : > { %v7303_v50 = vpop.permute.xlu1 %7302  ;;  %v7298_v25 = vpop.permute.xlu0 %7297  ;;  %vm3584_vm6 = vcmask 1046534  }
 0x18c   : > { %v7305_v59 = vunpack.i.h.bf16 %v7303_v50  ;;  %v7304_v2 = vunpack.i.l.bf16 %v7303_v50  ;;  %v7300_v62 = vunpack.i.h.bf16 %v7298_v25  ;;  %v7299_v1 = vunpack.i.l.bf16 %v7298_v25 }
 0x18e   : > { %v1606_v28 = vsel %vm1575_vm7, %v1573_v32, %v7304_v2  ;;  %v1607_v11 = vsel %vm1575_vm7, %v1574_v39, %v7305_v59  ;;  %v1604_v12 = vsel %vm1575_vm7, %v1571_v55, %v7299_v1  ;;  %v1605_v24 = vsel %vm1575_vm7, %v1572_v52, %v7300_v62 }
 0x18f   : > { %v7313_v42 = vpop.permute.xlu1 %7312  ;;  %v7308_v35 = vpop.permute.xlu0 %7307  ;;  %vm3586_vm7 = vcmask 1047559  }
 0x190   : > { %v7315_v43 = vunpack.i.h.bf16 %v7313_v42  ;;  %v7314_v17 = vunpack.i.l.bf16 %v7313_v42  ;;  %v7310_v7 = vunpack.i.h.bf16 %v7308_v35  ;;  %v7309_v19 = vunpack.i.l.bf16 %v7308_v35 }
 0x192   : > { %v1639_v61 = vsel %vm1608_vm8, %v1606_v28, %v7314_v17  ;;  %v1640_v49 = vsel %vm1608_vm8, %v1607_v11, %v7315_v43  ;;  %v1637_v44 = vsel %vm1608_vm8, %v1604_v12, %v7309_v19  ;;  %v1638_v15 = vsel %vm1608_vm8, %v1605_v24, %v7310_v7 }
 0x193   : > { %v7323_v53 = vpop.permute.xlu1 %7322  ;;  %v7318_v37 = vpop.permute.xlu0 %7317  ;;  %vm4836_vm8 = vcmask 1041408  }
 0x194   : > { %v7325_v8 = vunpack.i.h.bf16 %v7323_v53  ;;  %v7324_v9 = vunpack.i.l.bf16 %v7323_v53  ;;  %v7320_v26 = vunpack.i.h.bf16 %v7318_v37  ;;  %v7319_v29 = vunpack.i.l.bf16 %v7318_v37 }
 0x196   : > { %v1672_v16 = vsel %vm1641_vm9, %v1639_v61, %v7324_v9  ;;  %v1673_v54 = vsel %vm1641_vm9, %v1640_v49, %v7325_v8  ;;  %v1670_v4 = vsel %vm1641_vm9, %v1637_v44, %v7319_v29  ;;  %v1671_v50 = vsel %vm1641_vm9, %v1638_v15, %v7320_v26 }
 0x197   : > { %v7333_v10 = vpop.permute.xlu1 %7332  ;;  %v7328_v27 = vpop.permute.xlu0 %7327  ;;  %v8943_v15 = vsub.s32 0, %v8880_v31  ;;  %vm4837_vm9 = vcmask 1045508  }
 0x198   : > { %v7335_v3 = vunpack.i.h.bf16 %v7333_v10  ;;  %v7334_v20 = vunpack.i.l.bf16 %v7333_v10  ;;  %v7330_v22 = vunpack.i.h.bf16 %v7328_v27  ;;  %v7329_v40 = vunpack.i.l.bf16 %v7328_v27 }
 0x19a   : > { %v1705_v25 = vsel %vm1674_vm10, %v1672_v16, %v7334_v20  ;;  %v1706_v30 = vsel %vm1674_vm10, %v1673_v54, %v7335_v3  ;;  %v1703_v34 = vsel %vm1674_vm10, %v1670_v4, %v7329_v40  ;;  %v1704_v35 = vsel %vm1674_vm10, %v1671_v50, %v7330_v22  ;;  %vm9714_vm10 = vmor %vm4836_vm8, %vm4837_vm9 }
 0x19b   : > { %v7343_v6 = vpop.permute.xlu1 %7342  ;;  %v7338_v47 = vpop.permute.xlu0 %7337 }
 0x19c   : > { %v7345_v63 = vunpack.i.h.bf16 %v7343_v6  ;;  %v7344_v60 = vunpack.i.l.bf16 %v7343_v6  ;;  %v7340_v13 = vunpack.i.h.bf16 %v7338_v47  ;;  %v7339_v42 = vunpack.i.l.bf16 %v7338_v47 }
 0x19d   : > { %v6595_v57 = vpop.f32.mrb[0].mxu0 }
 0x19e   : > { %v1738_v36 = vsel %vm1707_vm11, %v1705_v25, %v7344_v60  ;;  %v2046_v41 = vmul.f32 %v6595_v57, %v8906_v45  ;;  %v1912_v38 = vpop.f32.mrb[1].mxu0  ;;  %v1739_v18 = vsel %vm1707_vm11, %v1706_v30, %v7345_v63  ;;  %v1736_v56 = vsel %vm1707_vm11, %v1703_v34, %v7339_v42 }
 0x19f   : > { %v1737_v23 = vsel %vm1707_vm11, %v1704_v35, %v7340_v13  ;;  %v2044_v48 = vmul.f32 %v8906_v45, %v1912_v38  ;;  %v6596_v51 = vpop.f32.mrb[2].mxu0  ;;  %v7353_v53 = vpop.permute.xlu1 %7352  ;;  %vm4817_vm11 = vcmask 1042432  }
 0x1a0   : > { %v2083_v21 = vadd.f32 %v8915_v5, %v2046_v41  ;;  %v2047_v46 = vmul.f32 %v6596_v51, %v8906_v45  ;;  %v7355_v58 = vunpack.i.h.bf16 %v7353_v53  ;;  %v7354_v14 = vunpack.i.l.bf16 %v7353_v53  ;;  %v7348_v59 = vpop.permute.xlu0 %7347  ;;  %v1915_v2 = vpop.f32.mrb[3].mxu0 }
 0x1a1   : > { %v2081_v37 = vadd.f32 %v8915_v5, %v2044_v48  ;;  %v7350_v32 = vunpack.i.h.bf16 %v7348_v59  ;;  %v7349_v39 = vunpack.i.l.bf16 %v7348_v59  ;;  %v2045_v62 = vmul.f32 %v8906_v45, %v1915_v2 }
 0x1a2   : > { %v2115_v1 = vmax.f32 %v2083_v21, 0.0  ;;  %v2084_v52 = vadd.f32 %v8915_v5, %v2047_v46  ;;  %v1771_v55 = vsel %vm1740_vm4, %v1738_v36, %v7354_v14  ;;  %v1772_v43 = vsel %vm1740_vm4, %v1739_v18, %v7355_v58 }
 0x1a3   : > { %v2113_v17 = vmax.f32 %v2081_v37, 0.0  ;;  %v1788_v7 = vpack.c.bf16 %v1772_v43, %v1771_v55  ;;  %v1769_v19 = vsel %vm1740_vm4, %v1736_v56, %v7349_v39  ;;  %v1770_v8 = vsel %vm1740_vm4, %v1737_v23, %v7350_v32 }
 0x1a4   : > { %v2211_v9 = vcombine.high %v2115_v1, %v2115_v1  ;;  %v2218_v10 = vrot.slane %v2115_v1, %v8885_v33  ;;  %v2116_v28 = vmax.f32 %v2084_v52, 0.0  ;;  %v1787_v11 = vpack.c.bf16 %v1770_v8, %v1769_v19 }
 0x1a5   : > { %v2177_v26 = vcombine.high %v2113_v17, %v2113_v17  ;;  %v2184_v29 = vrot.slane %v2113_v17, %v8885_v33  ;;  %v2082_v27 = vadd.f32 %v8915_v5, %v2045_v62 }
 0x1a6   : > { %v2225_v12 = vrot.slane %v2211_v9, %v8885_v33  ;;  %v2226_v24 = vcombine.high %v2218_v10, %v2218_v10  ;;  %v2228_v3 = vcombine.high %v2116_v28, %v2116_v28  ;;  %v2235_v20 = vrot.slane %v2116_v28, %v8885_v33  ;;  %6621 = vmatprep.mubr.msk.bf16.mxu0 %vm1825_vm12, %v1787_v11  ;;  %v7451_v11 = vld [vmem:[%s10134_s2 + $0x100] sm:$0xff]  }
 0x1a7   : > { %v2191_v61 = vrot.slane %v2177_v26, %v8885_v33  ;;  %v2192_v49 = vcombine.high %v2184_v29, %v2184_v29  ;;  %v2849_v22 = vmax.f32 %v2184_v29, %v2218_v10  ;;  %v2114_v40 = vmax.f32 %v2082_v27, 0.0  ;;  %6622 = vmatmul.mubr.msk.bf16.gmra.mrb[28].mxu0 %vm1825_vm12, %v1788_v7  ;;  %v8966_v29 = vld [vmem:[#allocation3] sm:$0xff]  ;;  %v8968_v27 = vld [vmem:[#allocation3 + $0x8] sm:$0x3]  ;;  %6625 = vmatprep.subr.bf16.mxu0 %v7451_v11 }
 0x1a8   : > { %v2227_v44 = vcombine.high %v2225_v12, %v2225_v12  ;;  %v2242_v16 = vrot.slane %v2228_v3, %v8885_v33  ;;  %v2243_v63 = vcombine.high %v2235_v20, %v2235_v20  ;;  %v7454_v3 = vld [vmem:[%s10134_s2] sm:$0xff]   ;;  %6626 = vmatpush3.bf16.msra.mxu0 %v7451_v11  ;;  %vm4818_vm12 = vcmask 1046532  }
 0x1a9   : > { %v2193_v54 = vcombine.high %v2191_v61, %v2191_v61  ;;  %v2850_v6 = vmax.f32 %v2192_v49, %v2226_v24  ;;  %v2851_v4 = vmax.f32 %v2191_v61, %v2225_v12  ;;  %v6149_v50 = vrot.slane %v2849_v22, 9  ;;  %v7452_v12 = vld [vmem:[%s10134_s2 + $0x108] sm:$0xff]   ;;  %v7453_v24 = vld [vmem:[%s10134_s2 + $0x40] sm:$0xff]  }
 0x1aa   : > { %v2194_v60 = vcombine.high %v2114_v40, %v2114_v40  ;;  %v2201_v47 = vrot.slane %v2114_v40, %v8885_v33  ;;  %v2244_v57 = vcombine.high %v2242_v16, %v2242_v16  ;;  %6627 = vmatprep.subr.bf16.mxu0 %v7452_v12  ;;  %6397 = vmatprep.subr.bf16.mxu1 %v7453_v24  ;;  %v3691_v61 = vrot.slane %v8968_v27, 1 }
 0x1ab   : > { %v2852_v25 = vmax.f32 %v2193_v54, %v2227_v44  ;;  %v6150_v30 = vrot.slane %v2850_v6, 9  ;;  %v6151_v13 = vrot.slane %v2851_v4, 9  ;;  %v3169_v42 = vmax.f32 %v2849_v22, %v6149_v50  ;;  %6398 = vmatpush3.bf16.msra.mxu1 %v7454_v3  ;;  %v7455_v54 = vld [vmem:[%s10134_s2 + $0x110] sm:$0xff]   ;;  %v7462_v3 = vld [vmem:[%s10134_s2 + $0x18] sm:$0xff]  }
 0x1ac   : > { %v2208_v31 = vrot.slane %v2194_v60, %v8885_v33  ;;  %v2209_v34 = vcombine.high %v2201_v47, %v2201_v47  ;;  %v2853_v35 = vmax.f32 %v2201_v47, %v2235_v20  ;;  %v3690_v20 = vrot.slane %v8966_v29, 1  ;;  %6628 = vmatpush3.bf16.msra.mxu0 %v7452_v12 }
 0x1ad   : > { %v6152_v36 = vrot.slane %v2852_v25, 9  ;;  %v3170_v41 = vmax.f32 %v2850_v6, %v6150_v30  ;;  %v3171_v38 = vmax.f32 %v2851_v4, %v6151_v13  ;;  %v3321_v53 = vrot.slane %v3169_v42, %v8943_v15  ;;  %6629 = vmatprep.subr.bf16.mxu0 %v7455_v54 }
 0x1ae   : > { %v2210_v18 = vcombine.high %v2208_v31, %v2208_v31  ;;  %v2854_v56 = vmax.f32 %v2209_v34, %v2243_v63  ;;  %v2855_v23 = vmax.f32 %v2208_v31, %v2242_v16  ;;  %v6153_v48 = vrot.slane %v2853_v35, 9 }
 0x1af   : > { %v3172_v51 = vmax.f32 %v2852_v25, %v6152_v36  ;;  %v3325_v21 = vrot.slane %v3170_v41, %v8943_v15  ;;  %v3329_v46 = vrot.slane %v3171_v38, %v8943_v15  ;;  %v3692_v47 = vsel %vm554_vm3, %v3690_v20, %v3691_v61 }
 0x1b0   : > { %v2856_v58 = vmax.f32 %v2210_v18, %v2244_v57  ;;  %v6154_v14 = vrot.slane %v2854_v56, 9  ;;  %v6155_v59 = vrot.slane %v2855_v23, 9  ;;  %v3173_v2 = vmax.f32 %v2853_v35, %v6153_v48  ;;  %v7456_v57 = vld [vmem:[%s10134_s2 + $0x48] sm:$0xff]   ;;  %6630 = vmatpush3.bf16.msra.mxu0 %v7455_v54  ;;  %v7458_v18 = vld [vmem:[%s10134_s2 + $0x118] sm:$0xff]  }
 0x1b1   : > { %v3333_v37 = vrot.slane %v3172_v51, %v8943_v15  ;;  %v3575_v32 = vsel %vm3574_vm14, %v3325_v21, %v3321_v53  ;;  %v7457_v35 = vld [vmem:[%s10134_s2 + $0x8] sm:$0xff]   ;;  %6399 = vmatprep.subr.bf16.mxu1 %v7456_v57  ;;  %6631 = vmatprep.subr.bf16.mxu0 %v7458_v18  ;;  %v7464_v57 = vld [vmem:[%s10134_s2 + $0x20] sm:$0xff]  }
 0x1b2   : > { %v3577_v39 = vsel %vm3576_vm15, %v3329_v46, %v3575_v32  ;;  %v6156_v62 = vrot.slane %v2856_v58, 9  ;;  %v3174_v1 = vmax.f32 %v2854_v56, %v6154_v14  ;;  %v3175_v52 = vmax.f32 %v2855_v23, %v6155_v59  ;;  %6400 = vmatpush3.bf16.msra.mxu1 %v7457_v35  ;;  %v7460_v32 = vld [vmem:[%s10134_s2 + $0x10] sm:$0xff]  }
 0x1b3   : > { %v3337_v55 = vrot.slane %v3173_v2, %v8943_v15  ;;  %v3579_v43 = vsel %vm3578_vm0, %v3333_v37, %v3577_v39 }
 0x1b4   : > { %v3176_v17 = vmax.f32 %v2856_v58, %v6156_v62  ;;  %v3341_v7 = vrot.slane %v3174_v1, %v8943_v15  ;;  %v3345_v19 = vrot.slane %v3175_v52, %v8943_v15  ;;  %v7459_v58 = vld [vmem:[%s10134_s2 + $0x50] sm:$0xff]   ;;  %6632 = vmatpush3.bf16.msra.mxu0 %v7458_v18 }
 0x1b5   : > { %v3581_v8 = vsel %vm3580_vm1, %v3337_v55, %v3579_v43  ;;  %6401 = vmatprep.subr.bf16.mxu1 %v7459_v58  ;;  %v7466_v58 = vld [vmem:[%s10134_s2 + $0x28] sm:$0xff]  }
 0x1b6   : > { %v3349_v9 = vrot.slane %v3176_v17, %v8943_v15  ;;  %v3583_v10 = vsel %vm3582_vm5, %v3341_v7, %v3581_v8  ;;  %6402 = vmatpush3.bf16.msra.mxu1 %v7460_v32 }
 0x1b7   : > { %v3585_v28 = vsel %vm3584_vm6, %v3345_v19, %v3583_v10 }
 0x1b8   : > { %v3587_v26 = vsel %vm3586_vm7, %v3349_v9, %v3585_v28  ;;  %v7461_v28 = vld [vmem:[%s10134_s2 + $0x58] sm:$0xff]  }
 0x1b9   : > { %3646 = vst.msk [vmem:[#allocation3 + $0x11] sm:$0xff] %vm1740_vm4, %v3587_v26  ;;  %6403 = vmatprep.subr.bf16.mxu1 %v7461_v28 }
 0x1ba   : > { %6404 = vmatpush3.bf16.msra.mxu1 %v7462_v3 }
 0x1bd   : > { %v6599_v49 = vpop.f32.mrb[4].mxu0 }
 0x1be   : > { %v2050_v22 = vmul.f32 %v6599_v49, %v8906_v45  ;;  %v1928_v40 = vpop.f32.mrb[5].mxu0 }
 0x1bf   : > { %v2048_v44 = vmul.f32 %v8906_v45, %v1928_v40  ;;  %v6600_v16 = vpop.f32.mrb[6].mxu0 }
 0x1c0   : > { %v2087_v6 = vadd.f32 %v8915_v5, %v2050_v22  ;;  %v2051_v4 = vmul.f32 %v6600_v16, %v8906_v45  ;;  %v1931_v50 = vpop.f32.mrb[7].mxu0  ;;  %v8989_v63 = vld [vmem:[#allocation3 + $0x10] sm:$0xff]  ;;  %v8991_v60 = vld [vmem:[#allocation3 + $0x18] sm:$0x3] }
 0x1c1   : > { %v2085_v25 = vadd.f32 %v8915_v5, %v2048_v44  ;;  %v2049_v30 = vmul.f32 %v8906_v45, %v1931_v50  ;;  %v3693_v13 = vrot.slane %v8989_v63, 1  ;;  %v3694_v42 = vrot.slane %v8991_v60, 1 }
 0x1c2   : > { %v2119_v31 = vmax.f32 %v2087_v6, 0.0  ;;  %v2088_v34 = vadd.f32 %v8915_v5, %v2051_v4 }
 0x1c3   : > { %v2117_v36 = vmax.f32 %v2085_v25, 0.0  ;;  %v2086_v41 = vadd.f32 %v8915_v5, %v2049_v30  ;;  %v9007_v38 = vsel %vm554_vm3, %v3693_v13, %v3694_v42 }
 0x1c4   : > { %v2279_v56 = vcombine.high %v2119_v31, %v2119_v31  ;;  %v2286_v23 = vrot.slane %v2119_v31, %v8885_v33  ;;  %v2120_v48 = vmax.f32 %v2088_v34, 0.0  ;;  %v7361_v51 = vpack.i.bf16 %v9007_v38, %v3692_v47  ;;  %v7463_v47 = vld [vmem:[%s10134_s2 + $0x60] sm:$0xff]  }
 0x1c5   : > { %v2245_v53 = vcombine.high %v2117_v36, %v2117_v36  ;;  %v2252_v21 = vrot.slane %v2117_v36, %v8885_v33  ;;  %v2118_v46 = vmax.f32 %v2086_v41, 0.0  ;;  %6405 = vmatprep.subr.bf16.mxu1 %v7463_v47 }
 0x1c6   : > { %v2293_v14 = vrot.slane %v2279_v56, %v8885_v33  ;;  %v2294_v59 = vcombine.high %v2286_v23, %v2286_v23  ;;  %v2296_v2 = vcombine.high %v2120_v48, %v2120_v48  ;;  %v2303_v37 = vrot.slane %v2120_v48, %v8885_v33  ;;  %7362 = vrot.lane.b32.xlu1 %v7361_v51, %s7680_s22  ;;  %v7465_v51 = vld [vmem:[%s10134_s2 + $0x68] sm:$0xff]  }
 0x1c7   : > { %v2259_v39 = vrot.slane %v2245_v53, %v8885_v33  ;;  %v2260_v62 = vcombine.high %v2252_v21, %v2252_v21  ;;  %v2857_v1 = vmax.f32 %v2252_v21, %v2286_v23  ;;  %v2262_v52 = vcombine.high %v2118_v46, %v2118_v46  ;;  %6406 = vmatpush3.bf16.msra.mxu1 %v7464_v57 }
 0x1c8   : > { %v2295_v55 = vcombine.high %v2293_v14, %v2293_v14  ;;  %v2310_v43 = vrot.slane %v2296_v2, %v8885_v33  ;;  %v2311_v17 = vcombine.high %v2303_v37, %v2303_v37  ;;  %v2269_v7 = vrot.slane %v2118_v46, %v8885_v33  ;;  %6407 = vmatprep.subr.bf16.mxu1 %v7465_v51 }
 0x1c9   : > { %v2261_v19 = vcombine.high %v2259_v39, %v2259_v39  ;;  %v2858_v8 = vmax.f32 %v2260_v62, %v2294_v59  ;;  %v2859_v9 = vmax.f32 %v2259_v39, %v2293_v14  ;;  %v6157_v10 = vrot.slane %v2857_v1, 9  ;;  %v7467_v62 = vld [vmem:[%s10134_s2 + $0x70] sm:$0xff]  }
 0x1ca   : > { %v2312_v11 = vcombine.high %v2310_v43, %v2310_v43  ;;  %v2276_v26 = vrot.slane %v2262_v52, %v8885_v33  ;;  %v2277_v12 = vcombine.high %v2269_v7, %v2269_v7  ;;  %v2861_v24 = vmax.f32 %v2269_v7, %v2303_v37  ;;  %v7468_v52 = vld [vmem:[%s10134_s2 + $0x30] sm:$0xff]  }
 0x1cb   : > { %v2860_v20 = vmax.f32 %v2261_v19, %v2295_v55  ;;  %v6158_v61 = vrot.slane %v2858_v8, 9  ;;  %v6159_v49 = vrot.slane %v2859_v9, 9  ;;  %v3177_v22 = vmax.f32 %v2857_v1, %v6157_v10  ;;  %6408 = vmatpush3.bf16.msra.mxu1 %v7466_v58 }
 0x1cc   : > { %v2278_v40 = vcombine.high %v2276_v26, %v2276_v26  ;;  %v2862_v44 = vmax.f32 %v2277_v12, %v2311_v17  ;;  %v2863_v16 = vmax.f32 %v2276_v26, %v2310_v43  ;;  %v6161_v54 = vrot.slane %v2861_v24, 9  ;;  %6409 = vmatprep.subr.bf16.mxu1 %v7467_v62  ;;  %v7469_v43 = vld [vmem:[%s10134_s2 + $0x78] sm:$0xff]  }
 0x1cd   : > { %v6160_v6 = vrot.slane %v2860_v20, 9  ;;  %v3178_v4 = vmax.f32 %v2858_v8, %v6158_v61  ;;  %v3179_v50 = vmax.f32 %v2859_v9, %v6159_v49  ;;  %v3353_v34 = vrot.slane %v3177_v22, %v8943_v15  ;;  %v7470_v17 = vld [vmem:[%s10134_s2 + $0x38] sm:$0xff]  }
 0x1ce   : > { %v2864_v25 = vmax.f32 %v2278_v40, %v2312_v11  ;;  %v6162_v30 = vrot.slane %v2862_v44, 9  ;;  %v6163_v13 = vrot.slane %v2863_v16, 9  ;;  %v3181_v42 = vmax.f32 %v2861_v24, %v6161_v54 }
 0x1cf   : > { %v3180_v31 = vmax.f32 %v2860_v20, %v6160_v6  ;;  %v3357_v35 = vrot.slane %v3178_v4, %v8943_v15  ;;  %v3361_v36 = vrot.slane %v3179_v50, %v8943_v15  ;;  %6410 = vmatpush3.bf16.msra.mxu1 %v7468_v52 }
 0x1d0   : > { %v6164_v41 = vrot.slane %v2864_v25, 9  ;;  %v3182_v18 = vmax.f32 %v2862_v44, %v6162_v30  ;;  %v3183_v56 = vmax.f32 %v2863_v16, %v6163_v13  ;;  %v3369_v46 = vrot.slane %v3181_v42, %v8943_v15  ;;  %6411 = vmatprep.subr.bf16.mxu1 %v7469_v43 }
 0x1d1   : > { %v3365_v23 = vrot.slane %v3180_v31, %v8943_v15  ;;  %v3588_v48 = vsel %vm3574_vm14, %v3357_v35, %v3353_v34 }
 0x1d2   : > { %v3589_v53 = vsel %vm3576_vm15, %v3361_v36, %v3588_v48  ;;  %v3184_v21 = vmax.f32 %v2864_v25, %v6164_v41  ;;  %v3373_v14 = vrot.slane %v3182_v18, %v8943_v15  ;;  %v3377_v2 = vrot.slane %v3183_v56, %v8943_v15 }
 0x1d3   : > { %v3590_v59 = vsel %vm3578_vm0, %v3365_v23, %v3589_v53  ;;  %6412 = vmatpush3.bf16.msra.mxu1 %v7470_v17 }
 0x1d4   : > { %v3591_v37 = vsel %vm3580_vm1, %v3369_v46, %v3590_v59  ;;  %v3381_v32 = vrot.slane %v3184_v21, %v8943_v15 }
 0x1d5   : > { %v3592_v39 = vsel %vm3582_vm5, %v3373_v14, %v3591_v37 }
 0x1d6   : > { %v3593_v1 = vsel %vm3584_vm6, %v3377_v2, %v3592_v39 }
 0x1d7   : > { %v3594_v55 = vsel %vm3586_vm7, %v3381_v32, %v3593_v1 }
 0x1d8   : > { %3647 = vst.msk [vmem:[#allocation3 + $0x21] sm:$0xff] %vm1740_vm4, %v3594_v55 }
 0x1dd   : > { %v6603_v7 = vpop.f32.mrb[8].mxu0 }
 0x1de   : > { %v2054_v19 = vmul.f32 %v6603_v7, %v8906_v45  ;;  %v1944_v8 = vpop.f32.mrb[9].mxu0 }
 0x1df   : > { %v2052_v9 = vmul.f32 %v8906_v45, %v1944_v8  ;;  %v6604_v10 = vpop.f32.mrb[10].mxu0  ;;  %v9076_v28 = vld [vmem:[#allocation3 + $0x20] sm:$0xff] }
 0x1e0   : > { %v2091_v11 = vadd.f32 %v8915_v5, %v2054_v19  ;;  %v2055_v26 = vmul.f32 %v6604_v10, %v8906_v45  ;;  %v1947_v12 = vpop.f32.mrb[11].mxu0  ;;  %v7356_v24 = vpack.i.bf16 %v9076_v28, %v8989_v63 }
 0x1e1   : > { %v2089_v3 = vadd.f32 %v8915_v5, %v2052_v9  ;;  %v2053_v20 = vmul.f32 %v8906_v45, %v1947_v12 }
 0x1e2   : > { %v2123_v61 = vmax.f32 %v2091_v11, 0.0  ;;  %v2092_v49 = vadd.f32 %v8915_v5, %v2055_v26  ;;  %7357 = vrot.lane.b32.xlu0 %v7356_v24, %s7680_s22 }
 0x1e3   : > { %v2121_v22 = vmax.f32 %v2089_v3, 0.0  ;;  %v2090_v40 = vadd.f32 %v8915_v5, %v2053_v20 }
 0x1e4   : > { %v2347_v44 = vcombine.high %v2123_v61, %v2123_v61  ;;  %v2354_v16 = vrot.slane %v2123_v61, %v8885_v33  ;;  %v2124_v54 = vmax.f32 %v2092_v49, 0.0 }
 0x1e5   : > { %v2313_v6 = vcombine.high %v2121_v22, %v2121_v22  ;;  %v2320_v4 = vrot.slane %v2121_v22, %v8885_v33  ;;  %v2122_v50 = vmax.f32 %v2090_v40, 0.0 }
 0x1e6   : > { %v2361_v47 = vrot.slane %v2347_v44, %v8885_v33  ;;  %v2362_v25 = vcombine.high %v2354_v16, %v2354_v16  ;;  %v2364_v30 = vcombine.high %v2124_v54, %v2124_v54  ;;  %v2371_v13 = vrot.slane %v2124_v54, %v8885_v33 }
 0x1e7   : > { %v2327_v42 = vrot.slane %v2313_v6, %v8885_v33  ;;  %v2328_v57 = vcombine.high %v2320_v4, %v2320_v4  ;;  %v2865_v31 = vmax.f32 %v2320_v4, %v2354_v16  ;;  %v2330_v34 = vcombine.high %v2122_v50, %v2122_v50 }
 0x1e8   : > { %v2363_v35 = vcombine.high %v2361_v47, %v2361_v47  ;;  %v2378_v36 = vrot.slane %v2364_v30, %v8885_v33  ;;  %v2379_v41 = vcombine.high %v2371_v13, %v2371_v13  ;;  %v2337_v18 = vrot.slane %v2122_v50, %v8885_v33  ;;  %v3659_v30 = vld [vmem:[#allocation3 + $0x28] sm:$0x3] }
 0x1e9   : > { %v2329_v56 = vcombine.high %v2327_v42, %v2327_v42  ;;  %v2866_v23 = vmax.f32 %v2328_v57, %v2362_v25  ;;  %v2867_v48 = vmax.f32 %v2327_v42, %v2361_v47  ;;  %v6165_v51 = vrot.slane %v2865_v31, 9 }
 0x1ea   : > { %v2380_v53 = vcombine.high %v2378_v36, %v2378_v36  ;;  %v2344_v21 = vrot.slane %v2330_v34, %v8885_v33  ;;  %v2345_v46 = vcombine.high %v2337_v18, %v2337_v18  ;;  %v2869_v58 = vmax.f32 %v2337_v18, %v2371_v13 }
 0x1eb   : > { %v2868_v14 = vmax.f32 %v2329_v56, %v2363_v35  ;;  %v6166_v59 = vrot.slane %v2866_v23, 9  ;;  %v6167_v2 = vrot.slane %v2867_v48, 9  ;;  %v3185_v37 = vmax.f32 %v2865_v31, %v6165_v51 }
 0x1ec   : > { %v2346_v32 = vcombine.high %v2344_v21, %v2344_v21  ;;  %v2870_v39 = vmax.f32 %v2345_v46, %v2379_v41  ;;  %v2871_v62 = vmax.f32 %v2344_v21, %v2378_v36  ;;  %v6169_v1 = vrot.slane %v2869_v58, 9 }
 0x1ed   : > { %v6168_v52 = vrot.slane %v2868_v14, 9  ;;  %v3186_v55 = vmax.f32 %v2866_v23, %v6166_v59  ;;  %v3187_v43 = vmax.f32 %v2867_v48, %v6167_v2  ;;  %v3385_v10 = vrot.slane %v3185_v37, %v8943_v15 }
 0x1ee   : > { %v2872_v17 = vmax.f32 %v2346_v32, %v2380_v53  ;;  %v6170_v7 = vrot.slane %v2870_v39, 9  ;;  %v6171_v19 = vrot.slane %v2871_v62, 9  ;;  %v3189_v8 = vmax.f32 %v2869_v58, %v6169_v1 }
 0x1ef   : > { %v3188_v9 = vmax.f32 %v2868_v14, %v6168_v52  ;;  %v3389_v11 = vrot.slane %v3186_v55, %v8943_v15  ;;  %v3393_v26 = vrot.slane %v3187_v43, %v8943_v15  ;;  %v3720_v13 = vrot.slane %v9076_v28, 2 }
 0x1f0   : > { %v6172_v12 = vrot.slane %v2872_v17, 9  ;;  %v3190_v24 = vmax.f32 %v2870_v39, %v6170_v7  ;;  %v3191_v3 = vmax.f32 %v2871_v62, %v6171_v19  ;;  %v3401_v40 = vrot.slane %v3189_v8, %v8943_v15 }
 0x1f1   : > { %v3397_v20 = vrot.slane %v3188_v9, %v8943_v15  ;;  %v3595_v61 = vsel %vm3574_vm14, %v3389_v11, %v3385_v10  ;;  %v3721_v42 = vrot.slane %v3659_v30, 2  ;;  %v3696_v35 = vrot.slane %v9076_v28, 1 }
 0x1f2   : > { %v3596_v49 = vsel %vm3576_vm15, %v3393_v26, %v3595_v61  ;;  %v3192_v22 = vmax.f32 %v2872_v17, %v6172_v12  ;;  %v3405_v44 = vrot.slane %v3190_v24, %v8943_v15  ;;  %v3409_v54 = vrot.slane %v3191_v3, %v8943_v15 }
 0x1f3   : > { %v3597_v16 = vsel %vm3578_vm0, %v3397_v20, %v3596_v49  ;;  %v3697_v36 = vrot.slane %v3659_v30, 1  ;;  %v9118_v48 = vsel %vm635_vm2, %v3720_v13, %v3721_v42 }
 0x1f4   : > { %v3598_v6 = vsel %vm3580_vm1, %v3401_v40, %v3597_v16  ;;  %v3413_v4 = vrot.slane %v3192_v22, %v8943_v15 }
 0x1f5   : > { %v3599_v50 = vsel %vm3582_vm5, %v3405_v44, %v3598_v6  ;;  %v9131_v62 = vsel %vm554_vm3, %v3696_v35, %v3697_v36 }
 0x1f6   : > { %v3600_v47 = vsel %vm3584_vm6, %v3409_v54, %v3599_v50 }
 0x1f7   : > { %v3601_v25 = vsel %vm3586_vm7, %v3413_v4, %v3600_v47 }
 0x1f8   : > { %3648 = vst.msk [vmem:[#allocation3 + $0x31] sm:$0xff] %vm1740_vm4, %v3601_v25 }
 0x1fd   : > { %v6607_v57 = vpop.f32.mrb[12].mxu0 }
 0x1fe   : > { %v2058_v31 = vmul.f32 %v6607_v57, %v8906_v45  ;;  %v1960_v34 = vpop.f32.mrb[13].mxu0 }
 0x1ff   : > { %v2056_v41 = vmul.f32 %v8906_v45, %v1960_v34  ;;  %v6608_v18 = vpop.f32.mrb[14].mxu0  ;;  %v9115_v56 = vld [vmem:[#allocation3 + $0x30] sm:$0xff]  ;;  %v3661_v23 = vld [vmem:[#allocation3 + $0x38] sm:$0x3] }
 0x200   : > { %v2095_v51 = vadd.f32 %v8915_v5, %v2058_v31  ;;  %v2059_v53 = vmul.f32 %v6608_v18, %v8906_v45  ;;  %v1963_v21 = vpop.f32.mrb[15].mxu0  ;;  %v3723_v46 = vrot.slane %v9115_v56, 2  ;;  %v3724_v58 = vrot.slane %v3661_v23, 2 }
 0x201   : > { %v2093_v28 = vadd.f32 %v8915_v5, %v2056_v41  ;;  %v2057_v14 = vmul.f32 %v8906_v45, %v1963_v21  ;;  %v3699_v59 = vrot.slane %v9115_v56, 1  ;;  %v3700_v2 = vrot.slane %v3661_v23, 1 }
 0x202   : > { %v2127_v37 = vmax.f32 %v2095_v51, 0.0  ;;  %v2096_v32 = vadd.f32 %v8915_v5, %v2059_v53  ;;  %v9128_v39 = vsel %vm635_vm2, %v3723_v46, %v3724_v58 }
 0x203   : > { %v2125_v1 = vmax.f32 %v2093_v28, 0.0  ;;  %v2094_v52 = vadd.f32 %v8915_v5, %v2057_v14  ;;  %v3880_v55 = vpack.c.bf16 %v9128_v39, %v9118_v48  ;;  %v9137_v43 = vsel %vm554_vm3, %v3699_v59, %v3700_v2 }
 0x204   : > { %v2415_v17 = vcombine.high %v2127_v37, %v2127_v37  ;;  %v2422_v7 = vrot.slane %v2127_v37, %v8885_v33  ;;  %v2128_v19 = vmax.f32 %v2096_v32, 0.0  ;;  %v7371_v8 = vpack.i.bf16 %v9137_v43, %v9131_v62 }
 0x205   : > { %v2381_v9 = vcombine.high %v2125_v1, %v2125_v1  ;;  %v2388_v10 = vrot.slane %v2125_v1, %v8885_v33  ;;  %v2126_v11 = vmax.f32 %v2094_v52, 0.0  ;;  %6633 = vmatprep.mubr.msk.bf16.mxu0 %vm1740_vm4, %v3880_v55 }
 0x206   : > { %v2429_v26 = vrot.slane %v2415_v17, %v8885_v33  ;;  %v2430_v12 = vcombine.high %v2422_v7, %v2422_v7  ;;  %v2432_v24 = vcombine.high %v2128_v19, %v2128_v19  ;;  %v2439_v3 = vrot.slane %v2128_v19, %v8885_v33  ;;  %7372 = vrot.lane.b32.xlu1 %v7371_v8, %s7680_s22 }
 0x207   : > { %v2395_v20 = vrot.slane %v2381_v9, %v8885_v33  ;;  %v2396_v61 = vcombine.high %v2388_v10, %v2388_v10  ;;  %v2873_v49 = vmax.f32 %v2388_v10, %v2422_v7  ;;  %v2398_v22 = vcombine.high %v2126_v11, %v2126_v11 }
 0x208   : > { %v2431_v40 = vcombine.high %v2429_v26, %v2429_v26  ;;  %v2446_v44 = vrot.slane %v2432_v24, %v8885_v33  ;;  %v2447_v16 = vcombine.high %v2439_v3, %v2439_v3  ;;  %v2405_v54 = vrot.slane %v2126_v11, %v8885_v33 }
 0x209   : > { %v2397_v6 = vcombine.high %v2395_v20, %v2395_v20  ;;  %v2874_v4 = vmax.f32 %v2396_v61, %v2430_v12  ;;  %v2875_v50 = vmax.f32 %v2395_v20, %v2429_v26  ;;  %v6173_v47 = vrot.slane %v2873_v49, 9 }
 0x20a   : > { %v2448_v25 = vcombine.high %v2446_v44, %v2446_v44  ;;  %v2412_v30 = vrot.slane %v2398_v22, %v8885_v33  ;;  %v2413_v13 = vcombine.high %v2405_v54, %v2405_v54  ;;  %v2877_v42 = vmax.f32 %v2405_v54, %v2439_v3 }
 0x20b   : > { %v2876_v57 = vmax.f32 %v2397_v6, %v2431_v40  ;;  %v6174_v31 = vrot.slane %v2874_v4, 9  ;;  %v6175_v34 = vrot.slane %v2875_v50, 9  ;;  %v3193_v35 = vmax.f32 %v2873_v49, %v6173_v47 }
 0x20c   : > { %v2414_v36 = vcombine.high %v2412_v30, %v2412_v30  ;;  %v2878_v41 = vmax.f32 %v2413_v13, %v2447_v16  ;;  %v2879_v18 = vmax.f32 %v2412_v30, %v2446_v44  ;;  %v6177_v23 = vrot.slane %v2877_v42, 9 }
 0x20d   : > { %v6176_v51 = vrot.slane %v2876_v57, 9  ;;  %v3194_v53 = vmax.f32 %v2874_v4, %v6174_v31  ;;  %v3195_v21 = vmax.f32 %v2875_v50, %v6175_v34  ;;  %v3417_v2 = vrot.slane %v3193_v35, %v8943_v15 }
 0x20e   : > { %v2880_v46 = vmax.f32 %v2414_v36, %v2448_v25  ;;  %v6178_v58 = vrot.slane %v2878_v41, 9  ;;  %v6179_v28 = vrot.slane %v2879_v18, 9  ;;  %v3197_v14 = vmax.f32 %v2877_v42, %v6177_v23 }
 0x20f   : > { %v3196_v59 = vmax.f32 %v2876_v57, %v6176_v51  ;;  %v3421_v37 = vrot.slane %v3194_v53, %v8943_v15  ;;  %v3425_v32 = vrot.slane %v3195_v21, %v8943_v15 }
 0x210   : > { %v6180_v1 = vrot.slane %v2880_v46, 9  ;;  %v3198_v52 = vmax.f32 %v2878_v41, %v6178_v58  ;;  %v3199_v55 = vmax.f32 %v2879_v18, %v6179_v28  ;;  %v3433_v9 = vrot.slane %v3197_v14, %v8943_v15 }
 0x211   : > { %v3429_v17 = vrot.slane %v3196_v59, %v8943_v15  ;;  %v3602_v7 = vsel %vm3574_vm14, %v3421_v37, %v3417_v2 }
 0x212   : > { %v3603_v19 = vsel %vm3576_vm15, %v3425_v32, %v3602_v7  ;;  %v3200_v8 = vmax.f32 %v2880_v46, %v6180_v1  ;;  %v3437_v10 = vrot.slane %v3198_v52, %v8943_v15  ;;  %v3441_v26 = vrot.slane %v3199_v55, %v8943_v15 }
 0x213   : > { %v3604_v11 = vsel %vm3578_vm0, %v3429_v17, %v3603_v19 }
 0x214   : > { %v3605_v12 = vsel %vm3580_vm1, %v3433_v9, %v3604_v11  ;;  %v3445_v24 = vrot.slane %v3200_v8, %v8943_v15 }
 0x215   : > { %v3606_v3 = vsel %vm3582_vm5, %v3437_v10, %v3605_v12 }
 0x216   : > { %v3607_v20 = vsel %vm3584_vm6, %v3441_v26, %v3606_v3 }
 0x217   : > { %v3608_v61 = vsel %vm3586_vm7, %v3445_v24, %v3607_v20 }
 0x218   : > { %3649 = vst.msk [vmem:[#allocation3 + $0x41] sm:$0xff] %vm1740_vm4, %v3608_v61 }
 0x21c   : > { %v6611_v49 = vpop.f32.mrb[16].mxu0 }
 0x21d   : > { %v2062_v22 = vmul.f32 %v6611_v49, %v8906_v45  ;;  %v1976_v40 = vpop.f32.mrb[17].mxu0 }
 0x21e   : > { %v2060_v44 = vmul.f32 %v8906_v45, %v1976_v40  ;;  %v6612_v16 = vpop.f32.mrb[18].mxu0 }
 0x21f   : > { %v9169_v54 = vld [vmem:[#allocation3 + $0x40] sm:$0xff]  ;;  %v2099_v6 = vadd.f32 %v8915_v5, %v2062_v22  ;;  %v2063_v4 = vmul.f32 %v6612_v16, %v8906_v45  ;;  %v1979_v50 = vpop.f32.mrb[19].mxu0 }
 0x220   : > { %v7366_v47 = vpack.i.bf16 %v9169_v54, %v9115_v56  ;;  %v2097_v25 = vadd.f32 %v8915_v5, %v2060_v44  ;;  %v2061_v30 = vmul.f32 %v8906_v45, %v1979_v50 }
 0x221   : > { %v2131_v13 = vmax.f32 %v2099_v6, 0.0  ;;  %v2100_v42 = vadd.f32 %v8915_v5, %v2063_v4 }
 0x222   : > { %7367 = vrot.lane.b32.xlu0 %v7366_v47, %s7680_s22  ;;  %v2129_v57 = vmax.f32 %v2097_v25, 0.0  ;;  %v2098_v31 = vadd.f32 %v8915_v5, %v2061_v30 }
 0x223   : > { %v2483_v34 = vcombine.high %v2131_v13, %v2131_v13  ;;  %v2490_v35 = vrot.slane %v2131_v13, %v8885_v33  ;;  %v2132_v36 = vmax.f32 %v2100_v42, 0.0 }
 0x224   : > { %v2449_v41 = vcombine.high %v2129_v57, %v2129_v57  ;;  %v2456_v18 = vrot.slane %v2129_v57, %v8885_v33  ;;  %v2130_v23 = vmax.f32 %v2098_v31, 0.0 }
 0x225   : > { %v2497_v51 = vrot.slane %v2483_v34, %v8885_v33  ;;  %v2498_v53 = vcombine.high %v2490_v35, %v2490_v35  ;;  %v2500_v21 = vcombine.high %v2132_v36, %v2132_v36  ;;  %v2507_v46 = vrot.slane %v2132_v36, %v8885_v33 }
 0x226   : > { %v2463_v58 = vrot.slane %v2449_v41, %v8885_v33  ;;  %v2464_v28 = vcombine.high %v2456_v18, %v2456_v18  ;;  %v2881_v14 = vmax.f32 %v2456_v18, %v2490_v35  ;;  %v2466_v59 = vcombine.high %v2130_v23, %v2130_v23 }
 0x227   : > { %v2499_v2 = vcombine.high %v2497_v51, %v2497_v51  ;;  %v2514_v37 = vrot.slane %v2500_v21, %v8885_v33  ;;  %v2515_v32 = vcombine.high %v2507_v46, %v2507_v46  ;;  %v2473_v1 = vrot.slane %v2130_v23, %v8885_v33 }
 0x228   : > { %v2465_v52 = vcombine.high %v2463_v58, %v2463_v58  ;;  %v2882_v55 = vmax.f32 %v2464_v28, %v2498_v53  ;;  %v2883_v17 = vmax.f32 %v2463_v58, %v2497_v51  ;;  %v6181_v7 = vrot.slane %v2881_v14, 9 }
 0x229   : > { %v2516_v19 = vcombine.high %v2514_v37, %v2514_v37  ;;  %v2480_v8 = vrot.slane %v2466_v59, %v8885_v33  ;;  %v2481_v9 = vcombine.high %v2473_v1, %v2473_v1  ;;  %v2885_v10 = vmax.f32 %v2473_v1, %v2507_v46  ;;  %v3663_v59 = vld [vmem:[#allocation3 + $0x48] sm:$0x3] }
 0x22a   : > { %v2884_v11 = vmax.f32 %v2465_v52, %v2499_v2  ;;  %v6182_v26 = vrot.slane %v2882_v55, 9  ;;  %v6183_v12 = vrot.slane %v2883_v17, 9  ;;  %v3201_v24 = vmax.f32 %v2881_v14, %v6181_v7 }
 0x22b   : > { %v2482_v3 = vcombine.high %v2480_v8, %v2480_v8  ;;  %v2886_v20 = vmax.f32 %v2481_v9, %v2515_v32  ;;  %v2887_v61 = vmax.f32 %v2480_v8, %v2514_v37  ;;  %v6185_v49 = vrot.slane %v2885_v10, 9 }
 0x22c   : > { %v6184_v22 = vrot.slane %v2884_v11, 9  ;;  %v3202_v40 = vmax.f32 %v2882_v55, %v6182_v26  ;;  %v3203_v44 = vmax.f32 %v2883_v17, %v6183_v12  ;;  %v3449_v25 = vrot.slane %v3201_v24, %v8943_v15  ;;  %v9217_v26 = vld [vmem:[%s10137_s5] ss:$0 sm:$0xff] }
 0x22d   : > { %v2888_v16 = vmax.f32 %v2482_v3, %v2516_v19  ;;  %v6186_v6 = vrot.slane %v2886_v20, 9  ;;  %v6187_v4 = vrot.slane %v2887_v61, 9  ;;  %v3205_v50 = vmax.f32 %v2885_v10, %v6185_v49 }
 0x22e   : > { %v3204_v47 = vmax.f32 %v2884_v11, %v6184_v22  ;;  %v3453_v30 = vrot.slane %v3202_v40, %v8943_v15  ;;  %v3457_v13 = vrot.slane %v3203_v44, %v8943_v15  ;;  %v3726_v2 = vrot.slane %v9169_v54, 2  ;;  %v9227_v44 = vld [vmem:[%s10137_s5 + $0x1] ss:$0 sm:$0xff] }
 0x22f   : > { %v6188_v42 = vrot.slane %v2888_v16, 9  ;;  %v3206_v57 = vmax.f32 %v2886_v20, %v6186_v6  ;;  %v3207_v31 = vmax.f32 %v2887_v61, %v6187_v4  ;;  %v3465_v18 = vrot.slane %v3205_v50, %v8943_v15 }
 0x230   : > { %v3461_v34 = vrot.slane %v3204_v47, %v8943_v15  ;;  %v3609_v35 = vsel %vm3574_vm14, %v3453_v30, %v3449_v25  ;;  %v3727_v37 = vrot.slane %v3663_v59, 2  ;;  %v3702_v55 = vrot.slane %v9169_v54, 1 }
 0x231   : > { %v3610_v36 = vsel %vm3576_vm15, %v3457_v13, %v3609_v35  ;;  %v3208_v41 = vmax.f32 %v2888_v16, %v6188_v42  ;;  %v3469_v23 = vrot.slane %v3206_v57, %v8943_v15  ;;  %v3473_v53 = vrot.slane %v3207_v31, %v8943_v15 }
 0x232   : > { %v3611_v51 = vsel %vm3578_vm0, %v3461_v34, %v3610_v36  ;;  %v3703_v17 = vrot.slane %v3663_v59, 1  ;;  %v9211_v10 = vsel %vm635_vm2, %v3726_v2, %v3727_v37  ;;  %v3717_v36 = vrot.slane %v8989_v63, 2 }
 0x233   : > { %v3612_v21 = vsel %vm3580_vm1, %v3465_v18, %v3611_v51  ;;  %v3477_v46 = vrot.slane %v3208_v41, %v8943_v15 }
 0x234   : > { %v3613_v58 = vsel %vm3582_vm5, %v3469_v23, %v3612_v21  ;;  %v9234_v4 = vsel %vm554_vm3, %v3702_v55, %v3703_v17 }
 0x235   : > { %v3614_v28 = vsel %vm3584_vm6, %v3473_v53, %v3613_v58 }
 0x236   : > { %v3615_v14 = vsel %vm3586_vm7, %v3477_v46, %v3614_v28 }
 0x237   : > { %3650 = vst.msk [vmem:[#allocation3 + $0x51] sm:$0xff] %vm1740_vm4, %v3615_v14 }
 0x23c   : > { %v6615_v32 = vpop.f32.mrb[20].mxu0 }
 0x23d   : > { %v2066_v1 = vmul.f32 %v6615_v32, %v8906_v45  ;;  %v1992_v52 = vpop.f32.mrb[21].mxu0 }
 0x23e   : > { %v2064_v7 = vmul.f32 %v8906_v45, %v1992_v52  ;;  %v6616_v19 = vpop.f32.mrb[22].mxu0  ;;  %v9208_v8 = vld [vmem:[#allocation3 + $0x50] sm:$0xff]  ;;  %v3665_v9 = vld [vmem:[#allocation3 + $0x58] sm:$0x3] }
 0x23f   : > { %v2103_v11 = vadd.f32 %v8915_v5, %v2066_v1  ;;  %v2067_v12 = vmul.f32 %v9217_v26, %v6616_v19  ;;  %v1995_v24 = vpop.f32.mrb[23].mxu0  ;;  %v3729_v3 = vrot.slane %v9208_v8, 2  ;;  %v3730_v45 = vrot.slane %v3665_v9, 2 }
 0x240   : > { %v2101_v20 = vadd.f32 %v8915_v5, %v2064_v7  ;;  %v2065_v61 = vmul.f32 %v9217_v26, %v1995_v24  ;;  %v3705_v49 = vrot.slane %v9208_v8, 1  ;;  %v3706_v22 = vrot.slane %v3665_v9, 1 }
 0x241   : > { %v2135_v40 = vmax.f32 %v2103_v11, 0.0  ;;  %v2104_v16 = vadd.f32 %v9227_v44, %v2067_v12  ;;  %v9231_v6 = vsel %vm635_vm2, %v3729_v3, %v3730_v45 }
 0x242   : > { %v2133_v5 = vmax.f32 %v2101_v20, 0.0  ;;  %v2102_v50 = vadd.f32 %v9227_v44, %v2065_v61  ;;  %v3884_v47 = vpack.c.bf16 %v9231_v6, %v9211_v10  ;;  %v9240_v25 = vsel %vm554_vm3, %v3705_v49, %v3706_v22 }
 0x243   : > { %v2551_v30 = vcombine.high %v2135_v40, %v2135_v40  ;;  %v2558_v13 = vrot.slane %v2135_v40, %v8885_v33  ;;  %v2136_v42 = vmax.f32 %v2104_v16, 0.0  ;;  %v7381_v57 = vpack.i.bf16 %v9240_v25, %v9234_v4 }
 0x244   : > { %v2517_v31 = vcombine.high %v2133_v5, %v2133_v5  ;;  %v2524_v34 = vrot.slane %v2133_v5, %v8885_v33  ;;  %v2134_v35 = vmax.f32 %v2102_v50, 0.0  ;;  %6634 = vmatmul.mubr.msk.bf16.vlgmr.msra.gmra.mrb[32].mxu0 %vm1740_vm4, %v3884_v47  ;;  %v3714_v16 = vrot.slane %v8966_v29, 2  ;;  %v7363_v5 = vpop.permute.xlu1 %7362 }
 0x245   : > { %v2565_v41 = vrot.slane %v2551_v30, %v8885_v33  ;;  %v2566_v18 = vcombine.high %v2558_v13, %v2558_v13  ;;  %v2568_v23 = vcombine.high %v2136_v42, %v2136_v42  ;;  %v2575_v51 = vrot.slane %v2136_v42, %v8885_v33  ;;  %7382 = vrot.lane.b32.xlu1 %v7381_v57, %s7680_s22 }
 0x246   : > { %v2531_v53 = vrot.slane %v2517_v31, %v8885_v33  ;;  %v2532_v21 = vcombine.high %v2524_v34, %v2524_v34  ;;  %v2889_v46 = vmax.f32 %v2524_v34, %v2558_v13  ;;  %v2534_v58 = vcombine.high %v2134_v35, %v2134_v35 }
 0x247   : > { %v2567_v28 = vcombine.high %v2565_v41, %v2565_v41  ;;  %v2582_v14 = vrot.slane %v2568_v23, %v8885_v33  ;;  %v2583_v59 = vcombine.high %v2575_v51, %v2575_v51  ;;  %v2541_v2 = vrot.slane %v2134_v35, %v8885_v33 }
 0x248   : > { %v2533_v37 = vcombine.high %v2531_v53, %v2531_v53  ;;  %v2890_v32 = vmax.f32 %v2532_v21, %v2566_v18  ;;  %v2891_v1 = vmax.f32 %v2531_v53, %v2565_v41  ;;  %v6189_v52 = vrot.slane %v2889_v46, 9 }
 0x249   : > { %v2584_v55 = vcombine.high %v2582_v14, %v2582_v14  ;;  %v2548_v17 = vrot.slane %v2534_v58, %v8885_v33  ;;  %v2549_v7 = vcombine.high %v2541_v2, %v2541_v2  ;;  %v2893_v19 = vmax.f32 %v2541_v2, %v2575_v51 }
 0x24a   : > { %v2892_v9 = vmax.f32 %v2533_v37, %v2567_v28  ;;  %v6190_v11 = vrot.slane %v2890_v32, 9  ;;  %v6191_v12 = vrot.slane %v2891_v1, 9  ;;  %v3209_v24 = vmax.f32 %v2889_v46, %v6189_v52 }
 0x24b   : > { %v2550_v3 = vcombine.high %v2548_v17, %v2548_v17  ;;  %v2894_v45 = vmax.f32 %v2549_v7, %v2583_v59  ;;  %v2895_v20 = vmax.f32 %v2548_v17, %v2582_v14  ;;  %v6193_v61 = vrot.slane %v2893_v19, 9 }
 0x24c   : > { %v6192_v49 = vrot.slane %v2892_v9, 9  ;;  %v3210_v22 = vmax.f32 %v2890_v32, %v6190_v11  ;;  %v3211_v40 = vmax.f32 %v2891_v1, %v6191_v12  ;;  %v3481_v57 = vrot.slane %v3209_v24, %v8943_v15 }
 0x24d   : > { %v2896_v50 = vmax.f32 %v2550_v3, %v2584_v55  ;;  %v6194_v47 = vrot.slane %v2894_v45, 9  ;;  %v6195_v30 = vrot.slane %v2895_v20, 9  ;;  %v3213_v13 = vmax.f32 %v2893_v19, %v6193_v61 }
 0x24e   : > { %v3212_v42 = vmax.f32 %v2892_v9, %v6192_v49  ;;  %v3485_v31 = vrot.slane %v3210_v22, %v8943_v15  ;;  %v3489_v34 = vrot.slane %v3211_v40, %v8943_v15  ;;  %v3715_v23 = vrot.slane %v8968_v27, 2 }
 0x24f   : > { %v6196_v35 = vrot.slane %v2896_v50, 9  ;;  %v3214_v41 = vmax.f32 %v2894_v45, %v6194_v47  ;;  %v3215_v18 = vmax.f32 %v2895_v20, %v6195_v30  ;;  %v7365_v51 = vunpack.i.h.bf16 %v7363_v5 }
 0x250   : > { %v3493_v53 = vrot.slane %v3212_v42, %v8943_v15  ;;  %v3616_v21 = vsel %vm3574_vm14, %v3485_v31, %v3481_v57  ;;  %v3718_v46 = vrot.slane %v8991_v60, 2  ;;  %v7364_v58 = vunpack.i.l.bf16 %v7363_v5 }
 0x251   : > { %v3617_v28 = vsel %vm3576_vm15, %v3489_v34, %v3616_v21  ;;  %v3216_v14 = vmax.f32 %v2896_v50, %v6196_v35  ;;  %v3497_v59 = vrot.slane %v3213_v13, %v8943_v15  ;;  %v3501_v2 = vrot.slane %v3214_v41, %v8943_v15 }
 0x252   : > { %v3618_v37 = vsel %vm3578_vm0, %v3493_v53, %v3617_v28  ;;  %v3505_v32 = vrot.slane %v3215_v18, %v8943_v15  ;;  %v3716_v52 = vsel %vm635_vm2, %v3714_v16, %v3715_v23  ;;  %v9276_v9 = vsel %vm635_vm2, %v3717_v36, %v3718_v46 }
 0x253   : > { %v3619_v27 = vsel %vm3580_vm1, %v3497_v59, %v3618_v37  ;;  %v3509_v55 = vrot.slane %v3216_v14, %v8943_v15  ;;  %v3850_v11 = vsel %vm1740_vm4, %v8966_v29, %v7364_v58  ;;  %v3851_v12 = vsel %vm1740_vm4, %v8989_v63, %v7365_v51 }
 0x254   : > { %v7358_v1 = vpop.permute.xlu0 %7357  ;;  %v3620_v60 = vsel %vm3582_vm5, %v3501_v2, %v3619_v27  ;;  %v3876_v61 = vpack.c.bf16 %v3851_v12, %v3850_v11 }
 0x255   : > { %v7360_v17 = vunpack.i.h.bf16 %v7358_v1  ;;  %v7359_v7 = vunpack.i.l.bf16 %v7358_v1  ;;  %v3621_v19 = vsel %vm3584_vm6, %v3505_v32, %v3620_v60 }
 0x256   : > { %v3622_v24 = vsel %vm3586_vm7, %v3509_v55, %v3621_v19 }
 0x257   : > { %v3858_v3 = vsel %vm1740_vm4, %v3716_v52, %v7359_v7  ;;  %v3859_v45 = vsel %vm1740_vm4, %v9276_v9, %v7360_v17  ;;  %3651 = vst.msk [vmem:[#allocation3 + $0x61] sm:$0xff] %vm1740_vm4, %v3622_v24 }
 0x258   : > { %v3877_v20 = vpack.c.bf16 %v3859_v45, %v3858_v3 }
 0x25a   : > { %4225 = vmatprep.mubr.bf16.mxu1 %v3877_v20 }
 0x25b   : > { %4226 = vmatmul.mubr.bf16.vlgmr.msra.gmra.mrb[0].mxu1 %v3876_v61 }
 0x25c   : > { %v6619_v36 = vpop.f32.mrb[24].mxu0 }
 0x25d   : > { %v2070_v49 = vmul.f32 %v9217_v26, %v6619_v36  ;;  %v2008_v29 = vpop.f32.mrb[25].mxu0 }
 0x25e   : > { %v2068_v22 = vmul.f32 %v9217_v26, %v2008_v29  ;;  %v6620_v63 = vpop.f32.mrb[26].mxu0  ;;  %v9289_v40 = vld [vmem:[#allocation3 + $0x60] sm:$0xff] }
 0x25f   : > { %v2107_v16 = vadd.f32 %v9227_v44, %v2070_v49  ;;  %v2071_v5 = vmul.f32 %v9217_v26, %v6620_v63  ;;  %v2011_v50 = vpop.f32.mrb[27].mxu0  ;;  %v7376_v47 = vpack.i.bf16 %v9289_v40, %v9208_v8 }
 0x260   : > { %v2105_v30 = vadd.f32 %v9227_v44, %v2068_v22  ;;  %v2069_v13 = vmul.f32 %v9217_v26, %v2011_v50 }
 0x261   : > { %v2139_v42 = vmax.f32 %v2107_v16, 0.0  ;;  %v2108_v57 = vadd.f32 %v9227_v44, %v2071_v5  ;;  %7377 = vrot.lane.b32.xlu0 %v7376_v47, %s7680_s22 }
 0x262   : > { %v2137_v31 = vmax.f32 %v2105_v30, 0.0  ;;  %v2106_v34 = vadd.f32 %v9227_v44, %v2069_v13 }
 0x263   : > { %v2619_v35 = vcombine.high %v2139_v42, %v2139_v42  ;;  %v2626_v41 = vrot.slane %v2139_v42, %v8885_v33  ;;  %v2140_v18 = vmax.f32 %v2108_v57, 0.0 }
 0x264   : > { %v2585_v23 = vcombine.high %v2137_v31, %v2137_v31  ;;  %v2592_v51 = vrot.slane %v2137_v31, %v8885_v33  ;;  %v2138_v53 = vmax.f32 %v2106_v34, 0.0 }
 0x265   : > { %v2633_v21 = vrot.slane %v2619_v35, %v8885_v33  ;;  %v2634_v46 = vcombine.high %v2626_v41, %v2626_v41  ;;  %v2636_v58 = vcombine.high %v2140_v18, %v2140_v18  ;;  %v2643_v28 = vrot.slane %v2140_v18, %v8885_v33 }
 0x266   : > { %v2599_v14 = vrot.slane %v2585_v23, %v8885_v33  ;;  %v2600_v59 = vcombine.high %v2592_v51, %v2592_v51  ;;  %v2897_v2 = vmax.f32 %v2592_v51, %v2626_v41  ;;  %v2602_v37 = vcombine.high %v2138_v53, %v2138_v53 }
 0x267   : > { %v2635_v32 = vcombine.high %v2633_v21, %v2633_v21  ;;  %v2650_v27 = vrot.slane %v2636_v58, %v8885_v33  ;;  %v2651_v1 = vcombine.high %v2643_v28, %v2643_v28  ;;  %v2609_v52 = vrot.slane %v2138_v53, %v8885_v33 }
 0x268   : > { %v2601_v55 = vcombine.high %v2599_v14, %v2599_v14  ;;  %v2898_v60 = vmax.f32 %v2600_v59, %v2634_v46  ;;  %v2899_v17 = vmax.f32 %v2599_v14, %v2633_v21  ;;  %v6197_v7 = vrot.slane %v2897_v2, 9 }
 0x269   : > { %v2652_v19 = vcombine.high %v2650_v27, %v2650_v27  ;;  %v2616_v11 = vrot.slane %v2602_v37, %v8885_v33  ;;  %v2617_v12 = vcombine.high %v2609_v52, %v2609_v52  ;;  %v2901_v24 = vmax.f32 %v2609_v52, %v2643_v28 }
 0x26a   : > { %v2900_v3 = vmax.f32 %v2601_v55, %v2635_v32  ;;  %v6198_v45 = vrot.slane %v2898_v60, 9  ;;  %v6199_v20 = vrot.slane %v2899_v17, 9  ;;  %v3217_v61 = vmax.f32 %v2897_v2, %v6197_v7 }
 0x26b   : > { %v2618_v36 = vcombine.high %v2616_v11, %v2616_v11  ;;  %v2902_v49 = vmax.f32 %v2617_v12, %v2651_v1  ;;  %v2903_v29 = vmax.f32 %v2616_v11, %v2650_v27  ;;  %v6201_v22 = vrot.slane %v2901_v24, 9  ;;  %v9324_v1 = vld [vmem:[#allocation3 + $0x68] sm:$0x3] }
 0x26c   : > { %v6200_v63 = vrot.slane %v2900_v3, 9  ;;  %v3218_v16 = vmax.f32 %v2898_v60, %v6198_v45  ;;  %v3219_v5 = vmax.f32 %v2899_v17, %v6199_v20  ;;  %v3513_v57 = vrot.slane %v3217_v61, %v8943_v15 }
 0x26d   : > { %v2904_v50 = vmax.f32 %v2618_v36, %v2652_v19  ;;  %v6202_v47 = vrot.slane %v2902_v49, 9  ;;  %v6203_v30 = vrot.slane %v2903_v29, 9  ;;  %v3221_v13 = vmax.f32 %v2901_v24, %v6201_v22 }
 0x26e   : > { %v3220_v42 = vmax.f32 %v2900_v3, %v6200_v63  ;;  %v3517_v31 = vrot.slane %v3218_v16, %v8943_v15  ;;  %v3521_v34 = vrot.slane %v3219_v5, %v8943_v15  ;;  %v3732_v17 = vrot.slane %v9289_v40, 2 }
 0x26f   : > { %v6204_v35 = vrot.slane %v2904_v50, 9  ;;  %v3222_v41 = vmax.f32 %v2902_v49, %v6202_v47  ;;  %v3223_v18 = vmax.f32 %v2903_v29, %v6203_v30  ;;  %v3529_v46 = vrot.slane %v3221_v13, %v8943_v15 }
 0x270   : > { %v3525_v23 = vrot.slane %v3220_v42, %v8943_v15  ;;  %v3623_v51 = vsel %vm3574_vm14, %v3517_v31, %v3513_v57  ;;  %v3733_v7 = vrot.slane %v9324_v1, 2  ;;  %v3708_v61 = vrot.slane %v9289_v40, 1 }
 0x271   : > { %v3624_v53 = vsel %vm3576_vm15, %v3521_v34, %v3623_v51  ;;  %v3224_v21 = vmax.f32 %v2904_v50, %v6204_v35  ;;  %v3533_v58 = vrot.slane %v3222_v41, %v8943_v15  ;;  %v3537_v14 = vrot.slane %v3223_v18, %v8943_v15 }
 0x272   : > { %v3625_v28 = vsel %vm3578_vm0, %v3525_v23, %v3624_v53  ;;  %v9341_v63 = vsel %vm635_vm2, %v3732_v17, %v3733_v7  ;;  %v3709_v16 = vrot.slane %v9324_v1, 1  ;;  %v7476_v1 = vld [vmem:[%s10134_s2 + $0x90] sm:$0xff]  }
 0x273   : > { %v3626_v59 = vsel %vm3580_vm1, %v3529_v46, %v3625_v28  ;;  %v3541_v2 = vrot.slane %v3224_v21, %v8943_v15 }
 0x274   : > { %v3627_v37 = vsel %vm3582_vm5, %v3533_v58, %v3626_v59 }
 0x275   : > { %v3628_v32 = vsel %vm3584_vm6, %v3537_v14, %v3627_v37 }
 0x276   : > { %v3629_v27 = vsel %vm3586_vm7, %v3541_v2, %v3628_v32 }
 0x277   : > { %3652 = vst.msk [vmem:[#allocation3 + $0x71] sm:$0xff] %vm1740_vm4, %v3629_v27 }
 0x27a   : > { %v6623_v52 = vpop.f32.mrb[28].mxu0 }
 0x27b   : > { %v2074_v55 = vmul.f32 %v9217_v26, %v6623_v52  ;;  %v2024_v60 = vpop.f32.mrb[29].mxu0 }
 0x27c   : > { %v2072_v19 = vmul.f32 %v9217_v26, %v2024_v60  ;;  %v6624_v11 = vpop.f32.mrb[30].mxu0 }
 0x27d   : > { %v2111_v12 = vadd.f32 %v9227_v44, %v2074_v55  ;;  %v2075_v24 = vmul.f32 %v9217_v26, %v6624_v11  ;;  %v2027_v3 = vpop.f32.mrb[31].mxu0 }
 0x27e   : > { %v2109_v45 = vadd.f32 %v9227_v44, %v2072_v19  ;;  %v2073_v20 = vmul.f32 %v9217_v26, %v2027_v3  ;;  %v9336_v29 = vld [vmem:[#allocation3 + $0x70] sm:$0xff]  ;;  %v9338_v22 = vld [vmem:[#allocation3 + $0x78] sm:$0x3] }
 0x27f   : > { %v2143_v36 = vmax.f32 %v2111_v12, 0.0  ;;  %v2112_v49 = vadd.f32 %v9227_v44, %v2075_v24  ;;  %v3735_v47 = vrot.slane %v9336_v29, 2  ;;  %v3736_v26 = vrot.slane %v9338_v22, 2 }
 0x280   : > { %v2141_v5 = vmax.f32 %v2109_v45, 0.0  ;;  %v2110_v50 = vadd.f32 %v9227_v44, %v2073_v20  ;;  %v3711_v57 = vrot.slane %v9336_v29, 1 }
 0x281   : > { %v2687_v30 = vcombine.high %v2143_v36, %v2143_v36  ;;  %v2694_v13 = vrot.slane %v2143_v36, %v8885_v33  ;;  %v2144_v42 = vmax.f32 %v2112_v49, 0.0  ;;  %v9351_v41 = vsel %vm635_vm2, %v3735_v47, %v3736_v26  ;;  %v7471_v26 = vld [vmem:[%s10134_s2 + $0xc0] sm:$0xff]  }
 0x282   : > { %v2653_v31 = vcombine.high %v2141_v5, %v2141_v5  ;;  %v2660_v34 = vrot.slane %v2141_v5, %v8885_v33  ;;  %v2142_v35 = vmax.f32 %v2110_v50, 0.0  ;;  %6437 = vmatprep.subr.bf16.mxu1 %v7471_v26  ;;  %v7478_v26 = vld [vmem:[%s10134_s2 + $0x98] sm:$0xff]  }
 0x283   : > { %v2701_v18 = vrot.slane %v2687_v30, %v8885_v33  ;;  %v2702_v44 = vcombine.high %v2694_v13, %v2694_v13  ;;  %v2704_v23 = vcombine.high %v2144_v42, %v2144_v42  ;;  %v2711_v51 = vrot.slane %v2144_v42, %v8885_v33  ;;  %v7472_v30 = vld [vmem:[%s10134_s2 + $0x80] sm:$0xff]  }
 0x284   : > { %v2667_v53 = vrot.slane %v2653_v31, %v8885_v33  ;;  %v2668_v21 = vcombine.high %v2660_v34, %v2660_v34  ;;  %v2905_v46 = vmax.f32 %v2660_v34, %v2694_v13  ;;  %v2670_v58 = vcombine.high %v2142_v35, %v2142_v35  ;;  %v7473_v13 = vld [vmem:[%s10134_s2 + $0xc8] sm:$0xff]   ;;  %6438 = vmatpush3.bf16.msra.mxu1 %v7472_v30  ;;  %v7607_v30 = vld [vmem:[#allocation3 + $0x20] sm:$0xff] }
 0x285   : > { %v2703_v28 = vcombine.high %v2701_v18, %v2701_v18  ;;  %v2718_v14 = vrot.slane %v2704_v23, %v8885_v33  ;;  %v2719_v59 = vcombine.high %v2711_v51, %v2711_v51  ;;  %v2677_v2 = vrot.slane %v2142_v35, %v8885_v33  ;;  %6439 = vmatprep.subr.bf16.mxu1 %v7473_v13 }
 0x286   : > { %v2669_v37 = vcombine.high %v2667_v53, %v2667_v53  ;;  %v2906_v32 = vmax.f32 %v2668_v21, %v2702_v44  ;;  %v2907_v27 = vmax.f32 %v2667_v53, %v2701_v18  ;;  %v6205_v52 = vrot.slane %v2905_v46, 9 }
 0x287   : > { %v2720_v55 = vcombine.high %v2718_v14, %v2718_v14  ;;  %v2684_v60 = vrot.slane %v2670_v58, %v8885_v33  ;;  %v2685_v17 = vcombine.high %v2677_v2, %v2677_v2  ;;  %v2909_v7 = vmax.f32 %v2677_v2, %v2711_v51  ;;  %v7474_v58 = vld [vmem:[%s10134_s2 + $0x88] sm:$0xff]   ;;  %v7475_v2 = vld [vmem:[%s10134_s2 + $0xd0] sm:$0xff]  }
 0x288   : > { %v2908_v19 = vmax.f32 %v2669_v37, %v2703_v28  ;;  %v6206_v11 = vrot.slane %v2906_v32, 9  ;;  %v6207_v12 = vrot.slane %v2907_v27, 9  ;;  %v3225_v24 = vmax.f32 %v2905_v46, %v6205_v52  ;;  %v7373_v37 = vpop.permute.xlu1 %7372  ;;  %6440 = vmatpush3.bf16.msra.mxu1 %v7474_v58 }
 0x289   : > { %v2686_v3 = vcombine.high %v2684_v60, %v2684_v60  ;;  %v2910_v45 = vmax.f32 %v2685_v17, %v2719_v59  ;;  %v2911_v20 = vmax.f32 %v2684_v60, %v2718_v14  ;;  %v6209_v36 = vrot.slane %v2909_v7, 9  ;;  %6441 = vmatprep.subr.bf16.mxu1 %v7475_v2 }
 0x28a   : > { %v6208_v49 = vrot.slane %v2908_v19, 9  ;;  %v3226_v5 = vmax.f32 %v2906_v32, %v6206_v11  ;;  %v3227_v50 = vmax.f32 %v2907_v27, %v6207_v12  ;;  %v3545_v47 = vrot.slane %v3225_v24, %v8943_v15 }
 0x28b   : > { %v2912_v42 = vmax.f32 %v2686_v3, %v2720_v55  ;;  %v6210_v31 = vrot.slane %v2910_v45, 9  ;;  %v6211_v34 = vrot.slane %v2911_v20, 9  ;;  %v3229_v35 = vmax.f32 %v2909_v7, %v6209_v36 }
 0x28c   : > { %v3228_v18 = vmax.f32 %v2908_v19, %v6208_v49  ;;  %v3549_v44 = vrot.slane %v3226_v5, %v8943_v15  ;;  %v3553_v23 = vrot.slane %v3227_v50, %v8943_v15  ;;  %v3888_v51 = vpack.c.bf16 %v9351_v41, %v9341_v63  ;;  %v9417_v50 = vld [vmem:[#allocation3 + $0x90] sm:$0xff]  ;;  %6442 = vmatpush3.bf16.msra.mxu1 %v7476_v1 }
 0x28d   : > { %v6212_v53 = vrot.slane %v2912_v42, 9  ;;  %v3230_v21 = vmax.f32 %v2910_v45, %v6210_v31  ;;  %v3231_v46 = vmax.f32 %v2911_v20, %v6211_v34  ;;  %v3712_v59 = vrot.slane %v9338_v22, 1  ;;  %v7479_v31 = vld [vmem:[%s10134_s2 + $0xe0] sm:$0xff]  }
 0x28e   : > { %v3557_v28 = vrot.slane %v3228_v18, %v8943_v15  ;;  %v3630_v14 = vsel %vm3574_vm14, %v3549_v44, %v3545_v47  ;;  %6637 = vmatprep.mubr.msk.bf16.mxu0 %vm1740_vm4, %v3888_v51  ;;  %v3561_v52 = vrot.slane %v3229_v35, %v8943_v15  ;;  %v9392_v22 = vsel %vm554_vm3, %v3708_v61, %v3709_v16  ;;  %v3673_v47 = vld [vmem:[#allocation3 + $0x98] sm:$0x3] }
 0x28f   : > { %v3631_v32 = vsel %vm3576_vm15, %v3553_v23, %v3630_v14  ;;  %v3232_v27 = vmax.f32 %v2912_v42, %v6212_v53  ;;  %v3565_v55 = vrot.slane %v3230_v21, %v8943_v15  ;;  %v9397_v17 = vsel %vm554_vm3, %v3711_v57, %v3712_v59  ;;  %v7477_v57 = vld [vmem:[%s10134_s2 + $0xd8] sm:$0xff]  }
 0x290   : > { %v3632_v60 = vsel %vm3578_vm0, %v3557_v28, %v3631_v32  ;;  %v3569_v7 = vrot.slane %v3231_v46, %v8943_v15  ;;  %v7391_v11 = vpack.i.bf16 %v9397_v17, %v9392_v22  ;;  %v7375_v12 = vunpack.i.h.bf16 %v7373_v37  ;;  %6443 = vmatprep.subr.bf16.mxu1 %v7477_v57  ;;  %v7482_v32 = vld [vmem:[%s10134_s2 + $0xa8] sm:$0xff]  }
 0x291   : > { %v3633_v19 = vsel %vm3580_vm1, %v3561_v52, %v3632_v60  ;;  %v7374_v61 = vunpack.i.l.bf16 %v7373_v37  ;;  %v3573_v16 = vrot.slane %v3232_v27, %v8943_v15  ;;  %v7401_v36 = vpack.i.bf16 %v9211_v10, %v9128_v39  ;;  %6444 = vmatpush3.bf16.msra.mxu1 %v7478_v26 }
 0x292   : > { %v3634_v24 = vsel %vm3582_vm5, %v3565_v55, %v3633_v19  ;;  %7392 = vrot.lane.b32.xlu1 %v7391_v11, %s7680_s22  ;;  %v3853_v42 = vsel %vm1740_vm4, %v9115_v56, %v7375_v12  ;;  %v3767_v44 = vrot.slane %v9417_v50, 2  ;;  %v3768_v23 = vrot.slane %v3673_v47, 2  ;;  %v7480_v56 = vld [vmem:[%s10134_s2 + $0xa0] sm:$0xff]   ;;  %6445 = vmatprep.subr.bf16.mxu1 %v7479_v31  ;;  %v7483_v55 = vld [vmem:[%s10134_s2 + $0xf0] sm:$0xff]   ;;  %vm9723_vm5 = vmor %vm4817_vm11, %vm4818_vm12 }
 0x293   : > { %v3635_v3 = vsel %vm3584_vm6, %v3569_v7, %v3634_v24  ;;  %v3852_v13 = vsel %vm1740_vm4, %v7607_v30, %v7374_v61  ;;  %v3764_v53 = vrot.slane %v9417_v50, 1  ;;  %v3765_v21 = vrot.slane %v3673_v47, 1  ;;  %v7484_v12 = vld [vmem:[%s10134_s2 + $0xb0] sm:$0xff]   ;;  %v7485_v61 = vld [vmem:[%s10134_s2 + $0xf8] sm:$0xff]  }
 0x294   : > { %v3636_v45 = vsel %vm3586_vm7, %v3573_v16, %v3635_v3  ;;  %v7368_v20 = vpop.permute.xlu0 %7367  ;;  %v9434_v51 = vpack.c.bf16 %v3853_v42, %v3852_v13  ;;  %v3769_v28 = vsel %vm635_vm2, %v3767_v44, %v3768_v23  ;;  %v7396_v11 = vpack.i.bf16 %v9118_v48, %v9276_v9  ;;  %v7486_v9 = vld [vmem:[%s10134_s2 + $0xb8] sm:$0xff]  }
 0x295   : > { %3653 = vst.msk [vmem:[#allocation3 + $0x81] sm:$0xff] %vm1740_vm4, %v3636_v45  ;;  %v7370_v49 = vunpack.i.h.bf16 %v7368_v20  ;;  %v7369_v5 = vunpack.i.l.bf16 %v7368_v20  ;;  %6446 = vmatpush3.bf16.msra.mxu1 %v7480_v56  ;;  %v3766_v52 = vsel %vm554_vm3, %v3764_v53, %v3765_v21  ;;  %vm5482_vm7 = vcmask 1040384  }
 0x296   : > { %7402 = vrot.lane.b32.xlu1 %v7401_v36, %s7680_s22 }
 0x297   : > { %v3860_v34 = vsel %vm1740_vm4, %v9118_v48, %v7369_v5  ;;  %v3861_v35 = vsel %vm1740_vm4, %v9128_v39, %v7370_v49  ;;  %v7481_v39 = vld [vmem:[%s10134_s2 + $0xe8] sm:$0xff]   ;;  %v7406_v48 = vpack.i.bf16 %v9341_v63, %v9231_v6 }
 0x298   : > { %v3881_v18 = vpack.c.bf16 %v3861_v35, %v3860_v34  ;;  %6447 = vmatprep.subr.bf16.mxu1 %v7481_v39 }
 0x299   : > { %6448 = vmatpush3.bf16.msra.mxu1 %v7482_v32 }
 0x29a   : > { %4233 = vmatprep.mubr.bf16.mxu1 %v3881_v18  ;;  %6449 = vmatprep.subr.bf16.mxu1 %v7483_v55 }
 0x29b   : > { %4234 = vmatmul.mubr.bf16.gmra.mrb[4].mxu1 %v9434_v51 }
 0x29c   : > { %v9444_v46 = vld [vmem:[#allocation3 + $0x80] sm:$0xff]  ;;  %v3671_v58 = vld [vmem:[#allocation3 + $0x88] sm:$0x3] }
 0x29d   : > { %v7386_v14 = vpack.i.bf16 %v9444_v46, %v9336_v29  ;;  %v3759_v59 = vrot.slane %v9444_v46, 2  ;;  %v3760_v2 = vrot.slane %v3671_v58, 2  ;;  %v3748_v37 = vrot.slane %v9444_v46, 1  ;;  %6450 = vmatpush3.bf16.msra.mxu1 %v7484_v12 }
 0x29e   : > { %v3749_v27 = vrot.slane %v3671_v58, 1  ;;  %6451 = vmatprep.subr.bf16.mxu1 %v7485_v61 }
 0x29f   : > { %7387 = vrot.lane.b32.xlu0 %v7386_v14, %s7680_s22  ;;  %v3761_v60 = vsel %vm635_vm2, %v3759_v59, %v3760_v2  ;;  %vm4694_vm2 = vcmask 521216  }
 0x2a0   : > { %v3892_v7 = vpack.c.bf16 %v3769_v28, %v3761_v60  ;;  %v9461_v19 = vsel %vm554_vm3, %v3748_v37, %v3749_v27  ;;  %v7416_v16 = vpack.i.bf16 %v3761_v60, %v9351_v41  ;;  %4695 = vst.msk [vmem:[#allocation4] sm:$0x3f] %vm4694_vm2, %v7672_v0  ;;  %4696 = vst.msk [vmem:[#allocation4 + $0x8] sm:$0x3f] %vm4694_vm2, %v7672_v0  ;;  %vm4798_vm3 = vcmask 519168  }
 0x2a1   : > { %v7411_v1 = vpack.i.bf16 %v3766_v52, %v9461_v19  ;;  %6452 = vmatpush3.bf16.msra.mxu1 %v7486_v9  ;;  %4700 = vst.msk [vmem:[#allocation4 + $0x28] sm:$0x3f] %vm4694_vm2, %v7672_v0  ;;  %4697 = vst.msk [vmem:[#allocation4 + $0x10] sm:$0x3f] %vm4694_vm2, %v7672_v0 }
 0x2a2   : > { %6638 = vmatmul.mubr.msk.bf16.gmra.mrb[36].mxu0 %vm1740_vm4, %v3892_v7  ;;  %4698 = vst.msk [vmem:[#allocation4 + $0x18] sm:$0x3f] %vm4694_vm2, %v7672_v0  ;;  %4699 = vst.msk [vmem:[#allocation4 + $0x20] sm:$0x3f] %vm4694_vm2, %v7672_v0 }
 0x2a3   : > { %7412 = vrot.lane.b32.xlu1 %v7411_v1, %s7680_s22  ;;  %7397 = vrot.lane.b32.xlu0 %v7396_v11, %s7680_s22  ;;  %5429 = vst.msk [vmem:[#allocation5] sm:$0xf] %vm4798_vm3, %v7672_v0  ;;  %5430 = vst.msk [vmem:[#allocation5 + $0x4] sm:$0xf] %vm4798_vm3, %v7672_v0 }
 0x2a4   : > { %5431 = vst.msk [vmem:[#allocation5 + $0x8] sm:$0xf] %vm4798_vm3, %v7672_v0  ;;  %5432 = vst.msk [vmem:[#allocation5 + $0xc] sm:$0xf] %vm4798_vm3, %v7672_v0 }
 0x2a5   : > { %vm5483_vm2 = vmor %vm5482_vm7, %vm3576_vm15 }
 0x2a6   : > { %vm5484_vm8 = vmor %vm5483_vm2, %vm3580_vm1 }
 0x2a7   : > { %7407 = vrot.lane.b32.xlu0 %v7406_v48, %s7680_s22 }
 0x2ab   : > { %7417 = vrot.lane.b32.xlu0 %v7416_v16, %s7680_s22 }
 0x2b7   : > { %v7383_v24 = vpop.permute.xlu1 %7382 }
 0x2b8   : > { %v7385_v57 = vunpack.i.h.bf16 %v7383_v24  ;;  %v7384_v3 = vunpack.i.l.bf16 %v7383_v24 }
 0x2ba   : > { %v3854_v49 = vsel %vm1740_vm4, %v9169_v54, %v7384_v3  ;;  %v3855_v5 = vsel %vm1740_vm4, %v9208_v8, %v7385_v57 }
 0x2bb   : > { %v3883_v13 = vpack.c.bf16 %v3855_v5, %v3854_v49 }
 0x2d3   : > { %v7378_v45 = vpop.permute.xlu0 %7377 }
 0x2d4   : > { %v7380_v20 = vunpack.i.h.bf16 %v7378_v45  ;;  %v7379_v36 = vunpack.i.l.bf16 %v7378_v45 }
 0x2d6   : > { %v3862_v47 = vsel %vm1740_vm4, %v9211_v10, %v7379_v36  ;;  %v3863_v26 = vsel %vm1740_vm4, %v9231_v6, %v7380_v20 }
 0x2d7   : > { %v3885_v30 = vpack.c.bf16 %v3863_v26, %v3862_v47 }
 0x2d9   : > { %4241 = vmatprep.mubr.bf16.mxu1 %v3885_v30 }
 0x2da   : > { %4242 = vmatmul.mubr.bf16.gmra.mrb[8].mxu1 %v3883_v13 }
 0x304   : > { %v7393_v42 = vpop.permute.xlu1 %7392 }
 0x305   : > { %v7395_v31 = vunpack.i.h.bf16 %v7393_v42  ;;  %v7394_v34 = vunpack.i.l.bf16 %v7393_v42 }
 0x307   : > { %v3856_v54 = vsel %vm1740_vm4, %v9289_v40, %v7394_v34  ;;  %v3857_v8 = vsel %vm1740_vm4, %v9336_v29, %v7395_v31 }
 0x308   : > { %v3887_v53 = vpack.c.bf16 %v3857_v8, %v3856_v54  ;;  %v7403_v14 = vpop.permute.xlu1 %7402  ;;  %v7495_v8 = vld [vmem:[%s10135_s3 + $0x40] sm:$0xff]  }
 0x309   : > { %v7405_v2 = vunpack.i.h.bf16 %v7403_v14  ;;  %v7404_v37 = vunpack.i.l.bf16 %v7403_v14  ;;  %6485 = vmatprep.subr.bf16.mxu1 %v7495_v8  ;;  %v7502_v14 = vld [vmem:[%s10135_s3 + $0x10] sm:$0xff]  }
 0x30b   : > { %v3868_v32 = vsel %vm1740_vm4, %v9137_v43, %v7404_v37  ;;  %v7511_v37 = vld [vmem:[%s10135_s3 + $0xd8] sm:$0xff]  }
 0x311   : > { %v7388_v35 = vpop.permute.xlu0 %7387 }
 0x312   : > { %v7390_v18 = vunpack.i.h.bf16 %v7388_v35  ;;  %v7389_v44 = vunpack.i.l.bf16 %v7388_v35 }
 0x314   : > { %v3864_v10 = vsel %vm1740_vm4, %v9341_v63, %v7389_v44  ;;  %v3865_v6 = vsel %vm1740_vm4, %v9351_v41, %v7390_v18 }
 0x315   : > { %v7398_v23 = vpop.permute.xlu0 %7397  ;;  %v3889_v56 = vpack.c.bf16 %v3865_v6, %v3864_v10  ;;  %v7413_v52 = vpop.permute.xlu1 %7412  ;;  %v7496_v10 = vld [vmem:[%s10135_s3] sm:$0xff]   ;;  %v7497_v6 = vld [vmem:[%s10135_s3 + $0x48] sm:$0xff]  }
 0x316   : > { %v7400_v21 = vunpack.i.h.bf16 %v7398_v23  ;;  %v7399_v39 = vunpack.i.l.bf16 %v7398_v23  ;;  %v7414_v7 = vunpack.i.l.bf16 %v7413_v52  ;;  %v7499_v23 = vld [vmem:[%s10135_s3 + $0xc0] sm:$0xff]  }
 0x317   : > { %4249 = vmatprep.mubr.bf16.mxu1 %v3889_v56  ;;  %v9499_v58 = vpop.f32.mrb[32].mxu0  ;;  %v7500_v56 = vld [vmem:[%s10135_s3 + $0x80] sm:$0xff]   ;;  %6507 = vmatprep.subr.bf16.mxu0 %v7499_v23 }
 0x318   : > { %4250 = vmatmul.mubr.bf16.gmra.mrb[12].mxu1 %v3887_v53  ;;  %v9501_v28 = vpop.f32.mrb[33].mxu0  ;;  %v3867_v29 = vsel %vm1740_vm4, %v9131_v62, %v7400_v21  ;;  %v3866_v63 = vsel %vm1740_vm4, %v9007_v38, %v7399_v39  ;;  %v7415_v38 = vunpack.i.h.bf16 %v7413_v52  ;;  %v3874_v43 = vsel %vm1740_vm4, %v9444_v46, %v7414_v7  ;;  %v7498_v21 = vld [vmem:[%s10135_s3 + $0x8] sm:$0xff]   ;;  %6508 = vmatpush3.bf16.msra.mxu0 %v7500_v56  ;;  %v7501_v39 = vld [vmem:[%s10135_s3 + $0x50] sm:$0xff]   ;;  %v7515_v52 = vld [vmem:[%s10135_s3 + $0xe0] sm:$0xff]  }
 0x319   : > { %4290 = vmatprep.mubr.bf16.mxu1 %v9434_v51  ;;  %v9504_v40 = vpop.f32.mrb[34].mxu0  ;;  %v3878_v59 = vpack.c.bf16 %v3867_v29, %v3866_v63  ;;  %v3869_v51 = vsel %vm1740_vm4, %v9234_v4, %v7405_v2  ;;  %v7408_v27 = vpop.permute.xlu0 %7407  ;;  %v7504_v29 = vld [vmem:[%s10135_s3 + $0x88] sm:$0xff]   ;;  %v7507_v63 = vld [vmem:[%s10135_s3 + $0xd0] sm:$0xff]  }
 0x31a   : > { %v9510_v41 = vpop.f32.mrb[35].mxu0  ;;  %v3882_v62 = vpack.c.bf16 %v3869_v51, %v3868_v32  ;;  %v7410_v55 = vunpack.i.h.bf16 %v7408_v27  ;;  %v7409_v60 = vunpack.i.l.bf16 %v7408_v27  ;;  %v3875_v4 = vsel %vm1740_vm4, %v9417_v50, %v7415_v38  ;;  %v7508_v2 = vld [vmem:[%s10135_s3 + $0x90] sm:$0xff]   ;;  %v7506_v32 = vld [vmem:[%s10135_s3 + $0x18] sm:$0xff]   ;;  %v7509_v51 = vld [vmem:[%s10135_s3 + $0x60] sm:$0xff]  }
 0x31b   : > { %v3891_v57 = vpack.c.bf16 %v3875_v4, %v3874_v43  ;;  %v7512_v27 = vld [vmem:[%s10135_s3 + $0x98] sm:$0xff]   ;;  %v7514_v38 = vld [vmem:[%s10135_s3 + $0x28] sm:$0xff]  }
 0x31c   : > { %v3870_v11 = vsel %vm1740_vm4, %v9240_v25, %v7409_v60  ;;  %v3871_v1 = vsel %vm1740_vm4, %v9392_v22, %v7410_v55  ;;  %v7513_v55 = vld [vmem:[%s10135_s3 + $0x68] sm:$0xff]   ;;  %v7516_v60 = vld [vmem:[%s10135_s3 + $0xa0] sm:$0xff]  }
 0x31d   : > { %v7418_v12 = vpop.permute.xlu0 %7417  ;;  %v3886_v48 = vpack.c.bf16 %v3871_v1, %v3870_v11 }
 0x31e   : > { %v7420_v9 = vunpack.i.h.bf16 %v7418_v12  ;;  %v7419_v16 = vunpack.i.l.bf16 %v7418_v12 }
 0x320   : > { %4291 = vmatmul.mubr.bf16.vlgmr.msra.gmra.mrb[16].mxu1 %v3878_v59  ;;  %v3872_v46 = vsel %vm1740_vm4, %v9397_v17, %v7419_v16  ;;  %v3873_v50 = vsel %vm1740_vm4, %v9461_v19, %v7420_v9  ;;  %v7505_v59 = vld [vmem:[%s10135_s3 + $0x58] sm:$0xff]  }
 0x321   : > { %4298 = vmatprep.mubr.bf16.mxu1 %v3883_v13  ;;  %v3890_v20 = vpack.c.bf16 %v3873_v50, %v3872_v46  ;;  %6486 = vmatpush3.bf16.msra.mxu1 %v7496_v10 }
 0x322   : > { %6487 = vmatprep.subr.bf16.mxu1 %v7497_v6 }
 0x325   : > { %6488 = vmatpush3.bf16.msra.mxu1 %v7498_v21 }
 0x326   : > { %6489 = vmatprep.subr.bf16.mxu1 %v7501_v39 }
 0x328   : > { %4299 = vmatmul.mubr.bf16.gmra.mrb[20].mxu1 %v3882_v62  ;;  %v7510_v62 = vld [vmem:[%s10135_s3 + $0x20] sm:$0xff]  }
 0x329   : > { %4306 = vmatprep.mubr.bf16.mxu1 %v3887_v53  ;;  %v7503_v53 = vld [vmem:[%s10135_s3 + $0xc8] sm:$0xff]   ;;  %6490 = vmatpush3.bf16.msra.mxu1 %v7502_v14 }
 0x32a   : > { %6509 = vmatprep.subr.bf16.mxu0 %v7503_v53  ;;  %6491 = vmatprep.subr.bf16.mxu1 %v7505_v59  ;;  %v9653_v53 = vld [vmem:[#allocation4] sm:$0x3f] }
 0x32b   : > { %6510 = vmatpush3.bf16.msra.mxu0 %v7504_v29 }
 0x32c   : > { %6511 = vmatprep.subr.bf16.mxu0 %v7507_v63 }
 0x32d   : > { %6492 = vmatpush3.bf16.msra.mxu1 %v7506_v32 }
 0x32e   : > { %v6413_v61 = vpop.f32.mrb[0].mxu1  ;;  %6493 = vmatprep.subr.bf16.mxu1 %v7509_v51 }
 0x32f   : > { %v6414_v24 = vpop.f32.mrb[1].mxu1  ;;  %6512 = vmatpush3.bf16.msra.mxu0 %v7508_v2 }
 0x330   : > { %v9524_v3 = vadd.f32 %v6414_v24, %v6413_v61  ;;  %v6416_v45 = vpop.f32.mrb[2].mxu1  ;;  %4307 = vmatmul.mubr.bf16.gmra.mrb[24].mxu1 %v3886_v48  ;;  %6513 = vmatprep.subr.bf16.mxu0 %v7511_v37  ;;  %v9662_v37 = vcombine.high %v9653_v53, %v9653_v53 }
 0x331   : > { %v6417_v25 = vpop.f32.mrb[3].mxu1  ;;  %4314 = vmatprep.mubr.bf16.mxu1 %v3891_v57  ;;  %6494 = vmatpush3.bf16.msra.mxu1 %v7510_v62 }
 0x332   : > { %v9526_v22 = vadd.f32 %v6417_v25, %v6416_v45  ;;  %6495 = vmatprep.subr.bf16.mxu1 %v7513_v55  ;;  %v9636_v25 = vld [vmem:[%s10138_s6] ss:$0 sm:$0xff] }
 0x333   : > { %6514 = vmatpush3.bf16.msra.mxu0 %v7512_v27 }
 0x334   : > { %6515 = vmatprep.subr.bf16.mxu0 %v7515_v52 }
 0x335   : > { %6496 = vmatpush3.bf16.msra.mxu1 %v7514_v38 }
 0x337   : > { %6516 = vmatpush3.bf16.msra.mxu0 %v7516_v60 }
 0x338   : > { %4315 = vmatmul.mubr.bf16.gmra.mrb[28].mxu1 %v3890_v20  ;;  %v9643_v20 = vld [vmem:[%s10138_s6 + $0x1] ss:$0 sm:$0xff] }
 0x36e   : > { %v6419_v36 = vpop.f32.mrb[4].mxu1 }
 0x36f   : > { %v6420_v49 = vpop.f32.mrb[5].mxu1 }
 0x370   : > { %v9532_v5 = vadd.f32 %v6420_v49, %v6419_v36  ;;  %v6422_v47 = vpop.f32.mrb[6].mxu1 }
 0x371   : > { %v6423_v26 = vpop.f32.mrb[7].mxu1 }
 0x372   : > { %v9534_v30 = vadd.f32 %v6423_v26, %v6422_v47 }
 0x375   : > { %v9536_v13 = vpop.f32.mrb[36].mxu0 }
 0x376   : > { %v9538_v42 = vpop.f32.mrb[37].mxu0 }
 0x377   : > { %v9540_v31 = vpop.f32.mrb[38].mxu0 }
 0x378   : > { %v9542_v17 = vpop.f32.mrb[39].mxu0 }
 0x3ad   : > { %v6425_v19 = vpop.f32.mrb[8].mxu1 }
 0x3ae   : > { %v6426_v34 = vpop.f32.mrb[9].mxu1 }
 0x3af   : > { %v9558_v35 = vadd.f32 %v6426_v34, %v6425_v19  ;;  %v6428_v18 = vpop.f32.mrb[10].mxu1 }
 0x3b0   : > { %v6429_v44 = vpop.f32.mrb[11].mxu1 }
 0x3b1   : > { %v9560_v54 = vadd.f32 %v6429_v44, %v6428_v18 }
 0x3eb   : > { %v6431_v7 = vpop.f32.mrb[12].mxu1 }
 0x3ec   : > { %v6432_v11 = vpop.f32.mrb[13].mxu1 }
 0x3ed   : > { %v9628_v1 = vadd.f32 %v6432_v11, %v6431_v7  ;;  %v6434_v12 = vpop.f32.mrb[14].mxu1 }
 0x3ee   : > { %v6435_v43 = vpop.f32.mrb[15].mxu1 }
 0x3ef   : > { %v9630_v4 = vadd.f32 %v6435_v43, %v6434_v12 }
 0x3f3   : > { %v6453_v61 = vpop.f32.mrb[16].mxu1 }
 0x3f4   : > { %v6454_v48 = vpop.f32.mrb[17].mxu1 }
 0x3f5   : > { %v6455_v9 = vadd.f32 %v6454_v48, %v6453_v61  ;;  %v6456_v16 = vpop.f32.mrb[18].mxu1 }
 0x3f6   : > { %v6457_v24 = vpop.f32.mrb[19].mxu1 }
 0x3f7   : > { %v4293_v57 = vadd.f32 %v6455_v9, %v9524_v3  ;;  %v6458_v45 = vadd.f32 %v6457_v24, %v6456_v16 }
 0x3f9   : > { %v4358_v46 = vadd.f32 %v9501_v28, %v4293_v57  ;;  %v4296_v50 = vadd.f32 %v6458_v45, %v9526_v22 }
 0x3fb   : > { %v4393_v36 = vmul.f32 %v9636_v25, %v4358_v46  ;;  %v4361_v49 = vadd.f32 %v9510_v41, %v4296_v50  ;;  %v6459_v3 = vpop.f32.mrb[20].mxu1 }
 0x3fc   : > { %v6460_v47 = vpop.f32.mrb[21].mxu1 }
 0x3fd   : > { %v4406_v26 = vadd.f32 %v9643_v20, %v4393_v36  ;;  %v4394_v19 = vmul.f32 %v9636_v25, %v4361_v49  ;;  %v6461_v34 = vadd.f32 %v6460_v47, %v6459_v3  ;;  %v6462_v18 = vpop.f32.mrb[22].mxu1 }
 0x3fe   : > { %v6463_v28 = vpop.f32.mrb[23].mxu1 }
 0x3ff   : > { %v4414_v44 = vmax.f32 %v4406_v26, 0.0  ;;  %v4407_v22 = vadd.f32 %v9643_v20, %v4394_v19  ;;  %v4301_v8 = vadd.f32 %v6461_v34, %v9532_v5  ;;  %v6464_v10 = vadd.f32 %v6463_v28, %v6462_v18 }
 0x401   : > { %v4430_v6 = vcombine.high %v4414_v44, %v4414_v44  ;;  %v4437_v23 = vrot.slane %v4414_v44, %v8885_v33  ;;  %v4415_v56 = vmax.f32 %v4407_v22, 0.0  ;;  %v4366_v41 = vadd.f32 %v9499_v58, %v4301_v8 }
 0x402   : > { %v4304_v21 = vadd.f32 %v6464_v10, %v9534_v30 }
 0x403   : > { %v4444_v39 = vrot.slane %v4430_v6, %v8885_v33  ;;  %v4447_v29 = vcombine.high %v4415_v56, %v4415_v56  ;;  %v4454_v63 = vrot.slane %v4415_v56, %v8885_v33  ;;  %v6465_v14 = vpop.f32.mrb[24].mxu1  ;;  %v4395_v59 = vmul.f32 %v9636_v25, %v4366_v41 }
 0x404   : > { %v4369_v5 = vadd.f32 %v9504_v40, %v4304_v21  ;;  %v6466_v2 = vpop.f32.mrb[25].mxu1  ;;  %v4445_v58 = vcombine.high %v4437_v23, %v4437_v23 }
 0x405   : > { %v4461_v32 = vrot.slane %v4447_v29, %v8885_v33  ;;  %v4462_v51 = vcombine.high %v4454_v63, %v4454_v63  ;;  %v4598_v30 = vmax.f32 %v4437_v23, %v4454_v63  ;;  %v6468_v27 = vpop.f32.mrb[26].mxu1  ;;  %v4446_v52 = vcombine.high %v4444_v39, %v4444_v39 }
 0x406   : > { %v4408_v62 = vadd.f32 %v9643_v20, %v4395_v59  ;;  %v4396_v55 = vmul.f32 %v9636_v25, %v4369_v5  ;;  %v6467_v60 = vadd.f32 %v6466_v2, %v6465_v14  ;;  %v6469_v38 = vpop.f32.mrb[27].mxu1 }
 0x407   : > { %v4463_v7 = vcombine.high %v4461_v32, %v4461_v32  ;;  %v4599_v40 = vmax.f32 %v4445_v58, %v4462_v51  ;;  %v4600_v11 = vmax.f32 %v4444_v39, %v4461_v32  ;;  %v6255_v12 = vrot.slane %v4598_v30, 9 }
 0x408   : > { %v4416_v43 = vmax.f32 %v4408_v62, 0.0  ;;  %v4409_v61 = vadd.f32 %v9643_v20, %v4396_v55  ;;  %v4309_v48 = vadd.f32 %v6467_v60, %v9558_v35  ;;  %v6470_v9 = vadd.f32 %v6469_v38, %v6468_v27 }
 0x409   : > { %v4601_v16 = vmax.f32 %v4446_v52, %v4463_v7  ;;  %v6256_v24 = vrot.slane %v4599_v40, 9  ;;  %v6257_v57 = vrot.slane %v4600_v11, 9  ;;  %v4678_v45 = vmax.f32 %v4598_v30, %v6255_v12 }
 0x40a   : > { %v4464_v46 = vcombine.high %v4416_v43, %v4416_v43  ;;  %v4471_v50 = vrot.slane %v4416_v43, %v8885_v33  ;;  %v4417_v36 = vmax.f32 %v4409_v61, 0.0  ;;  %v4374_v49 = vadd.f32 %v9538_v42, %v4309_v48 }
 0x40b   : > { %v6258_v3 = vrot.slane %v4601_v16, 9  ;;  %v4679_v47 = vmax.f32 %v4599_v40, %v6256_v24  ;;  %v4680_v26 = vmax.f32 %v4600_v11, %v6257_v57  ;;  %v4720_v19 = vrot.slane %v4678_v45, %v8943_v15  ;;  %v6471_v34 = vpop.f32.mrb[28].mxu1 }
 0x40c   : > { %v4478_v18 = vrot.slane %v4464_v46, %v8885_v33  ;;  %v4479_v35 = vcombine.high %v4471_v50, %v4471_v50  ;;  %v4481_v28 = vcombine.high %v4417_v36, %v4417_v36  ;;  %v4488_v44 = vrot.slane %v4417_v36, %v8885_v33  ;;  %v6472_v22 = vpop.f32.mrb[29].mxu1 }
 0x40d   : > { %v4681_v8 = vmax.f32 %v4601_v16, %v6258_v3  ;;  %v4724_v10 = vrot.slane %v4679_v47, %v8943_v15  ;;  %v4728_v6 = vrot.slane %v4680_v26, %v8943_v15  ;;  %v4397_v42 = vmul.f32 %v9636_v25, %v4374_v49  ;;  %v6474_v23 = vpop.f32.mrb[30].mxu1 }
 0x40e   : > { %v4480_v56 = vcombine.high %v4478_v18, %v4478_v18  ;;  %v4495_v41 = vrot.slane %v4481_v28, %v8885_v33  ;;  %v4496_v21 = vcombine.high %v4488_v44, %v4488_v44  ;;  %v4602_v39 = vmax.f32 %v4471_v50, %v4488_v44  ;;  %v6475_v29 = vpop.f32.mrb[31].mxu1 }
 0x40f   : > { %v4732_v63 = vrot.slane %v4681_v8, %v8943_v15  ;;  %v4781_v14 = vsel %vm3574_vm14, %v4724_v10, %v4720_v19  ;;  %v4410_v59 = vadd.f32 %v9643_v20, %v4397_v42  ;;  %v4312_v5 = vadd.f32 %v6470_v9, %v9560_v54 }
 0x410   : > { %v4782_v2 = vsel %vm3576_vm15, %v4728_v6, %v4781_v14  ;;  %v4497_v58 = vcombine.high %v4495_v41, %v4495_v41  ;;  %v4603_v32 = vmax.f32 %v4479_v35, %v4496_v21  ;;  %v4604_v51 = vmax.f32 %v4478_v18, %v4495_v41 }
 0x411   : > { %v4783_v30 = vsel %vm3578_vm0, %v4732_v63, %v4782_v2  ;;  %v6259_v27 = vrot.slane %v4602_v39, 9  ;;  %v4418_v52 = vmax.f32 %v4410_v59, 0.0  ;;  %v4377_v62 = vadd.f32 %v9542_v17, %v4312_v5 }
 0x412   : > { %4799 = vst.msk [vmem:[#allocation4 + $0x9] sm:$0xf] %vm4798_vm3, %v4783_v30  ;;  %v4605_v55 = vmax.f32 %v4480_v56, %v4497_v58  ;;  %v6260_v60 = vrot.slane %v4603_v32, 9  ;;  %v6261_v38 = vrot.slane %v4604_v51, 9  ;;  %v6473_v7 = vadd.f32 %v6472_v22, %v6471_v34 }
 0x413   : > { %v4682_v40 = vmax.f32 %v4602_v39, %v6259_v27  ;;  %v4498_v11 = vcombine.high %v4418_v52, %v4418_v52  ;;  %v4398_v54 = vmul.f32 %v9636_v25, %v4377_v62  ;;  %v4505_v17 = vrot.slane %v4418_v52, %v8885_v33 }
 0x414   : > { %v6262_v12 = vrot.slane %v4605_v55, 9  ;;  %v4683_v43 = vmax.f32 %v4603_v32, %v6260_v60  ;;  %v4684_v61 = vmax.f32 %v4604_v51, %v6261_v38  ;;  %v4317_v48 = vadd.f32 %v6473_v7, %v9628_v1 }
 0x415   : > { %v4736_v9 = vrot.slane %v4682_v40, %v8943_v15  ;;  %v4411_v16 = vadd.f32 %v9643_v20, %v4398_v54  ;;  %v6476_v36 = vadd.f32 %v6475_v29, %v6474_v23  ;;  %v6275_v49 = vrot.slane %v9653_v53, 10 }
 0x416   : > { %v4685_v24 = vmax.f32 %v4605_v55, %v6262_v12  ;;  %v4740_v57 = vrot.slane %v4683_v43, %v8943_v15  ;;  %v4744_v45 = vrot.slane %v4684_v61, %v8943_v15  ;;  %v4382_v46 = vadd.f32 %v9536_v13, %v4317_v48 }
 0x417   : > { %v4419_v50 = vmax.f32 %v4411_v16, 0.0  ;;  %v4841_v1 = vrot.slane %v9662_v37, 6  ;;  %v4512_v26 = vrot.slane %v4498_v11, %v8885_v33  ;;  %v4320_v13 = vadd.f32 %v6476_v36, %v9630_v4 }
 0x418   : > { %v4748_v3 = vrot.slane %v4685_v24, %v8943_v15  ;;  %v4784_v47 = vsel %vm3574_vm14, %v4740_v57, %v4736_v9  ;;  %v4399_v19 = vmul.f32 %v9636_v25, %v4382_v46  ;;  %v4513_v22 = vcombine.high %v4505_v17, %v4505_v17 }
 0x419   : > { %v4785_v34 = vsel %vm3576_vm15, %v4744_v45, %v4784_v47  ;;  %v4515_v18 = vcombine.high %v4419_v50, %v4419_v50  ;;  %v4522_v35 = vrot.slane %v4419_v50, %v8885_v33  ;;  %v9703_v28 = vld [vmem:[#allocation4 + $0x8] sm:$0x3f]  ;;  %v4385_v56 = vadd.f32 %v9540_v31, %v4320_v13 }
 0x41a   : > { %v4786_v44 = vsel %vm3578_vm0, %v4748_v3, %v4785_v34  ;;  %v4412_v8 = vadd.f32 %v9643_v20, %v4399_v19  ;;  %v4814_v10 = vcombine.high %v9703_v28, %v9703_v28  ;;  %v4514_v41 = vcombine.high %v4512_v26, %v4512_v26 }
 0x41b   : > { %4800 = vst.msk [vmem:[#allocation4 + $0x11] sm:$0xf] %vm4798_vm3, %v4786_v44  ;;  %v4529_v6 = vrot.slane %v4515_v18, %v8885_v33  ;;  %v4530_v42 = vcombine.high %v4522_v35, %v4522_v35  ;;  %v4606_v23 = vmax.f32 %v4505_v17, %v4522_v35  ;;  %v4400_v5 = vmul.f32 %v9636_v25, %v4385_v56 }
 0x41c   : > { %v4420_v21 = vmax.f32 %v4412_v8, 0.0  ;;  %v4826_v2 = vrot.slane %v4814_v10, 5  ;;  %v9721_v31 = vsel %vm9714_vm10, %v6275_v49, %v4841_v1  ;;  %v6272_v55 = vrot.slane %v9703_v28, 9 }
 0x41d   : > { %v4531_v39 = vcombine.high %v4529_v6, %v4529_v6  ;;  %v4607_v29 = vmax.f32 %v4513_v22, %v4530_v42  ;;  %v4608_v63 = vmax.f32 %v4512_v26, %v4529_v6  ;;  %v6263_v14 = vrot.slane %v4606_v23, 9 }
 0x41e   : > { %v4532_v59 = vcombine.high %v4420_v21, %v4420_v21  ;;  %v4539_v52 = vrot.slane %v4420_v21, %v8885_v33  ;;  %v4413_v62 = vadd.f32 %v9643_v20, %v4400_v5  ;;  %v4845_v25 = vrot.slane %v4814_v10, 6 }
 0x41f   : > { %v4609_v58 = vmax.f32 %v4514_v41, %v4531_v39  ;;  %v6264_v32 = vrot.slane %v4607_v29, 9  ;;  %v6265_v51 = vrot.slane %v4608_v63, 9  ;;  %v4686_v30 = vmax.f32 %v4606_v23, %v6263_v14 }
 0x420   : > { %v6276_v40 = vrot.slane %v9703_v28, 10  ;;  %v4546_v54 = vrot.slane %v4532_v59, %v8885_v33  ;;  %v4421_v12 = vmax.f32 %v4413_v62, 0.0  ;;  %v9737_v61 = vsel %vm9723_vm5, %v6272_v55, %v4826_v2  ;;  %v9785_v55 = vld [vmem:[#allocation4 + $0x28] sm:$0x3f] }
 0x421   : > { %v6266_v60 = vrot.slane %v4609_v58, 9  ;;  %v4687_v38 = vmax.f32 %v4607_v29, %v6264_v32  ;;  %v4688_v7 = vmax.f32 %v4608_v63, %v6265_v51  ;;  %v4752_v11 = vrot.slane %v4686_v30, %v8943_v15  ;;  %v7519_v51 = vld [vmem:[%s10135_s3 + $0x70] sm:$0xff]  }
 0x422   : > { %v9733_v43 = vld [vmem:[#allocation4 + $0x10] sm:$0x3f]  ;;  %v4547_v16 = vcombine.high %v4539_v52, %v4539_v52  ;;  %v4549_v24 = vcombine.high %v4421_v12, %v4421_v12  ;;  %v4556_v57 = vrot.slane %v4421_v12, %v8885_v33  ;;  %v9748_v45 = vsel %vm9714_vm10, %v6276_v40, %v4845_v25  ;;  %6497 = vmatprep.subr.bf16.mxu1 %v7519_v51 }
 0x423   : > { %v4689_v20 = vmax.f32 %v4609_v58, %v6266_v60  ;;  %v4756_v48 = vrot.slane %v4687_v38, %v8943_v15  ;;  %v4760_v9 = vrot.slane %v4688_v7, %v8943_v15  ;;  %v9743_v17 = vcombine.high %v9733_v43, %v9733_v43  ;;  %v7521_v60 = vld [vmem:[%s10135_s3 + $0xe8] sm:$0xff]  }
 0x424   : > { %v6273_v36 = vrot.slane %v9733_v43, 9  ;;  %v4563_v3 = vrot.slane %v4549_v24, %v8885_v33  ;;  %v4564_v47 = vcombine.high %v4556_v57, %v4556_v57  ;;  %v4610_v26 = vmax.f32 %v4539_v52, %v4556_v57  ;;  %6517 = vmatprep.subr.bf16.mxu0 %v7521_v60 }
 0x425   : > { %v4764_v46 = vrot.slane %v4689_v20, %v8943_v15  ;;  %v4787_v50 = vsel %vm3574_vm14, %v4756_v48, %v4752_v11  ;;  %v4830_v49 = vrot.slane %v9743_v17, 5  ;;  %v4548_v34 = vcombine.high %v4546_v54, %v4546_v54 }
 0x426   : > { %v4788_v1 = vsel %vm3576_vm15, %v4760_v9, %v4787_v50  ;;  %v4887_v35 = vcombine.low %v9721_v31, %v9748_v45  ;;  %v4565_v13 = vcombine.high %v4563_v3, %v4563_v3  ;;  %v4611_v44 = vmax.f32 %v4547_v16, %v4564_v47  ;;  %v7522_v9 = vld [vmem:[%s10135_s3 + $0xa8] sm:$0xff]   ;;  %v7524_v16 = vld [vmem:[%s10135_s3 + $0x38] sm:$0xff]  }
 0x427   : > { %v4789_v19 = vsel %vm3578_vm0, %v4764_v46, %v4788_v1  ;;  %v9759_v18 = vsel %vm9723_vm5, %v6273_v36, %v4830_v49  ;;  %v4612_v22 = vmax.f32 %v4546_v54, %v4563_v3  ;;  %v6267_v8 = vrot.slane %v4610_v26, 9  ;;  %6518 = vmatpush3.bf16.msra.mxu0 %v7522_v9  ;;  %v7525_v1 = vld [vmem:[%s10135_s3 + $0xf0] sm:$0xff]  }
 0x428   : > { %4801 = vst.msk [vmem:[#allocation4 + $0x19] sm:$0xf] %vm4798_vm3, %v4789_v19  ;;  %v4899_v10 = vcombine.low %v9737_v61, %v9759_v18  ;;  %v4613_v6 = vmax.f32 %v4548_v34, %v4565_v13  ;;  %v6268_v42 = vrot.slane %v4611_v44, 9  ;;  %v6271_v41 = vrot.slane %v9653_v53, 9  ;;  %v7526_v3 = vld [vmem:[%s10135_s3 + $0xb0] sm:$0xff]   ;;  %6519 = vmatprep.subr.bf16.mxu0 %v7525_v1  ;;  %v7539_v1 = vld [vmem:[%s10136_s4 + $0x80] sm:$0xff]  }
 0x429   : > { %v6269_v23 = vrot.slane %v4612_v22, 9  ;;  %v4690_v56 = vmax.f32 %v4610_v26, %v6267_v8  ;;  %v4822_v21 = vrot.slane %v9662_v37, 5  ;;  %v7520_v37 = vld [vmem:[%s10135_s3 + $0x30] sm:$0xff]   ;;  %v4849_v25 = vrot.slane %v9743_v17, 6  ;;  %v7523_v17 = vld [vmem:[%s10135_s3 + $0x78] sm:$0xff]  }
 0x42a   : > { %v6270_v39 = vrot.slane %v4613_v6, 9  ;;  %v4691_v29 = vmax.f32 %v4611_v44, %v6268_v42  ;;  %v6277_v40 = vrot.slane %v9733_v43, 10  ;;  %6498 = vmatpush3.bf16.msra.mxu1 %v7520_v37  ;;  %v4866_v24 = vcombine.high %v9785_v55, %v9785_v55  ;;  %v7528_v8 = vld [vmem:[%s10135_s3 + $0xf8] sm:$0xff]  }
 0x42b   : > { %v4692_v63 = vmax.f32 %v4612_v22, %v6269_v23  ;;  %v4768_v59 = vrot.slane %v4690_v56, %v8943_v15  ;;  %v4823_v32 = vsel %vm9723_vm5, %v6271_v41, %v4822_v21  ;;  %6499 = vmatprep.subr.bf16.mxu1 %v7523_v17  ;;  %v6282_v19 = vrot.slane %v9785_v55, 10  ;;  %6520 = vmatpush3.bf16.msra.mxu0 %v7526_v3  ;;  %v7529_v56 = vld [vmem:[%s10135_s3 + $0xb8] sm:$0xff]   ;;  %v7541_v3 = vld [vmem:[%s10136_s4 + $0xc8] sm:$0xff]  }
 0x42c   : > { %v4693_v14 = vmax.f32 %v4613_v6, %v6270_v39  ;;  %v4772_v5 = vrot.slane %v4691_v29, %v8943_v15  ;;  %v4850_v50 = vsel %vm9714_vm10, %v6277_v40, %v4849_v25  ;;  %v4879_v36 = vcombine.low %v4823_v32, %v9737_v61  ;;  %6521 = vmatprep.subr.bf16.mxu0 %v7528_v8  ;;  %v7532_v61 = vld [vmem:[%s10135_s3 + $0x110] sm:$0xff]   ;;  %v7549_v8 = vld [vmem:[%s10136_s4 + $0xd8] sm:$0xff]  }
 0x42d   : > { %v4776_v2 = vrot.slane %v4692_v63, %v8943_v15  ;;  %v4873_v34 = vrot.slane %v4866_v24, 6  ;;  %v6281_v13 = vrot.slane %v9785_v55, 9  ;;  %v4869_v44 = vrot.slane %v4866_v24, 5 }
 0x42e   : > { %v4780_v30 = vrot.slane %v4693_v14, %v8943_v15  ;;  %v4790_v52 = vsel %vm3574_vm14, %v4772_v5, %v4768_v59  ;;  %6500 = vmatpush3.bf16.msra.mxu1 %v7524_v16  ;;  %v4891_v6 = vcombine.low %v9703_v28, %v9733_v43  ;;  %v4903_v32 = vcombine.low %v9748_v45, %v4850_v50 }
 0x42f   : > { %v9771_v58 = vld [vmem:[#allocation4 + $0x18] sm:$0x3f]  ;;  %v4791_v38 = vsel %vm3576_vm15, %v4776_v2, %v4790_v52  ;;  %6641 = vmatprep.subr.bf16.mxu1 %v7672_v0  ;;  %v4874_v21 = vsel %vm9714_vm10, %v6282_v19, %v4873_v34  ;;  %v4870_v39 = vsel %vm9723_vm5, %v6281_v13, %v4869_v44  ;;  %6522 = vmatpush3.bf16.msra.mxu0 %v7529_v56  ;;  %v7542_v19 = vld [vmem:[%s10136_s4 + $0x50] sm:$0xff]   ;;  %v7553_v56 = vld [vmem:[%s10136_s4 + $0xe0] sm:$0xff]  }
 0x430   : > { %v4816_v62 = vcombine.high %v9771_v58, %v9771_v58  ;;  %v6274_v7 = vrot.slane %v9771_v58, 9  ;;  %v4876_v11 = vcombine.low %v9733_v43, %v9771_v58  ;;  %v4792_v54 = vsel %vm3578_vm0, %v4780_v30, %v4791_v38  ;;  %v7527_v43 = vld [vmem:[%s10135_s3 + $0x100] sm:$0xff]   ;;  %v7545_v34 = vld [vmem:[%s10136_s4 + $0xd0] sm:$0xff]  }
 0x431   : > { %v6278_v20 = vrot.slane %v9771_v58, 10  ;;  %4802 = vst.msk [vmem:[#allocation4 + $0x21] sm:$0xf] %vm4798_vm3, %v4792_v54  ;;  %v4875_v4 = vcombine.low %v9653_v53, %v9703_v28  ;;  %vm7682_vm0 = vmmov 0   ;;  %v7544_v13 = vld [vmem:[%s10136_s4 + $0x10] sm:$0xff]  }
 0x432   : > { %v4834_v12 = vrot.slane %v4816_v62, 5  ;;  %v4853_v48 = vrot.slane %v4816_v62, 6  ;;  %v7547_v44 = vld [vmem:[%s10136_s4 + $0x90] sm:$0xff]  }
 0x434   : > { %v9812_v57 = vsel %vm9723_vm5, %v6274_v7, %v4834_v12  ;;  %v4854_v46 = vsel %vm9714_vm10, %v6278_v20, %v4853_v48 }
 0x435   : > { %v4880_v49 = vcombine.low %v9759_v18, %v9812_v57  ;;  %v4888_v47 = vcombine.low %v4850_v50, %v4854_v46  ;;  %v7533_v18 = vld [vmem:[%s10135_s3 + $0x118] sm:$0xff]   ;;  %v7536_v50 = vld [vmem:[%s10136_s4] sm:$0xff]  }
 0x437   : > { %v7426_v26 = vpack.i.bf16 %v4880_v49, %v4879_v36  ;;  %v7537_v36 = vld [vmem:[%s10136_s4 + $0xc0] sm:$0xff]   ;;  %v7538_v49 = vld [vmem:[%s10136_s4 + $0x48] sm:$0xff]  }
 0x438   : > { %v4807_v22 = vld [vmem:[#allocation4 + $0x20] sm:$0x3f]  ;;  %6556 = vmatprep.subr.bf16.mxu0 %v7537_v36 }
 0x439   : > { %7427 = vrot.lane.b32.xlu0 %v7426_v26, %s7680_s22  ;;  %v4892_v42 = vcombine.low %v9771_v58, %v4807_v22  ;;  %v4856_v23 = vcombine.high %v4807_v22, %v4807_v22  ;;  %v6280_v41 = vrot.slane %v4807_v22, 10  ;;  %v6279_v14 = vrot.slane %v4807_v22, 9  ;;  %v7543_v26 = vld [vmem:[%s10136_s4 + $0x88] sm:$0xff]  }
 0x43a   : > { %v4911_v24 = vcombine.low %v4807_v22, %v9785_v55  ;;  %v7546_v22 = vld [vmem:[%s10136_s4 + $0x58] sm:$0xff]  }
 0x43b   : > { %v7421_v29 = vpack.i.bf16 %v4892_v42, %v4891_v6  ;;  %v4863_v63 = vrot.slane %v4856_v23, 6  ;;  %v4859_v59 = vrot.slane %v4856_v23, 5  ;;  %v7548_v6 = vld [vmem:[%s10136_s4 + $0x18] sm:$0xff]   ;;  %v7550_v23 = vld [vmem:[%s10136_s4 + $0x60] sm:$0xff]  }
 0x43c   : > { %v7551_v42 = vld [vmem:[%s10136_s4 + $0x98] sm:$0xff]  }
 0x43d   : > { %7422 = vrot.lane.b32.xlu1 %v7421_v29, %s7680_s22  ;;  %v4864_v5 = vsel %vm9714_vm10, %v6280_v41, %v4863_v63  ;;  %v4860_v2 = vsel %vm9723_vm5, %v6279_v14, %v4859_v59  ;;  %v7552_v41 = vld [vmem:[%s10136_s4 + $0x20] sm:$0xff]   ;;  %v7557_v29 = vld [vmem:[%s10136_s4 + $0xe8] sm:$0xff]   ;;  %v7558_v59 = vld [vmem:[%s10136_s4 + $0x70] sm:$0xff]  }
 0x43e   : > { %v4904_v51 = vcombine.low %v4854_v46, %v4864_v5  ;;  %v4917_v37 = vcombine.low %v4864_v5, %v4874_v21  ;;  %v4913_v30 = vcombine.low %v4860_v2, %v4870_v39  ;;  %v4900_v52 = vcombine.low %v9812_v57, %v4860_v2  ;;  %v7555_v21 = vld [vmem:[%s10136_s4 + $0xa0] sm:$0xff]   ;;  %v7554_v39 = vld [vmem:[%s10136_s4 + $0x68] sm:$0xff]   ;;  %v7560_v5 = vld [vmem:[%s10136_s4 + $0x30] sm:$0xff]  }
 0x43f   : > { %v7556_v63 = vld [vmem:[%s10136_s4 + $0x28] sm:$0xff]  }
 0x440   : > { %4907 = vrot.lane.b32.xlu0 %v4904_v51, %s7680_s22  ;;  %v7431_v62 = vpack.i.bf16 %v4903_v32, %v4913_v30  ;;  %v4930_v25 = vpack.c.bf16 %v4917_v37, %v4888_v47  ;;  %v7559_v14 = vld [vmem:[%s10136_s4 + $0xa8] sm:$0xff]  }
 0x442   : > { %7432 = vrot.lane.b32.xlu1 %v7431_v62, %s7680_s22 }
 0x4ab   : > { %v7428_v60 = vpop.permute.xlu0 %7427 }
 0x4ac   : > { %v7430_v38 = vunpack.i.h.bf16 %v7428_v60  ;;  %v7429_v27 = vunpack.i.l.bf16 %v7428_v60 }
 0x4ae   : > { %v4920_v7 = vsel %vm1740_vm4, %v4876_v11, %v7430_v38  ;;  %v4919_v40 = vsel %vm1740_vm4, %v4875_v4, %v7429_v27 }
 0x4af   : > { %v4926_v54 = vpack.c.bf16 %v4920_v7, %v4919_v40  ;;  %v7423_v12 = vpop.permute.xlu1 %7422 }
 0x4b0   : > { %v7425_v20 = vunpack.i.h.bf16 %v7423_v12  ;;  %v7424_v48 = vunpack.i.l.bf16 %v7423_v12  ;;  %v6320_v12 = vld [vmem:[%s10139_s7] ss:$0 sm:$0xff] }
 0x4b2   : > { %v4921_v9 = vsel %vm1740_vm4, %v4887_v35, %v7424_v48  ;;  %v4922_v53 = vsel %vm1740_vm4, %v4888_v47, %v7425_v20  ;;  %v4908_v58 = vpop.permute.xlu0 %4907  ;;  %v7531_v35 = vld [vmem:[%s10135_s3 + $0x108] sm:$0xff]  }
 0x4b3   : > { %v4927_v28 = vpack.c.bf16 %v4922_v53, %v4921_v9  ;;  %v4924_v57 = vsel %vm1740_vm4, %v4900_v52, %v4908_v58  ;;  %v7540_v47 = vld [vmem:[%s10136_s4 + $0x8] sm:$0xff]   ;;  %v6321_v9 = vld [vmem:[%s10139_s7 + $0x1] ss:$0 sm:$0xff] }
 0x4b4   : > { %v7433_v11 = vpop.permute.xlu1 %7432 }
 0x4b5   : > { %v7435_v17 = vunpack.i.h.bf16 %v7433_v11  ;;  %v7434_v16 = vunpack.i.l.bf16 %v7433_v11  ;;  %5254 = vmatprep.mubr.bf16.mxu1 %v4927_v28 }
 0x4b6   : > { %5255 = vmatmul.mubr.bf16.vlgmr.msra.gmra.mrb[32].mxu1 %v4926_v54 }
 0x4b7   : > { %v4923_v31 = vsel %vm1740_vm4, %v4899_v10, %v7435_v17  ;;  %6642 = vmatpush3.bf16.msra.mxu1 %v7527_v43  ;;  %v4925_v45 = vsel %vm1740_vm4, %v4911_v24, %v7434_v16  ;;  %6649 = vmatprep.mubr.msk.bf16.mxu1 %vm7682_vm0, %v7672_v0  ;;  %v7535_v10 = vld [vmem:[%s10136_s4 + $0x40] sm:$0xff]  }
 0x4b8   : > { %v4928_v55 = vpack.c.bf16 %v4924_v57, %v4923_v31  ;;  %6643 = vmatprep.subr.bf16.mxu1 %v7672_v0  ;;  %v4929_v46 = vpack.c.bf16 %v4925_v45, %v4920_v7 }
 0x4ba   : > { %5295 = vmatprep.mubr.bf16.mxu0 %v4929_v46 }
 0x4bb   : > { %6644 = vmatpush3.bf16.msra.mxu1 %v7531_v35  ;;  %5296 = vmatmul.mubr.bf16.vlgmr.msra.gmra.mrb[40].mxu0 %v4928_v55 }
 0x4bc   : > { %6645 = vmatprep.subr.bf16.mxu1 %v7672_v0  ;;  %6557 = vmatpush3.bf16.msra.mxu0 %v7539_v1 }
 0x4bd   : > { %6558 = vmatprep.subr.bf16.mxu0 %v7541_v3 }
 0x4bf   : > { %6646 = vmatpush3.bf16.msra.mxu1 %v7532_v61 }
 0x4c0   : > { %6647 = vmatprep.subr.bf16.mxu1 %v7672_v0  ;;  %6559 = vmatpush3.bf16.msra.mxu0 %v7543_v26 }
 0x4c1   : > { %6560 = vmatprep.subr.bf16.mxu0 %v7545_v34 }
 0x4c3   : > { %6648 = vmatpush3.bf16.msra.mxu1 %v7533_v18 }
 0x4c4   : > { %6534 = vmatprep.subr.bf16.mxu1 %v7535_v10  ;;  %6561 = vmatpush3.bf16.msra.mxu0 %v7547_v44 }
 0x4c5   : > { %6562 = vmatprep.subr.bf16.mxu0 %v7549_v8 }
 0x4c6   : > { %6650 = vmatmul.mubr.msk.bf16.vlgmr.msra.gmra.mrb[36].mxu1 %vm1740_vm4, %v4930_v25 }
 0x4c7   : > { %6535 = vmatpush3.bf16.msra.mxu1 %v7536_v50 }
 0x4c8   : > { %6536 = vmatprep.subr.bf16.mxu1 %v7538_v49  ;;  %6563 = vmatpush3.bf16.msra.mxu0 %v7551_v42 }
 0x4c9   : > { %6564 = vmatprep.subr.bf16.mxu0 %v7553_v56  ;;  %v9980_v56 = vld [vmem:[#allocation5] sm:$0xf] }
 0x4cb   : > { %6537 = vmatpush3.bf16.msra.mxu1 %v7540_v47 }
 0x4cc   : > { %6538 = vmatprep.subr.bf16.mxu1 %v7542_v19  ;;  %6565 = vmatpush3.bf16.msra.mxu0 %v7555_v21 }
 0x4cd   : > { %6566 = vmatprep.subr.bf16.mxu0 %v7557_v29  ;;  %v9985_v29 = vld [vmem:[#allocation5 + $0xc] sm:$0xf] }
 0x4cf   : > { %6539 = vmatpush3.bf16.msra.mxu1 %v7544_v13 }
 0x4d0   : > { %6540 = vmatprep.subr.bf16.mxu1 %v7546_v22  ;;  %6567 = vmatpush3.bf16.msra.mxu0 %v7559_v14 }
 0x4d3   : > { %6541 = vmatpush3.bf16.msra.mxu1 %v7548_v6 }
 0x4d4   : > { %6542 = vmatprep.subr.bf16.mxu1 %v7550_v23 }
 0x4d7   : > { %6543 = vmatpush3.bf16.msra.mxu1 %v7552_v41 }
 0x4d8   : > { %6544 = vmatprep.subr.bf16.mxu1 %v7554_v39 }
 0x4db   : > { %6545 = vmatpush3.bf16.msra.mxu1 %v7556_v63  ;;  %v5472_v63 = vrot.slane %v9980_v56, %v8885_v33 }
 0x4dc   : > { %6546 = vmatprep.subr.bf16.mxu1 %v7558_v59  ;;  %v9994_v59 = vrot.slane %v9985_v29, %v8885_v33 }
 0x4df   : > { %6547 = vmatpush3.bf16.msra.mxu1 %v7560_v5  ;;  %v5473_v5 = vcombine.high %v5472_v63, %v5472_v63 }
 0x589   : > { %v6501_v2 = vpop.f32.mrb[32].mxu1 }
 0x58a   : > { %v6502_v32 = vpop.f32.mrb[33].mxu1 }
 0x58b   : > { %v6503_v51 = vadd.f32 %v6502_v32, %v6501_v2  ;;  %v6504_v37 = vpop.f32.mrb[34].mxu1 }
 0x58c   : > { %v6505_v30 = vpop.f32.mrb[35].mxu1 }
 0x58d   : > { %v6506_v52 = vadd.f32 %v6505_v30, %v6504_v37  ;;  %v5488_v37 = vrot.slane %v5473_v5, 7  ;;  %v7571_v5 = vld [vmem:[%s10136_s4 + $0x110] sm:$0xff]  }
 0x58e   : > { %v6523_v62 = vpop.f32.mrb[40].mxu0 }
 0x58f   : > { %v6524_v25 = vpop.f32.mrb[41].mxu0 }
 0x590   : > { %v6525_v60 = vadd.f32 %v6524_v25, %v6523_v62  ;;  %v6526_v4 = vpop.f32.mrb[42].mxu0 }
 0x591   : > { %v6527_v38 = vpop.f32.mrb[43].mxu0 }
 0x592   : > { %v6528_v27 = vadd.f32 %v6527_v38, %v6526_v4  ;;  %v5298_v7 = vadd.f32 %v6525_v60, %v6503_v51  ;;  %v6326_v51 = vrot.slane %v5472_v63, 9  ;;  %v6329_v60 = vrot.slane %v9994_v59, 9  ;;  %v7562_v38 = vld [vmem:[%s10136_s4 + $0xf0] sm:$0xff]  }
 0x593   : > { %6568 = vmatprep.subr.bf16.mxu0 %v7562_v38 }
 0x594   : > { %v5301_v40 = vadd.f32 %v6528_v27, %v6506_v52  ;;  %v7563_v27 = vld [vmem:[%s10136_s4 + $0x78] sm:$0xff]  }
 0x595   : > { %6548 = vmatprep.subr.bf16.mxu1 %v7563_v27 }
 0x599   : > { %v5338_v54 = vpop.f32.mrb[36].mxu1 }
 0x59a   : > { %v5339_v20 = vadd.f32 %v5338_v54, %v5298_v7  ;;  %v6651_v48 = vpop.f32.mrb[37].mxu1  ;;  %v7564_v7 = vld [vmem:[%s10136_s4 + $0xb0] sm:$0xff]  }
 0x59b   : > { %v5341_v53 = vpop.f32.mrb[38].mxu1  ;;  %v7565_v48 = vld [vmem:[%s10136_s4 + $0x38] sm:$0xff]   ;;  %6569 = vmatpush3.bf16.msra.mxu0 %v7564_v7 }
 0x59c   : > { %v5350_v28 = vmul.f32 %v6320_v12, %v5339_v20  ;;  %v5342_v43 = vadd.f32 %v5341_v53, %v5301_v40  ;;  %v6652_v58 = vpop.f32.mrb[39].mxu1  ;;  %v7566_v53 = vld [vmem:[%s10136_s4 + $0xf8] sm:$0xff]   ;;  %6549 = vmatpush3.bf16.msra.mxu1 %v7565_v48 }
 0x59d   : > { %6570 = vmatprep.subr.bf16.mxu0 %v7566_v53  ;;  %6653 = vmatprep.subr.bf16.mxu1 %v7672_v0 }
 0x59e   : > { %v5357_v11 = vadd.f32 %v6321_v9, %v5350_v28  ;;  %v5351_v17 = vmul.f32 %v6320_v12, %v5342_v43  ;;  %v7567_v28 = vld [vmem:[%s10136_s4 + $0xb8] sm:$0xff]  }
 0x59f   : > { %6571 = vmatpush3.bf16.msra.mxu0 %v7567_v28 }
 0x5a0   : > { %v5359_v16 = vmax.f32 %v5357_v11, 0.0  ;;  %v5358_v24 = vadd.f32 %v6321_v9, %v5351_v17 }
 0x5a2   : > { %v5363_v57 = vcombine.high %v5359_v16, %v5359_v16  ;;  %v5370_v31 = vrot.slane %v5359_v16, %v8885_v33  ;;  %v5360_v45 = vmax.f32 %v5358_v24, 0.0 }
 0x5a4   : > { %v5377_v35 = vrot.slane %v5363_v57, %v8885_v33  ;;  %v5380_v55 = vcombine.high %v5360_v45, %v5360_v45  ;;  %v5387_v46 = vrot.slane %v5360_v45, %v8885_v33  ;;  %v5378_v61 = vcombine.high %v5370_v31, %v5370_v31 }
 0x5a6   : > { %v5379_v18 = vcombine.high %v5377_v35, %v5377_v35  ;;  %v5405_v10 = vmax.f32 %v5370_v31, %v5377_v35  ;;  %v5394_v50 = vrot.slane %v5380_v55, %v8885_v33  ;;  %v5395_v36 = vcombine.high %v5387_v46, %v5387_v46 }
 0x5a8   : > { %v5406_v49 = vmax.f32 %v5378_v61, %v5379_v18  ;;  %v6322_v1 = vrot.slane %v5405_v10, 9  ;;  %v5396_v3 = vcombine.high %v5394_v50, %v5394_v50  ;;  %v5407_v47 = vmax.f32 %v5387_v46, %v5394_v50 }
 0x5aa   : > { %v6323_v26 = vrot.slane %v5406_v49, 9  ;;  %v5425_v19 = vmax.f32 %v5405_v10, %v6322_v1  ;;  %v5408_v34 = vmax.f32 %v5395_v36, %v5396_v3  ;;  %v6324_v13 = vrot.slane %v5407_v47, 9 }
 0x5ac   : > { %v5426_v44 = vmax.f32 %v5406_v49, %v6323_v26  ;;  %v6325_v22 = vrot.slane %v5408_v34, 9  ;;  %v5427_v8 = vmax.f32 %v5407_v47, %v6324_v13  ;;  %v5440_v6 = vrot.slane %v5425_v19, %v8943_v15 }
 0x5ae   : > { %v5444_v42 = vrot.slane %v5426_v44, %v8943_v15  ;;  %v5428_v23 = vmax.f32 %v5408_v34, %v6325_v22  ;;  %v5448_v21 = vrot.slane %v5427_v8, %v8943_v15 }
 0x5b0   : > { %v5453_v41 = vsel %vm3574_vm14, %v5444_v42, %v5440_v6  ;;  %v5452_v39 = vrot.slane %v5428_v23, %v8943_v15  ;;  %v5515_v15 = vcombine.high %v9994_v59, %v9994_v59 }
 0x5b1   : > { %5458 = vst.msk [vmem:[#allocation5 + $0x5] sm:$0x3] %vm3234_vm13, %v5453_v41  ;;  %v7568_v41 = vld [vmem:[%s10136_s4 + $0x100] sm:$0xff]  }
 0x5b2   : > { %v5454_v14 = vsel %vm3574_vm14, %v5452_v39, %v5448_v21  ;;  %v5518_v4 = vrot.slane %v5515_v15, 7 }
 0x5b3   : > { %5459 = vst.msk [vmem:[#allocation5 + $0x9] sm:$0x3] %vm3234_vm13, %v5454_v14  ;;  %vm10002_vm13 = vmor %vm5484_vm8, %vm3584_vm6  ;;  %v7570_v14 = vld [vmem:[%s10136_s4 + $0x108] sm:$0xff]  }
 0x5b4   : > { %v5489_v40 = vsel %vm10002_vm13, %v6326_v51, %v5488_v37  ;;  %v5519_v17 = vsel %vm10002_vm13, %v6329_v60, %v5518_v4 }
 0x5b8   : > { %v5461_v2 = vld [vmem:[#allocation5 + $0x4] sm:$0xf] }
 0x5b9   : > { %v5480_v32 = vrot.slane %v5461_v2, %v8885_v33  ;;  %v5520_v50 = vcombine.low %v9980_v56, %v5461_v2 }
 0x5ba   : > { %v5462_v30 = vld [vmem:[#allocation5 + $0x8] sm:$0xf] }
 0x5bb   : > { %v5481_v62 = vcombine.high %v5480_v32, %v5480_v32  ;;  %v10007_v25 = vrot.slane %v5462_v30, %v8885_v33  ;;  %v6327_v54 = vrot.slane %v5480_v32, 9  ;;  %v5549_v9 = vcombine.low %v5461_v2, %v5462_v30  ;;  %v7572_v2 = vld [vmem:[%s10136_s4 + $0x118] sm:$0xff]  }
 0x5bc   : > { %v6330_v36 = vcombine.high %v5472_v63, %v5480_v32  ;;  %v5580_v49 = vcombine.low %v5462_v30, %v9985_v29  ;;  %v5527_v3 = vrot.slane %v5520_v50, %v8885_v33 }
 0x5bd   : > { %v5492_v12 = vrot.slane %v5481_v62, 7  ;;  %v5502_v20 = vcombine.high %v10007_v25, %v10007_v25  ;;  %v6328_v58 = vrot.slane %v10007_v25, 9  ;;  %v6331_v24 = vcombine.high %v5480_v32, %v10007_v25 }
 0x5be   : > { %v5556_v45 = vrot.slane %v5549_v9, %v8885_v33  ;;  %v5547_v19 = vrot.slane %v6330_v36, %v8885_v33  ;;  %v5587_v44 = vrot.slane %v5580_v49, %v8885_v33  ;;  %v6332_v15 = vcombine.high %v10007_v25, %v9994_v59 }
 0x5bf   : > { %v5493_v43 = vsel %vm10002_vm13, %v6327_v54, %v5492_v12  ;;  %v5505_v11 = vrot.slane %v5502_v20, 7  ;;  %v5576_v61 = vrot.slane %v6331_v24, %v8885_v33  ;;  %v6371_v12 = vld [vmem:[%s10140_s8 + $0x1] ss:$0 sm:$0xff] }
 0x5c0   : > { %v5529_v16 = vcombine.low %v5489_v40, %v5493_v43  ;;  %v5607_v32 = vrot.slane %v6332_v15, %v8885_v33 }
 0x5c1   : > { %v5506_v57 = vsel %vm10002_vm13, %v6328_v58, %v5505_v11 }
 0x5c2   : > { %v5536_v31 = vrot.slane %v5529_v16, %v8885_v33  ;;  %v5589_v35 = vcombine.low %v5506_v57, %v5519_v17  ;;  %v5560_v55 = vcombine.low %v5493_v43, %v5506_v57  ;;  %v5617_v51 = vpack.c.bf16 %v5607_v32, %v5607_v32 }
 0x5c4   : > { %v7436_v46 = vpack.i.bf16 %v5536_v31, %v5556_v45  ;;  %v5596_v18 = vrot.slane %v5589_v35, %v8885_v33  ;;  %v5567_v13 = vrot.slane %v5560_v55, %v8885_v33 }
 0x5c6   : > { %7437 = vrot.lane.b32.xlu1 %v7436_v46, %s7680_s22  ;;  %v7441_v10 = vpack.i.bf16 %v5576_v61, %v5596_v18 }
 0x5c8   : > { %7442 = vrot.lane.b32.xlu0 %v7441_v10, %s7680_s22  ;;  %s323_s22 = sand.u32 1, %s7662_s10  }
 0x5c9   : > { %s324_s24 = scalar_lea.vmem [#allocation6], %s323_s22  ;;  %s6053_s29 = scalar_lea.sflag [#allocation7], %s323_s22 }
 0x5ca   : > { %s6065_s14 = sshll.u32 %s324_s24, 4  ;;  %s10092_s14 = int_to_ptr.vmem [resolvable:$true] %s6065_s14 }
 0x5cb   : > { %s7608_s25 = scalar_lea.vmem %s10092_s14, 16  ;;  %p7615_p0 = scmp.lt.s32.totalorder %s10092_s14, %s7613_s26 }
 0x5cc   : > { %p7609_p11 = scmp.ne.s32.totalorder %s10092_s14, %s7608_s25  ;;  %p7616_p1 = scmp.lt.s32.totalorder %s7614_s27, %s7608_s25 }
 0x5ce   : > { %p7610_p12 = pnand %p7609_p11, %p7772_p5  ;;  %p7617_p2 = por %p7616_p1, %p7615_p0 }
 0x5d0   : > { %p7611_p13 = pneg %p7610_p12 }
 0x5d2   : > { %p7618_p3 = pnand %p7617_p2, %p7611_p13 }
 0x638   : > { %v7438_v1 = vpop.permute.xlu1 %7437 }
 0x639   : > { %v7440_v47 = vunpack.i.h.bf16 %v7438_v1  ;;  %v7439_v26 = vunpack.i.l.bf16 %v7438_v1 }
 0x63a   : > { %v7443_v34 = vpop.permute.xlu0 %7442 }
 0x63b   : > { %v5609_v22 = vsel %vm1740_vm4, %v5527_v3, %v7440_v47  ;;  %v7445_v8 = vunpack.i.h.bf16 %v7443_v34  ;;  %v7444_v6 = vunpack.i.l.bf16 %v7443_v34  ;;  %v5610_v42 = vsel %vm1740_vm4, %v5547_v19, %v7439_v26 }
 0x63c   : > { %v5613_v23 = vpack.c.bf16 %v5609_v22, %v5609_v22  ;;  %v5614_v56 = vpack.c.bf16 %v5610_v42, %v5610_v42 }
 0x63d   : > { %v5611_v21 = vsel %vm1740_vm4, %v5567_v13, %v7445_v8  ;;  %v5612_v39 = vsel %vm1740_vm4, %v5587_v44, %v7444_v6 }
 0x63e   : > { %v5615_v29 = vpack.c.bf16 %v5611_v21, %v5611_v21  ;;  %5941 = vmatprep.mubr.bf16.mxu1 %v5614_v56  ;;  %v5616_v63 = vpack.c.bf16 %v5612_v39, %v5612_v39 }
 0x63f   : > { %5942 = vmatmul.mubr.bf16.vlgmr.msra.gmra.mrb[40].mxu1 %v5613_v23 }
 0x640   : > { %6654 = vmatpush3.bf16.msra.mxu1 %v7568_v41  ;;  %5981 = vmatprep.mubr.bf16.mxu0 %v5616_v63 }
 0x641   : > { %5982 = vmatmul.mubr.bf16.vlgmr.msra.gmra.mrb[44].mxu0 %v5615_v29  ;;  %6655 = vmatprep.subr.bf16.mxu1 %v7672_v0 }
 0x642   : > { %6661 = vmatprep.mubr.msk.bf16.mxu1 %vm7682_vm0, %v7672_v0 }
 0x644   : > { %6656 = vmatpush3.bf16.msra.mxu1 %v7570_v14 }
 0x645   : > { %6657 = vmatprep.subr.bf16.mxu1 %v7672_v0 }
 0x648   : > { %6658 = vmatpush3.bf16.msra.mxu1 %v7571_v5 }
 0x649   : > { %6659 = vmatprep.subr.bf16.mxu1 %v7672_v0  ;;  %v6370_v0 = vld [vmem:[%s10140_s8] ss:$0 sm:$0xff] }
 0x64c   : > { %6660 = vmatpush3.bf16.msra.mxu1 %v7572_v2 }
 0x64f   : > { %6662 = vmatmul.mubr.msk.bf16.vlgmr.msra.gmra.mrb[44].mxu1 %vm1740_vm4, %v5617_v51  ;;  %vm6050_vm4 = vcmask 516096  }
 0x712   : > { %v6550_v37 = vpop.f32.mrb[40].mxu1 }
 0x713   : > { %v6551_v30 = vpop.f32.mrb[41].mxu1 }
 0x714   : > { %v6552_v52 = vadd.f32 %v6551_v30, %v6550_v37  ;;  %v6553_v62 = vpop.f32.mrb[42].mxu1  ;;  %v6572_v60 = vpop.f32.mrb[44].mxu0 }
 0x715   : > { %v6554_v4 = vpop.f32.mrb[43].mxu1  ;;  %v6573_v59 = vpop.f32.mrb[45].mxu0 }
 0x716   : > { %v6574_v25 = vadd.f32 %v6573_v59, %v6572_v60  ;;  %v6575_v38 = vpop.f32.mrb[46].mxu0 }
 0x717   : > { %v6576_v27 = vpop.f32.mrb[47].mxu0 }
 0x718   : > { %v5984_v7 = vadd.f32 %v6574_v25, %v6552_v52 }
 0x722   : > { %v6023_v40 = vpop.f32.mrb[44].mxu1 }
 0x723   : > { %v6024_v33 = vadd.f32 %v6023_v40, %v5984_v7  ;;  %v6663_v54 = vpop.f32.mrb[45].mxu1 }
 0x724   : > { %v6026_v20 = vpop.f32.mrb[46].mxu1 }
 0x725   : > { %v6034_v48 = vmul.f32 %v6370_v0, %v6024_v33  ;;  %v6664_v9 = vpop.f32.mrb[47].mxu1 }
 0x727   : > { %v6040_v53 = vadd.f32 %v6371_v12, %v6034_v48 }
 0x729   : > { %v6041_v28 = vmax.f32 %v6040_v53, 0.0 }
 0x72b   : > { %v6042_v43 = vsel %vm4798_vm3, %v6041_v28, 0.0 }
 0x72c   : > { %v6043_v58 = vrot.slane %v6042_v43, 4 }
 0x72e   : > { %v6044_v11 = vadd.f32 %v6043_v58, %v6042_v43 }
 0x730   : > { %v6045_v17 = vrot.slane %v6044_v11, 2 }
 0x732   : > { %v6046_v16 = vadd.f32 %v6045_v17, %v6044_v11 }
 0x734   : > { %v6047_v24 = vrot.slane %v6046_v16, 1 }
 0x736   : > { %v6048_v57 = vadd.f32 %v6047_v24, %v6046_v16 }
 0x738   : > { %v6049_v31 = vmul.f32 0.25, %v6048_v57 }
 0x73a   : > { %6051 = vst.msk [vmem:[%s324_s24] sm:$0x1] %vm6050_vm4, %v6049_v31 }
 0x73b   : > { %7621 = shalt.err (!%p7618_p3)
}
 0x73c   : > { %s7622_s28 = scalar_lea.hbm %s10090_s23, 16  ;;  %s7626_s24 = scalar_lea.hbm %s10141_s9, 32 }
 0x73d   : > { %p7623_p4 = scmp.ne.s32.totalorder %s10090_s23, %s7622_s28  ;;  %p7627_p9 = scmp.lt.u32.totalorder %s10090_s23, %s10141_s9 }
 0x73e   : > { %p7628_p10 = scmp.lt.u32.totalorder %s7626_s24, %s7622_s28  ;;  %p7630_p12 = scmp.lt.u32.totalorder %s7622_s28, %s10090_s23 }
 0x73f   : > { %p7624_p7 = pnand %p7623_p4, %p7772_p5 }
 0x740   : > { %p7629_p11 = por %p7628_p10, %p7627_p9 }
 0x741   : > { %p7625_p8 = pneg %p7624_p7 }
 0x742   : > { %p7631_p13 = por %p7630_p12, %p7629_p11 }
 0x744   : > { %p7632_p0 = pnand %p7631_p13, %p7625_p8 }
 0x746   : > { %7635 = shalt.err (!%p7632_p0)
}
 0x747   : > { %6666 = dma.vmem_to_hbm [thread:$0]  (%p7772_p5), %s10092_s14, 16, %s10090_s23, %s6053_s29  }
 0x748 PF: > { %p6672_p1 = scmp.ge.s32.totalorder %s7670_s12, 2  ;;  %s6077_s25 = sand.u32 1, %s7658_s30  }
 0x749   : > { %s6078_s13 = scalar_lea.sflag [#allocation7], %s6077_s25 }
 0x74a   : > { %p6669_p2 = pnand %p6672_p1, %p7776_p6 }
 0x74c   : > { %7653 = dma.done.wait (!%p6669_p2), %s6078_s13, 16  }
 0x74d   : > { %7655 = vsyncadd (!%p6669_p2), %s6078_s13, 4294967280  ;;  %p19_p3 = scmp.ge.s32.totalorder %s7759_s15, 4   ;;  %s10150_s30 = smov %s7662_s10 }
 0x74e   : > { %s10151_s10 = smov %s7666_s11  ;;  %s10152_s11 = smov %s7770_s18 }
 0x74f   : > { %s10153_s12 = smov %s7759_s15  ;;  %21 = sbr.rel (!%p19_p3) target bundleno = 3 (0x3), region = 95 }
 0x756   :  { %6082 = vsyncpa [#allocation7], 1 }
 0x757   :  { %6084 = vsyncpa [#allocation7 + $0x1], 1 }

</bundles_post_ra>
